<compile_context>
chip_gen: v6e
topology: v6e:2x2x1
jax: 0.10.0
libtpu: 0.0.40
codegen_flags: <defaults>
</compile_context>

<pallas_src>
import functools

import jax
import jax.numpy as jnp
from jax.experimental import pallas as pl
from jax.experimental.pallas import tpu as pltpu


# ---------------------------------------------------------------------------
# Fused Pallas kernel: entire GraphWTorchNet forward for one instance
# ---------------------------------------------------------------------------

def _fused_forward_kernel(*refs, num_graph, num_dense):
    """refs = (x, adj, batch,
               graph_w[0..num_graph-1]   each (2, cin, cout) bf16,
               dense_w[0..num_dense-1]   each (cin, cout)    bf16,
               w_out                     (cin, num_classes)  bf16,
               bias_slab                 (num_layers, 512)   f32,
               out_ref)"""
    x_ref, adj_ref, batch_ref = refs[0], refs[1], refs[2]
    graph_w = refs[3:3 + num_graph]
    dense_w = refs[3 + num_graph:3 + num_graph + num_dense]
    w_out_ref = refs[3 + num_graph + num_dense]
    bias_ref = refs[4 + num_graph + num_dense]
    out_ref = refs[-1]

    adj = adj_ref[...].astype(jnp.bfloat16)   # 0/1 entries: exact in bf16
    x = x_ref[...]                             # (N, F) f32

    # --- graph conv stack: relu( x @ W_root + (adj @ x) @ W_rel + b ) -------
    for li in range(num_graph):
        w_ref = graph_w[li]                    # (2, cin, cout) bf16
        cout = w_ref.shape[2]
        b = bias_ref[li:li + 1, :cout]         # (1, cout) f32, static slice

        xb = x.astype(jnp.bfloat16)
        ax = jnp.dot(adj, xb,
                     preferred_element_type=jnp.float32).astype(jnp.bfloat16)
        node = jnp.dot(xb, w_ref[0], preferred_element_type=jnp.float32)
        rel = jnp.dot(ax, w_ref[1], preferred_element_type=jnp.float32)
        x = jnp.maximum(node + rel + b, 0.0)

    # --- global pooling: x = batch @ x ---------------------------------------
    x = jnp.dot(batch_ref[...].astype(jnp.bfloat16), x.astype(jnp.bfloat16),
                preferred_element_type=jnp.float32)

    # --- MLP head -------------------------------------------------------------
    for li in range(num_dense):
        w = dense_w[li][...]                   # (cin, cout) bf16
        cout = w.shape[1]
        b = bias_ref[num_graph + li:num_graph + li + 1, :cout]
        x = jnp.maximum(
            jnp.dot(x.astype(jnp.bfloat16), w,
                    preferred_element_type=jnp.float32) + b, 0.0)

    # --- output layer (no activation) ----------------------------------------
    w_out = w_out_ref[...]
    cout = w_out.shape[1]
    b = bias_ref[num_graph + num_dense:num_graph + num_dense + 1, :cout]
    out_ref[...] = jnp.dot(x.astype(jnp.bfloat16), w_out,
                           preferred_element_type=jnp.float32) + b


# ---------------------------------------------------------------------------
# Cost estimate (advisory)
# ---------------------------------------------------------------------------

def _cost_estimate(packed, x, adj, batch_mat, num_classes):
    G, N, F = x.shape
    B = batch_mat.shape[1]
    flops = 0
    feat = F
    for w in packed["graph_w"]:
        _, cin, cout = w.shape
        flops += 2 * N * N * cin            # adj @ x
        flops += 2 * 2 * N * cin * cout     # root + rel matmuls
        feat = cout
    flops += 2 * B * N * feat               # pooling
    for w in packed["dense_w"]:
        cin, cout = w.shape
        flops += 2 * B * cin * cout
    cin, cout = packed["w_out"].shape
    flops += 2 * B * cin * cout
    flops *= G

    weight_bytes = sum(int(a.size) * a.dtype.itemsize
                       for a in jax.tree_util.tree_leaves(packed))
    act_bytes = (int(x.size) + int(adj.size) + int(batch_mat.size)) * 4
    act_bytes += G * B * num_classes * 4
    return pl.CostEstimate(flops=flops, transcendentals=0,
                           bytes_accessed=weight_bytes + act_bytes)


# ---------------------------------------------------------------------------
# Wrapper: grid over instances, weights VMEM-resident via constant index_map
# ---------------------------------------------------------------------------

def graph_net_forward(packed, x, adj, batch_mat):
    """x: (G, N, F), adj: (G, N, N), batch_mat: (G, B, N) -> (G, B, classes).
    Also accepts single-instance 2-D inputs (module semantics)."""
    single = x.ndim == 2
    if single:
        x, adj, batch_mat = x[None], adj[None], batch_mat[None]

    G, N, F = x.shape
    B = batch_mat.shape[1]

    graph_w = packed["graph_w"]
    dense_w = packed["dense_w"]
    flat = list(graph_w) + list(dense_w) + [packed["w_out"], packed["bias"]]
    num_classes = packed["w_out"].shape[1]
    ng, nd = len(graph_w), len(dense_w)

    kernel = functools.partial(_fused_forward_kernel,
                               num_graph=ng, num_dense=nd)

    def const_spec(arr):
        # Full-array block, constant block index -> DMA'd once, VMEM-resident
        # across all grid steps.
        return pl.BlockSpec(arr.shape, lambda i, _nd=arr.ndim: (0,) * _nd)

    out = pl.pallas_call(
        kernel,
        out_shape=jax.ShapeDtypeStruct((G, B, num_classes), jnp.float32),
        grid=(G,),
        in_specs=[
            pl.BlockSpec((None, N, F), lambda i: (i, 0, 0)),
            pl.BlockSpec((None, N, N), lambda i: (i, 0, 0)),
            pl.BlockSpec((None, B, N), lambda i: (i, 0, 0)),
        ] + [const_spec(w) for w in flat],
        out_specs=pl.BlockSpec((None, B, num_classes), lambda i: (i, 0, 0)),
        compiler_params=pltpu.CompilerParams(
            dimension_semantics=("parallel",),
            vmem_limit_bytes=32 * 1024 * 1024),
        cost_estimate=_cost_estimate(packed, x, adj, batch_mat, num_classes),
    )(x, adj, batch_mat, *flat)

    return out[0] if single else out


# ---------------------------------------------------------------------------
# Parameters (deterministic, PyTorch-Linear-style uniform init) + packing
# ---------------------------------------------------------------------------

def init_params(key,
                num_node_features=5,
                hidden_channels_GCN=(32, 128, 256, 512, 512, 256, 256),
                hidden_channels_MLP=(256, 128, 64),
                num_classes=1):
    params = {"graph": [], "dense": []}

    gcn_channels = [num_node_features] + list(hidden_channels_GCN)
    for cin, cout in zip(gcn_channels[:-1], gcn_channels[1:]):
        key, k1, k2, k3 = jax.random.split(key, 4)
        scale = 1.0 / jnp.sqrt(float(cin))
        params["graph"].append(dict(
            w_root=jax.random.uniform(k1, (cin, cout), jnp.float32, -scale, scale),
            w_rel=jax.random.uniform(k2, (cin, cout), jnp.float32, -scale, scale),
            b_rel=jax.random.uniform(k3, (1, cout), jnp.float32, -scale, scale),
        ))

    mlp_channels = list(hidden_channels_GCN[-1:]) + list(hidden_channels_MLP)
    for cin, cout in zip(mlp_channels[:-1], mlp_channels[1:]):
        key, k1, k2 = jax.random.split(key, 3)
        scale = 1.0 / jnp.sqrt(float(cin))
        params["dense"].append(dict(
            w=jax.random.uniform(k1, (cin, cout), jnp.float32, -scale, scale),
            b=jax.random.uniform(k2, (1, cout), jnp.float32, -scale, scale),
        ))

    key, k1, k2 = jax.random.split(key, 3)
    cin = hidden_channels_MLP[-1]
    scale = 1.0 / jnp.sqrt(float(cin))
    params["out"] = dict(
        w=jax.random.uniform(k1, (cin, num_classes), jnp.float32, -scale, scale),
        b=jax.random.uniform(k2, (1, num_classes), jnp.float32, -scale, scale),
    )
    return params


def pack_params(params):
    """One-time packing (do OUTSIDE jit so the bf16 cast is not paid per call)."""
    graph_w = tuple(
        jnp.stack([p["w_root"], p["w_rel"]], axis=0).astype(jnp.bfloat16)
        for p in params["graph"])
    dense_w = tuple(p["w"].astype(jnp.bfloat16) for p in params["dense"])
    w_out = params["out"]["w"].astype(jnp.bfloat16)

    biases = ([p["b_rel"] for p in params["graph"]]
              + [p["b"] for p in params["dense"]]
              + [params["out"]["b"]])
    width = max(b.shape[1] for b in biases)
    width = ((width + 127) // 128) * 128
    bias_slab = jnp.concatenate(
        [jnp.pad(b, ((0, 0), (0, width - b.shape[1]))) for b in biases],
        axis=0).astype(jnp.float32)

    return dict(graph_w=graph_w, dense_w=dense_w, w_out=w_out, bias=bias_slab)


# ---------------------------------------------------------------------------
# Pure-JAX reference (mirrors GraphWTorchNet.forward; matmul_dtype controls
# whether the matmul operands are quantized to bf16 exactly like the kernel)
# ---------------------------------------------------------------------------

def reference_forward(params, x, adj, batch_mat, *, matmul_dtype=jnp.float32):
    def mm(a, b):
        return jnp.dot(a.astype(matmul_dtype), b.astype(matmul_dtype),
                       preferred_element_type=jnp.float32)

    for p in params["graph"]:
        node = mm(x, p["w_root"])
        rel = mm(mm(adj, x), p["w_rel"]) + p["b_rel"]
        x = jnp.maximum(node + rel, 0.0)
    x = mm(batch_mat, x)
    for p in params["dense"]:
        x = jnp.maximum(mm(x, p["w"]) + p["b"], 0.0)
    return mm(x, params["out"]["w"]) + params["out"]["b"]


# ---------------------------------------------------------------------------
# Main
# ---------------------------------------------------------------------------

if __name__ == "__main__":
    key = jax.random.PRNGKey(0)
    kp, kx, ka = jax.random.split(key, 3)

    N, F, B, G = 16, 5, 2, 4  # 16 nodes, 5 features, 2 graphs/instance, 4 instances
    params = init_params(kp, num_node_features=F)
    packed = pack_params(params)   # bf16 weights + bias slab, packed once

    xs = jax.random.normal(kx, (G, N, F), jnp.float32)

    # symmetric 0/1 adjacency matrices
    adjs = (jax.random.uniform(ka, (G, N, N)) < 0.3).astype(jnp.float32)
    adjs = jnp.maximum(adjs, jnp.swapaxes(adjs, -1, -2))

    # batch pooling matrix: graph 0 mean-pools nodes 0..7, graph 1 nodes 8..15
    batch_mat = jnp.zeros((B, N), jnp.float32)
    batch_mat = batch_mat.at[0, : N // 2].set(1.0 / (N // 2))
    batch_mat = batch_mat.at[1, N // 2:].set(1.0 / (N // 2))
    batch_mats = jnp.tile(batch_mat[None], (G, 1, 1))

    fwd = jax.jit(graph_net_forward)
    out = jax.block_until_ready(fwd(packed, xs, adjs, batch_mats))
    assert out.shape == (G, B, 1), out.shape

    # Compare against a reference that applies the same bf16 weight/operand
    # quantization (both sides use MXU bf16 inputs + f32 accumulation, so
    # differences are only accumulation-order rounding).
    for g in range(G):
        ref = reference_forward(params, xs[g], adjs[g], batch_mats[g],
                                matmul_dtype=jnp.bfloat16)
        assert jnp.allclose(out[g], ref, atol=2e-3, rtol=2e-3), (g, out[g], ref)

    print("KERNEL_OK")
</pallas_src>

<mosaic_0001>
module attributes {stable_mosaic.version = 11 : i64} {
  func.func @_fused_forward_kernel(%arg0: i32, %arg1: memref<1x16x5xf32, #tpu.memory_space<vmem>>, %arg2: memref<1x16x16xf32, #tpu.memory_space<vmem>>, %arg3: memref<1x2x16xf32, #tpu.memory_space<vmem>>, %arg4: memref<2x5x32xbf16, #tpu.memory_space<vmem>>, %arg5: memref<2x32x128xbf16, #tpu.memory_space<vmem>>, %arg6: memref<2x128x256xbf16, #tpu.memory_space<vmem>>, %arg7: memref<2x256x512xbf16, #tpu.memory_space<vmem>>, %arg8: memref<2x512x512xbf16, #tpu.memory_space<vmem>>, %arg9: memref<2x512x256xbf16, #tpu.memory_space<vmem>>, %arg10: memref<2x256x256xbf16, #tpu.memory_space<vmem>>, %arg11: memref<256x256xbf16, #tpu.memory_space<vmem>>, %arg12: memref<256x128xbf16, #tpu.memory_space<vmem>>, %arg13: memref<128x64xbf16, #tpu.memory_space<vmem>>, %arg14: memref<64x1xbf16, #tpu.memory_space<vmem>>, %arg15: memref<11x512xf32, #tpu.memory_space<vmem>>, %arg16: memref<1x2x1xf32, #tpu.memory_space<vmem>>) attributes {dimension_semantics = [#tpu.dimension_semantics<parallel>], iteration_bounds = array<i64: 4>, scalar_prefetch = 0 : i64, scratch_operands = 0 : i64, tpu.core_type = #tpu.core_type<tc>, window_params = [{transform_indices = @transform_0, window_bounds = array<i64: 1, 16, 5>}, {transform_indices = @transform_1, window_bounds = array<i64: 1, 16, 16>}, {transform_indices = @transform_2, window_bounds = array<i64: 1, 2, 16>}, {pipeline_mode = #tpu.pipeline_mode<synchronous>, transform_indices = @transform_3, window_bounds = array<i64: 2, 5, 32>}, {pipeline_mode = #tpu.pipeline_mode<synchronous>, transform_indices = @transform_4, window_bounds = array<i64: 2, 32, 128>}, {pipeline_mode = #tpu.pipeline_mode<synchronous>, transform_indices = @transform_5, window_bounds = array<i64: 2, 128, 256>}, {pipeline_mode = #tpu.pipeline_mode<synchronous>, transform_indices = @transform_6, window_bounds = array<i64: 2, 256, 512>}, {pipeline_mode = #tpu.pipeline_mode<synchronous>, transform_indices = @transform_7, window_bounds = array<i64: 2, 512, 512>}, {pipeline_mode = #tpu.pipeline_mode<synchronous>, transform_indices = @transform_8, window_bounds = array<i64: 2, 512, 256>}, {pipeline_mode = #tpu.pipeline_mode<synchronous>, transform_indices = @transform_9, window_bounds = array<i64: 2, 256, 256>}, {pipeline_mode = #tpu.pipeline_mode<synchronous>, transform_indices = @transform_10, window_bounds = array<i64: 256, 256>}, {pipeline_mode = #tpu.pipeline_mode<synchronous>, transform_indices = @transform_11, window_bounds = array<i64: 256, 128>}, {pipeline_mode = #tpu.pipeline_mode<synchronous>, transform_indices = @transform_12, window_bounds = array<i64: 128, 64>}, {pipeline_mode = #tpu.pipeline_mode<synchronous>, transform_indices = @transform_13, window_bounds = array<i64: 64, 1>}, {pipeline_mode = #tpu.pipeline_mode<synchronous>, transform_indices = @transform_14, window_bounds = array<i64: 11, 512>}, {transform_indices = @transform_15, window_bounds = array<i64: 1, 2, 1>}]} {
    %c0 = arith.constant 0 : index
    %c0_0 = arith.constant 0 : index
    %c0_1 = arith.constant 0 : index
    %0 = vector.load %arg2[%c0, %c0_0, %c0_1] : memref<1x16x16xf32, #tpu.memory_space<vmem>>, vector<1x16x16xf32>
    %1 = vector.shape_cast %0 : vector<1x16x16xf32> to vector<16x16xf32>
    %2 = arith.truncf %1 : vector<16x16xf32> to vector<16x16xbf16>
    %c0_2 = arith.constant 0 : index
    %c0_3 = arith.constant 0 : index
    %c0_4 = arith.constant 0 : index
    %3 = vector.load %arg1[%c0_2, %c0_3, %c0_4] : memref<1x16x5xf32, #tpu.memory_space<vmem>>, vector<1x16x5xf32>
    %4 = vector.shape_cast %3 : vector<1x16x5xf32> to vector<16x5xf32>
    %c0_5 = arith.constant 0 : index
    %c0_6 = arith.constant 0 : index
    %5 = vector.load %arg15[%c0_5, %c0_6] : memref<11x512xf32, #tpu.memory_space<vmem>>, vector<1x32xf32>
    %6 = arith.truncf %4 : vector<16x5xf32> to vector<16x5xbf16>
    %cst = arith.constant dense<0.000000e+00> : vector<16x5xf32>
    %7 = tpu.matmul %2, %6, %cst {dimension_numbers = #tpu.dot_dimension_numbers<[1], [0], [0], [1], [0, 0, 1, 1], [], []>} : vector<16x16xbf16>, vector<16x5xbf16>, vector<16x5xf32> -> vector<16x5xf32>
    %8 = arith.truncf %7 : vector<16x5xf32> to vector<16x5xbf16>
    %c0_7 = arith.constant 0 : index
    %c0_8 = arith.constant 0 : index
    %c0_9 = arith.constant 0 : index
    %9 = vector.load %arg4[%c0_7, %c0_8, %c0_9] : memref<2x5x32xbf16, #tpu.memory_space<vmem>>, vector<1x5x32xbf16>
    %10 = vector.shape_cast %9 : vector<1x5x32xbf16> to vector<5x32xbf16>
    %cst_10 = arith.constant dense<0.000000e+00> : vector<16x32xf32>
    %11 = tpu.matmul %6, %10, %cst_10 {dimension_numbers = #tpu.dot_dimension_numbers<[1], [0], [0], [1], [0, 0, 1, 1], [], []>} : vector<16x5xbf16>, vector<5x32xbf16>, vector<16x32xf32> -> vector<16x32xf32>
    %c1 = arith.constant 1 : index
    %c0_11 = arith.constant 0 : index
    %c0_12 = arith.constant 0 : index
    %12 = vector.load %arg4[%c1, %c0_11, %c0_12] : memref<2x5x32xbf16, #tpu.memory_space<vmem>>, vector<1x5x32xbf16>
    %13 = vector.shape_cast %12 : vector<1x5x32xbf16> to vector<5x32xbf16>
    %cst_13 = arith.constant dense<0.000000e+00> : vector<16x32xf32>
    %14 = tpu.matmul %8, %13, %cst_13 {dimension_numbers = #tpu.dot_dimension_numbers<[1], [0], [0], [1], [0, 0, 1, 1], [], []>} : vector<16x5xbf16>, vector<5x32xbf16>, vector<16x32xf32> -> vector<16x32xf32>
    %15 = arith.addf %11, %14 : vector<16x32xf32>
    %16 = vector.broadcast %5 : vector<1x32xf32> to vector<16x32xf32>
    %17 = arith.addf %15, %16 : vector<16x32xf32>
    %cst_14 = arith.constant 0.000000e+00 : f32
    %18 = vector.broadcast %cst_14 : f32 to vector<16x32xf32>
    %19 = arith.maximumf %17, %18 : vector<16x32xf32>
    %c1_15 = arith.constant 1 : index
    %c0_16 = arith.constant 0 : index
    %20 = vector.load %arg15[%c1_15, %c0_16] : memref<11x512xf32, #tpu.memory_space<vmem>>, vector<1x128xf32>
    %21 = arith.truncf %19 : vector<16x32xf32> to vector<16x32xbf16>
    %cst_17 = arith.constant dense<0.000000e+00> : vector<16x32xf32>
    %22 = tpu.matmul %2, %21, %cst_17 {dimension_numbers = #tpu.dot_dimension_numbers<[1], [0], [0], [1], [0, 0, 1, 1], [], []>} : vector<16x16xbf16>, vector<16x32xbf16>, vector<16x32xf32> -> vector<16x32xf32>
    %23 = arith.truncf %22 : vector<16x32xf32> to vector<16x32xbf16>
    %c0_18 = arith.constant 0 : index
    %c0_19 = arith.constant 0 : index
    %c0_20 = arith.constant 0 : index
    %24 = vector.load %arg5[%c0_18, %c0_19, %c0_20] : memref<2x32x128xbf16, #tpu.memory_space<vmem>>, vector<1x32x128xbf16>
    %25 = vector.shape_cast %24 : vector<1x32x128xbf16> to vector<32x128xbf16>
    %cst_21 = arith.constant dense<0.000000e+00> : vector<16x128xf32>
    %26 = tpu.matmul %21, %25, %cst_21 {dimension_numbers = #tpu.dot_dimension_numbers<[1], [0], [0], [1], [0, 0, 1, 1], [], []>} : vector<16x32xbf16>, vector<32x128xbf16>, vector<16x128xf32> -> vector<16x128xf32>
    %c1_22 = arith.constant 1 : index
    %c0_23 = arith.constant 0 : index
    %c0_24 = arith.constant 0 : index
    %27 = vector.load %arg5[%c1_22, %c0_23, %c0_24] : memref<2x32x128xbf16, #tpu.memory_space<vmem>>, vector<1x32x128xbf16>
    %28 = vector.shape_cast %27 : vector<1x32x128xbf16> to vector<32x128xbf16>
    %cst_25 = arith.constant dense<0.000000e+00> : vector<16x128xf32>
    %29 = tpu.matmul %23, %28, %cst_25 {dimension_numbers = #tpu.dot_dimension_numbers<[1], [0], [0], [1], [0, 0, 1, 1], [], []>} : vector<16x32xbf16>, vector<32x128xbf16>, vector<16x128xf32> -> vector<16x128xf32>
    %30 = arith.addf %26, %29 : vector<16x128xf32>
    %31 = vector.broadcast %20 : vector<1x128xf32> to vector<16x128xf32>
    %32 = arith.addf %30, %31 : vector<16x128xf32>
    %cst_26 = arith.constant 0.000000e+00 : f32
    %33 = vector.broadcast %cst_26 : f32 to vector<16x128xf32>
    %34 = arith.maximumf %32, %33 : vector<16x128xf32>
    %c2 = arith.constant 2 : index
    %c0_27 = arith.constant 0 : index
    %35 = vector.load %arg15[%c2, %c0_27] : memref<11x512xf32, #tpu.memory_space<vmem>>, vector<1x256xf32>
    %36 = arith.truncf %34 : vector<16x128xf32> to vector<16x128xbf16>
    %cst_28 = arith.constant dense<0.000000e+00> : vector<16x128xf32>
    %37 = tpu.matmul %2, %36, %cst_28 {dimension_numbers = #tpu.dot_dimension_numbers<[1], [0], [0], [1], [0, 0, 1, 1], [], []>} : vector<16x16xbf16>, vector<16x128xbf16>, vector<16x128xf32> -> vector<16x128xf32>
    %38 = arith.truncf %37 : vector<16x128xf32> to vector<16x128xbf16>
    %c0_29 = arith.constant 0 : index
    %c0_30 = arith.constant 0 : index
    %c0_31 = arith.constant 0 : index
    %39 = vector.load %arg6[%c0_29, %c0_30, %c0_31] : memref<2x128x256xbf16, #tpu.memory_space<vmem>>, vector<1x128x256xbf16>
    %40 = vector.shape_cast %39 : vector<1x128x256xbf16> to vector<128x256xbf16>
    %cst_32 = arith.constant dense<0.000000e+00> : vector<16x256xf32>
    %41 = tpu.matmul %36, %40, %cst_32 {dimension_numbers = #tpu.dot_dimension_numbers<[1], [0], [0], [1], [0, 0, 1, 1], [], []>} : vector<16x128xbf16>, vector<128x256xbf16>, vector<16x256xf32> -> vector<16x256xf32>
    %c1_33 = arith.constant 1 : index
    %c0_34 = arith.constant 0 : index
    %c0_35 = arith.constant 0 : index
    %42 = vector.load %arg6[%c1_33, %c0_34, %c0_35] : memref<2x128x256xbf16, #tpu.memory_space<vmem>>, vector<1x128x256xbf16>
    %43 = vector.shape_cast %42 : vector<1x128x256xbf16> to vector<128x256xbf16>
    %cst_36 = arith.constant dense<0.000000e+00> : vector<16x256xf32>
    %44 = tpu.matmul %38, %43, %cst_36 {dimension_numbers = #tpu.dot_dimension_numbers<[1], [0], [0], [1], [0, 0, 1, 1], [], []>} : vector<16x128xbf16>, vector<128x256xbf16>, vector<16x256xf32> -> vector<16x256xf32>
    %45 = arith.addf %41, %44 : vector<16x256xf32>
    %46 = vector.broadcast %35 : vector<1x256xf32> to vector<16x256xf32>
    %47 = arith.addf %45, %46 : vector<16x256xf32>
    %cst_37 = arith.constant 0.000000e+00 : f32
    %48 = vector.broadcast %cst_37 : f32 to vector<16x256xf32>
    %49 = arith.maximumf %47, %48 : vector<16x256xf32>
    %c3 = arith.constant 3 : index
    %c0_38 = arith.constant 0 : index
    %50 = vector.load %arg15[%c3, %c0_38] : memref<11x512xf32, #tpu.memory_space<vmem>>, vector<1x512xf32>
    %51 = arith.truncf %49 : vector<16x256xf32> to vector<16x256xbf16>
    %cst_39 = arith.constant dense<0.000000e+00> : vector<16x256xf32>
    %52 = tpu.matmul %2, %51, %cst_39 {dimension_numbers = #tpu.dot_dimension_numbers<[1], [0], [0], [1], [0, 0, 1, 1], [], []>} : vector<16x16xbf16>, vector<16x256xbf16>, vector<16x256xf32> -> vector<16x256xf32>
    %53 = arith.truncf %52 : vector<16x256xf32> to vector<16x256xbf16>
    %c0_40 = arith.constant 0 : index
    %c0_41 = arith.constant 0 : index
    %c0_42 = arith.constant 0 : index
    %54 = vector.load %arg7[%c0_40, %c0_41, %c0_42] : memref<2x256x512xbf16, #tpu.memory_space<vmem>>, vector<1x256x512xbf16>
    %55 = vector.shape_cast %54 : vector<1x256x512xbf16> to vector<256x512xbf16>
    %cst_43 = arith.constant dense<0.000000e+00> : vector<16x512xf32>
    %56 = tpu.matmul %51, %55, %cst_43 {dimension_numbers = #tpu.dot_dimension_numbers<[1], [0], [0], [1], [0, 0, 1, 1], [], []>} : vector<16x256xbf16>, vector<256x512xbf16>, vector<16x512xf32> -> vector<16x512xf32>
    %c1_44 = arith.constant 1 : index
    %c0_45 = arith.constant 0 : index
    %c0_46 = arith.constant 0 : index
    %57 = vector.load %arg7[%c1_44, %c0_45, %c0_46] : memref<2x256x512xbf16, #tpu.memory_space<vmem>>, vector<1x256x512xbf16>
    %58 = vector.shape_cast %57 : vector<1x256x512xbf16> to vector<256x512xbf16>
    %cst_47 = arith.constant dense<0.000000e+00> : vector<16x512xf32>
    %59 = tpu.matmul %53, %58, %cst_47 {dimension_numbers = #tpu.dot_dimension_numbers<[1], [0], [0], [1], [0, 0, 1, 1], [], []>} : vector<16x256xbf16>, vector<256x512xbf16>, vector<16x512xf32> -> vector<16x512xf32>
    %60 = arith.addf %56, %59 : vector<16x512xf32>
    %61 = vector.broadcast %50 : vector<1x512xf32> to vector<16x512xf32>
    %62 = arith.addf %60, %61 : vector<16x512xf32>
    %cst_48 = arith.constant 0.000000e+00 : f32
    %63 = vector.broadcast %cst_48 : f32 to vector<16x512xf32>
    %64 = arith.maximumf %62, %63 : vector<16x512xf32>
    %c4 = arith.constant 4 : index
    %c0_49 = arith.constant 0 : index
    %65 = vector.load %arg15[%c4, %c0_49] : memref<11x512xf32, #tpu.memory_space<vmem>>, vector<1x512xf32>
    %66 = arith.truncf %64 : vector<16x512xf32> to vector<16x512xbf16>
    %cst_50 = arith.constant dense<0.000000e+00> : vector<16x512xf32>
    %67 = tpu.matmul %2, %66, %cst_50 {dimension_numbers = #tpu.dot_dimension_numbers<[1], [0], [0], [1], [0, 0, 1, 1], [], []>} : vector<16x16xbf16>, vector<16x512xbf16>, vector<16x512xf32> -> vector<16x512xf32>
    %68 = arith.truncf %67 : vector<16x512xf32> to vector<16x512xbf16>
    %c0_51 = arith.constant 0 : index
    %c0_52 = arith.constant 0 : index
    %c0_53 = arith.constant 0 : index
    %69 = vector.load %arg8[%c0_51, %c0_52, %c0_53] : memref<2x512x512xbf16, #tpu.memory_space<vmem>>, vector<1x512x512xbf16>
    %70 = vector.shape_cast %69 : vector<1x512x512xbf16> to vector<512x512xbf16>
    %cst_54 = arith.constant dense<0.000000e+00> : vector<16x512xf32>
    %71 = tpu.matmul %66, %70, %cst_54 {dimension_numbers = #tpu.dot_dimension_numbers<[1], [0], [0], [1], [0, 0, 1, 1], [], []>} : vector<16x512xbf16>, vector<512x512xbf16>, vector<16x512xf32> -> vector<16x512xf32>
    %c1_55 = arith.constant 1 : index
    %c0_56 = arith.constant 0 : index
    %c0_57 = arith.constant 0 : index
    %72 = vector.load %arg8[%c1_55, %c0_56, %c0_57] : memref<2x512x512xbf16, #tpu.memory_space<vmem>>, vector<1x512x512xbf16>
    %73 = vector.shape_cast %72 : vector<1x512x512xbf16> to vector<512x512xbf16>
    %cst_58 = arith.constant dense<0.000000e+00> : vector<16x512xf32>
    %74 = tpu.matmul %68, %73, %cst_58 {dimension_numbers = #tpu.dot_dimension_numbers<[1], [0], [0], [1], [0, 0, 1, 1], [], []>} : vector<16x512xbf16>, vector<512x512xbf16>, vector<16x512xf32> -> vector<16x512xf32>
    %75 = arith.addf %71, %74 : vector<16x512xf32>
    %76 = vector.broadcast %65 : vector<1x512xf32> to vector<16x512xf32>
    %77 = arith.addf %75, %76 : vector<16x512xf32>
    %cst_59 = arith.constant 0.000000e+00 : f32
    %78 = vector.broadcast %cst_59 : f32 to vector<16x512xf32>
    %79 = arith.maximumf %77, %78 : vector<16x512xf32>
    %c5 = arith.constant 5 : index
    %c0_60 = arith.constant 0 : index
    %80 = vector.load %arg15[%c5, %c0_60] : memref<11x512xf32, #tpu.memory_space<vmem>>, vector<1x256xf32>
    %81 = arith.truncf %79 : vector<16x512xf32> to vector<16x512xbf16>
    %cst_61 = arith.constant dense<0.000000e+00> : vector<16x512xf32>
    %82 = tpu.matmul %2, %81, %cst_61 {dimension_numbers = #tpu.dot_dimension_numbers<[1], [0], [0], [1], [0, 0, 1, 1], [], []>} : vector<16x16xbf16>, vector<16x512xbf16>, vector<16x512xf32> -> vector<16x512xf32>
    %83 = arith.truncf %82 : vector<16x512xf32> to vector<16x512xbf16>
    %c0_62 = arith.constant 0 : index
    %c0_63 = arith.constant 0 : index
    %c0_64 = arith.constant 0 : index
    %84 = vector.load %arg9[%c0_62, %c0_63, %c0_64] : memref<2x512x256xbf16, #tpu.memory_space<vmem>>, vector<1x512x256xbf16>
    %85 = vector.shape_cast %84 : vector<1x512x256xbf16> to vector<512x256xbf16>
    %cst_65 = arith.constant dense<0.000000e+00> : vector<16x256xf32>
    %86 = tpu.matmul %81, %85, %cst_65 {dimension_numbers = #tpu.dot_dimension_numbers<[1], [0], [0], [1], [0, 0, 1, 1], [], []>} : vector<16x512xbf16>, vector<512x256xbf16>, vector<16x256xf32> -> vector<16x256xf32>
    %c1_66 = arith.constant 1 : index
    %c0_67 = arith.constant 0 : index
    %c0_68 = arith.constant 0 : index
    %87 = vector.load %arg9[%c1_66, %c0_67, %c0_68] : memref<2x512x256xbf16, #tpu.memory_space<vmem>>, vector<1x512x256xbf16>
    %88 = vector.shape_cast %87 : vector<1x512x256xbf16> to vector<512x256xbf16>
    %cst_69 = arith.constant dense<0.000000e+00> : vector<16x256xf32>
    %89 = tpu.matmul %83, %88, %cst_69 {dimension_numbers = #tpu.dot_dimension_numbers<[1], [0], [0], [1], [0, 0, 1, 1], [], []>} : vector<16x512xbf16>, vector<512x256xbf16>, vector<16x256xf32> -> vector<16x256xf32>
    %90 = arith.addf %86, %89 : vector<16x256xf32>
    %91 = vector.broadcast %80 : vector<1x256xf32> to vector<16x256xf32>
    %92 = arith.addf %90, %91 : vector<16x256xf32>
    %cst_70 = arith.constant 0.000000e+00 : f32
    %93 = vector.broadcast %cst_70 : f32 to vector<16x256xf32>
    %94 = arith.maximumf %92, %93 : vector<16x256xf32>
    %c6 = arith.constant 6 : index
    %c0_71 = arith.constant 0 : index
    %95 = vector.load %arg15[%c6, %c0_71] : memref<11x512xf32, #tpu.memory_space<vmem>>, vector<1x256xf32>
    %96 = arith.truncf %94 : vector<16x256xf32> to vector<16x256xbf16>
    %cst_72 = arith.constant dense<0.000000e+00> : vector<16x256xf32>
    %97 = tpu.matmul %2, %96, %cst_72 {dimension_numbers = #tpu.dot_dimension_numbers<[1], [0], [0], [1], [0, 0, 1, 1], [], []>} : vector<16x16xbf16>, vector<16x256xbf16>, vector<16x256xf32> -> vector<16x256xf32>
    %98 = arith.truncf %97 : vector<16x256xf32> to vector<16x256xbf16>
    %c0_73 = arith.constant 0 : index
    %c0_74 = arith.constant 0 : index
    %c0_75 = arith.constant 0 : index
    %99 = vector.load %arg10[%c0_73, %c0_74, %c0_75] : memref<2x256x256xbf16, #tpu.memory_space<vmem>>, vector<1x256x256xbf16>
    %100 = vector.shape_cast %99 : vector<1x256x256xbf16> to vector<256x256xbf16>
    %cst_76 = arith.constant dense<0.000000e+00> : vector<16x256xf32>
    %101 = tpu.matmul %96, %100, %cst_76 {dimension_numbers = #tpu.dot_dimension_numbers<[1], [0], [0], [1], [0, 0, 1, 1], [], []>} : vector<16x256xbf16>, vector<256x256xbf16>, vector<16x256xf32> -> vector<16x256xf32>
    %c1_77 = arith.constant 1 : index
    %c0_78 = arith.constant 0 : index
    %c0_79 = arith.constant 0 : index
    %102 = vector.load %arg10[%c1_77, %c0_78, %c0_79] : memref<2x256x256xbf16, #tpu.memory_space<vmem>>, vector<1x256x256xbf16>
    %103 = vector.shape_cast %102 : vector<1x256x256xbf16> to vector<256x256xbf16>
    %cst_80 = arith.constant dense<0.000000e+00> : vector<16x256xf32>
    %104 = tpu.matmul %98, %103, %cst_80 {dimension_numbers = #tpu.dot_dimension_numbers<[1], [0], [0], [1], [0, 0, 1, 1], [], []>} : vector<16x256xbf16>, vector<256x256xbf16>, vector<16x256xf32> -> vector<16x256xf32>
    %105 = arith.addf %101, %104 : vector<16x256xf32>
    %106 = vector.broadcast %95 : vector<1x256xf32> to vector<16x256xf32>
    %107 = arith.addf %105, %106 : vector<16x256xf32>
    %cst_81 = arith.constant 0.000000e+00 : f32
    %108 = vector.broadcast %cst_81 : f32 to vector<16x256xf32>
    %109 = arith.maximumf %107, %108 : vector<16x256xf32>
    %c0_82 = arith.constant 0 : index
    %c0_83 = arith.constant 0 : index
    %c0_84 = arith.constant 0 : index
    %110 = vector.load %arg3[%c0_82, %c0_83, %c0_84] : memref<1x2x16xf32, #tpu.memory_space<vmem>>, vector<1x2x16xf32>
    %111 = vector.shape_cast %110 : vector<1x2x16xf32> to vector<2x16xf32>
    %112 = arith.truncf %111 : vector<2x16xf32> to vector<2x16xbf16>
    %113 = arith.truncf %109 : vector<16x256xf32> to vector<16x256xbf16>
    %cst_85 = arith.constant dense<0.000000e+00> : vector<2x256xf32>
    %114 = tpu.matmul %112, %113, %cst_85 {dimension_numbers = #tpu.dot_dimension_numbers<[1], [0], [0], [1], [0, 0, 1, 1], [], []>} : vector<2x16xbf16>, vector<16x256xbf16>, vector<2x256xf32> -> vector<2x256xf32>
    %c0_86 = arith.constant 0 : index
    %c0_87 = arith.constant 0 : index
    %115 = vector.load %arg11[%c0_86, %c0_87] : memref<256x256xbf16, #tpu.memory_space<vmem>>, vector<256x256xbf16>
    %c7 = arith.constant 7 : index
    %c0_88 = arith.constant 0 : index
    %116 = vector.load %arg15[%c7, %c0_88] : memref<11x512xf32, #tpu.memory_space<vmem>>, vector<1x256xf32>
    %117 = arith.truncf %114 : vector<2x256xf32> to vector<2x256xbf16>
    %cst_89 = arith.constant dense<0.000000e+00> : vector<2x256xf32>
    %118 = tpu.matmul %117, %115, %cst_89 {dimension_numbers = #tpu.dot_dimension_numbers<[1], [0], [0], [1], [0, 0, 1, 1], [], []>} : vector<2x256xbf16>, vector<256x256xbf16>, vector<2x256xf32> -> vector<2x256xf32>
    %119 = vector.broadcast %116 : vector<1x256xf32> to vector<2x256xf32>
    %120 = arith.addf %118, %119 : vector<2x256xf32>
    %cst_90 = arith.constant 0.000000e+00 : f32
    %121 = vector.broadcast %cst_90 : f32 to vector<2x256xf32>
    %122 = arith.maximumf %120, %121 : vector<2x256xf32>
    %c0_91 = arith.constant 0 : index
    %c0_92 = arith.constant 0 : index
    %123 = vector.load %arg12[%c0_91, %c0_92] : memref<256x128xbf16, #tpu.memory_space<vmem>>, vector<256x128xbf16>
    %c8 = arith.constant 8 : index
    %c0_93 = arith.constant 0 : index
    %124 = vector.load %arg15[%c8, %c0_93] : memref<11x512xf32, #tpu.memory_space<vmem>>, vector<1x128xf32>
    %125 = arith.truncf %122 : vector<2x256xf32> to vector<2x256xbf16>
    %cst_94 = arith.constant dense<0.000000e+00> : vector<2x128xf32>
    %126 = tpu.matmul %125, %123, %cst_94 {dimension_numbers = #tpu.dot_dimension_numbers<[1], [0], [0], [1], [0, 0, 1, 1], [], []>} : vector<2x256xbf16>, vector<256x128xbf16>, vector<2x128xf32> -> vector<2x128xf32>
    %127 = vector.broadcast %124 : vector<1x128xf32> to vector<2x128xf32>
    %128 = arith.addf %126, %127 : vector<2x128xf32>
    %cst_95 = arith.constant 0.000000e+00 : f32
    %129 = vector.broadcast %cst_95 : f32 to vector<2x128xf32>
    %130 = arith.maximumf %128, %129 : vector<2x128xf32>
    %c0_96 = arith.constant 0 : index
    %c0_97 = arith.constant 0 : index
    %131 = vector.load %arg13[%c0_96, %c0_97] : memref<128x64xbf16, #tpu.memory_space<vmem>>, vector<128x64xbf16>
    %c9 = arith.constant 9 : index
    %c0_98 = arith.constant 0 : index
    %132 = vector.load %arg15[%c9, %c0_98] : memref<11x512xf32, #tpu.memory_space<vmem>>, vector<1x64xf32>
    %133 = arith.truncf %130 : vector<2x128xf32> to vector<2x128xbf16>
    %cst_99 = arith.constant dense<0.000000e+00> : vector<2x64xf32>
    %134 = tpu.matmul %133, %131, %cst_99 {dimension_numbers = #tpu.dot_dimension_numbers<[1], [0], [0], [1], [0, 0, 1, 1], [], []>} : vector<2x128xbf16>, vector<128x64xbf16>, vector<2x64xf32> -> vector<2x64xf32>
    %135 = vector.broadcast %132 : vector<1x64xf32> to vector<2x64xf32>
    %136 = arith.addf %134, %135 : vector<2x64xf32>
    %cst_100 = arith.constant 0.000000e+00 : f32
    %137 = vector.broadcast %cst_100 : f32 to vector<2x64xf32>
    %138 = arith.maximumf %136, %137 : vector<2x64xf32>
    %c0_101 = arith.constant 0 : index
    %c0_102 = arith.constant 0 : index
    %139 = vector.load %arg14[%c0_101, %c0_102] : memref<64x1xbf16, #tpu.memory_space<vmem>>, vector<64x1xbf16>
    %c10 = arith.constant 10 : index
    %c0_103 = arith.constant 0 : index
    %140 = vector.load %arg15[%c10, %c0_103] : memref<11x512xf32, #tpu.memory_space<vmem>>, vector<1x1xf32>
    %141 = arith.truncf %138 : vector<2x64xf32> to vector<2x64xbf16>
    %cst_104 = arith.constant dense<0.000000e+00> : vector<2x1xf32>
    %142 = tpu.matmul %141, %139, %cst_104 {dimension_numbers = #tpu.dot_dimension_numbers<[1], [0], [0], [1], [0, 0, 1, 1], [], []>} : vector<2x64xbf16>, vector<64x1xbf16>, vector<2x1xf32> -> vector<2x1xf32>
    %143 = vector.broadcast %140 : vector<1x1xf32> to vector<2x1xf32>
    %144 = arith.addf %142, %143 : vector<2x1xf32>
    %c0_105 = arith.constant 0 : index
    %c0_106 = arith.constant 0 : index
    %c0_107 = arith.constant 0 : index
    %145 = vector.load %arg16[%c0_105, %c0_106, %c0_107] : memref<1x2x1xf32, #tpu.memory_space<vmem>>, vector<1x2x1xf32>
    %146 = vector.shape_cast %145 : vector<1x2x1xf32> to vector<2x1xf32>
    %147 = vector.shape_cast %144 : vector<2x1xf32> to vector<1x2x1xf32>
    tpu.vector_store %arg16[%c0_105, %c0_106, %c0_107], %147 {strides = array<i32>} : memref<1x2x1xf32, #tpu.memory_space<vmem>>, vector<1x2x1xf32>,
    return
  }
  func.func @transform_0(%arg0: i32) -> (i32, i32, i32) {
    %c0_i32 = arith.constant 0 : i32
    %c0_i32_0 = arith.constant 0 : i32
    %c0_i32_1 = arith.constant 0 : i32
    return %arg0, %c0_i32, %c0_i32_0 : i32, i32, i32
  }
  func.func @transform_1(%arg0: i32) -> (i32, i32, i32) {
    %c0_i32 = arith.constant 0 : i32
    %c0_i32_0 = arith.constant 0 : i32
    %c0_i32_1 = arith.constant 0 : i32
    return %arg0, %c0_i32, %c0_i32_0 : i32, i32, i32
  }
  func.func @transform_2(%arg0: i32) -> (i32, i32, i32) {
    %c0_i32 = arith.constant 0 : i32
    %c0_i32_0 = arith.constant 0 : i32
    %c0_i32_1 = arith.constant 0 : i32
    return %arg0, %c0_i32, %c0_i32_0 : i32, i32, i32
  }
  func.func @transform_3(%arg0: i32) -> (i32, i32, i32) {
    %c0_i32 = arith.constant 0 : i32
    %c0_i32_0 = arith.constant 0 : i32
    %c0_i32_1 = arith.constant 0 : i32
    %c0_i32_2 = arith.constant 0 : i32
    return %c0_i32, %c0_i32_0, %c0_i32_1 : i32, i32, i32
  }
  func.func @transform_4(%arg0: i32) -> (i32, i32, i32) {
    %c0_i32 = arith.constant 0 : i32
    %c0_i32_0 = arith.constant 0 : i32
    %c0_i32_1 = arith.constant 0 : i32
    %c0_i32_2 = arith.constant 0 : i32
    return %c0_i32, %c0_i32_0, %c0_i32_1 : i32, i32, i32
  }
  func.func @transform_5(%arg0: i32) -> (i32, i32, i32) {
    %c0_i32 = arith.constant 0 : i32
    %c0_i32_0 = arith.constant 0 : i32
    %c0_i32_1 = arith.constant 0 : i32
    %c0_i32_2 = arith.constant 0 : i32
    return %c0_i32, %c0_i32_0, %c0_i32_1 : i32, i32, i32
  }
  func.func @transform_6(%arg0: i32) -> (i32, i32, i32) {
    %c0_i32 = arith.constant 0 : i32
    %c0_i32_0 = arith.constant 0 : i32
    %c0_i32_1 = arith.constant 0 : i32
    %c0_i32_2 = arith.constant 0 : i32
    return %c0_i32, %c0_i32_0, %c0_i32_1 : i32, i32, i32
  }
  func.func @transform_7(%arg0: i32) -> (i32, i32, i32) {
    %c0_i32 = arith.constant 0 : i32
    %c0_i32_0 = arith.constant 0 : i32
    %c0_i32_1 = arith.constant 0 : i32
    %c0_i32_2 = arith.constant 0 : i32
    return %c0_i32, %c0_i32_0, %c0_i32_1 : i32, i32, i32
  }
  func.func @transform_8(%arg0: i32) -> (i32, i32, i32) {
    %c0_i32 = arith.constant 0 : i32
    %c0_i32_0 = arith.constant 0 : i32
    %c0_i32_1 = arith.constant 0 : i32
    %c0_i32_2 = arith.constant 0 : i32
    return %c0_i32, %c0_i32_0, %c0_i32_1 : i32, i32, i32
  }
  func.func @transform_9(%arg0: i32) -> (i32, i32, i32) {
    %c0_i32 = arith.constant 0 : i32
    %c0_i32_0 = arith.constant 0 : i32
    %c0_i32_1 = arith.constant 0 : i32
    %c0_i32_2 = arith.constant 0 : i32
    return %c0_i32, %c0_i32_0, %c0_i32_1 : i32, i32, i32
  }
  func.func @transform_10(%arg0: i32) -> (i32, i32) {
    %c0_i32 = arith.constant 0 : i32
    %c0_i32_0 = arith.constant 0 : i32
    %c0_i32_1 = arith.constant 0 : i32
    return %c0_i32, %c0_i32_0 : i32, i32
  }
  func.func @transform_11(%arg0: i32) -> (i32, i32) {
    %c0_i32 = arith.constant 0 : i32
    %c0_i32_0 = arith.constant 0 : i32
    %c0_i32_1 = arith.constant 0 : i32
    return %c0_i32, %c0_i32_0 : i32, i32
  }
  func.func @transform_12(%arg0: i32) -> (i32, i32) {
    %c0_i32 = arith.constant 0 : i32
    %c0_i32_0 = arith.constant 0 : i32
    %c0_i32_1 = arith.constant 0 : i32
    return %c0_i32, %c0_i32_0 : i32, i32
  }
  func.func @transform_13(%arg0: i32) -> (i32, i32) {
    %c0_i32 = arith.constant 0 : i32
    %c0_i32_0 = arith.constant 0 : i32
    %c0_i32_1 = arith.constant 0 : i32
    return %c0_i32, %c0_i32_0 : i32, i32
  }
  func.func @transform_14(%arg0: i32) -> (i32, i32) {
    %c0_i32 = arith.constant 0 : i32
    %c0_i32_0 = arith.constant 0 : i32
    %c0_i32_1 = arith.constant 0 : i32
    return %c0_i32, %c0_i32_0 : i32, i32
  }
  func.func @transform_15(%arg0: i32) -> (i32, i32, i32) {
    %c0_i32 = arith.constant 0 : i32
    %c0_i32_0 = arith.constant 0 : i32
    %c0_i32_1 = arith.constant 0 : i32
    return %arg0, %c0_i32, %c0_i32_0 : i32, i32, i32
  }
}

</mosaic_0001>

<bundles_post_ra>
// kernel: graph_net_forward.1
= control target key start
LH: loop header
LB: loop body
LE: loop exit
PB: predicated region body
PF: predicated region fallthrough
CT: control target
= control target key end

     0   :  { %s9645_s0 = inlined_call_operand.vmem [shape: f32[4,16,5], index: 0, kind: input, shape index: {}]   ;;  %s9646_s1 = inlined_call_operand.vmem [shape: f32[4,16,16], index: 1, kind: input, shape index: {}]   ;;  %s9647_s2 = inlined_call_operand.hbm [shape: f32[4,2,16], index: 2, kind: input, shape index: {}]   ;;  %s9648_s3 = inlined_call_operand.vmem [shape: bf16[2,5,32], index: 3, kind: input, shape index: {}]   ;;  %s9649_s4 = inlined_call_operand.hbm [shape: bf16[2,32,128], index: 4, kind: input, shape index: {}]   ;;  %s9650_s5 = inlined_call_operand.hbm [shape: bf16[2,128,256], index: 5, kind: input, shape index: {}]   ;;  %s9651_s6 = inlined_call_operand.hbm [shape: bf16[2,256,512], index: 6, kind: input, shape index: {}]   ;;  %s9652_s7 = inlined_call_operand.hbm [shape: bf16[2,512,512], index: 7, kind: input, shape index: {}]   ;;  %s9653_s8 = inlined_call_operand.hbm [shape: bf16[2,512,256], index: 8, kind: input, shape index: {}]   ;;  %s9654_s9 = inlined_call_operand.hbm [shape: bf16[2,256,256], index: 9, kind: input, shape index: {}]   ;;  %s9655_s10 = inlined_call_operand.hbm [shape: bf16[256,256], index: 10, kind: input, shape index: {}]   ;;  %s9656_s11 = inlined_call_operand.vmem [shape: bf16[256,128], index: 11, kind: input, shape index: {}]   ;;  %s9657_s12 = inlined_call_operand.vmem [shape: bf16[128,64], index: 12, kind: input, shape index: {}]   ;;  %s9658_s13 = inlined_call_operand.vmem [shape: bf16[64,1], index: 13, kind: input, shape index: {}]   ;;  %s9659_s14 = inlined_call_operand.hbm [shape: f32[11,512], index: 14, kind: input, shape index: {}]   ;;  %s9660_s15 = inlined_call_operand.vmem [shape: f32[4,2,1], index: 15, kind: output, shape index: {}]  }
   0x1   :  { %9668 = sst [smem:[#allocation21_spill]] %s9649_s4 }
   0x2   :  { %9669 = sst [smem:[#allocation22_spill]] %s9650_s5 }
   0x3   :  { %9670 = sst [smem:[#allocation23_spill]] %s9651_s6 }
   0x4   :  { %9671 = sst [smem:[#allocation24_spill]] %s9657_s12 }
   0x5   :  { %9672 = sst [smem:[#allocation25_spill]] %s9658_s13 }
   0x6   :  { %9673 = sst [smem:[#allocation26_spill]] %s9660_s15 }
   0x7   :  { %20 = vsyncpa [#allocation3], 0 }
   0x8   :  { %22 = vsyncpa [#allocation3 + $0x1], 0 }
   0x9   :  { %23 = vsyncpa [#allocation5], 0 }
   0xa   :  { %24 = vsyncpa [#allocation8], 0 }
   0xb   :  { %25 = vsyncpa [#allocation11], 0 }
   0xc   :  { %26 = vsyncpa [#allocation14], 0  ;;  %s9160_s18 = smov 0   ;;  %s9162_s19 = smov 0  }
   0xd   :  { %s9164_s20 = smov 0   ;;  %s9166_s21 = smov 0  }
   0xe LB: > { %s9059_s22 = smov [#allocation4]   ;;  %s9181_s24 = sadd.s32 4294967295, %s9057_s21   ;;  %s9057_s21 = sphi %s9166_s21, %s9701_s21   ;;  %s9053_s20 = sphi %s9164_s20, %s9700_s20   ;;  %s9049_s19 = sphi %s9162_s19, %s9699_s19   ;;  %s9045_s18 = sphi %s9160_s18, %s9698_s18  }
   0xf   : > { %s408_s23 = sshll.u32 %s9059_s22, 4  ;;  %p6798_p0 = scmp.ge.s32.totalorder %s9057_s21, 1  ;;  %s409_s23 = int_to_ptr.vmem [resolvable:$true] %s408_s23 }
  0x10   : > { %p9661_p1 = scmp.eq.s32.totalorder %s9181_s24, 0  ;;  %p393_p2 = scmp.lt.s32.totalorder %s9057_s21, 5 }
  0x11   : > { %s9060_s26 = smov [#allocation7]   ;;  %s8782_s30 = scalar_lea.vmem %s409_s23, 512 }
  0x12   : > { %p9186_p3 = pnand %p6798_p0, %p393_p2  ;;  %s434_s27 = sshll.u32 %s9060_s26, 4  ;;  %s435_s27 = int_to_ptr.vmem [resolvable:$true] %s434_s27 }
  0x13   : > { %p8783_p7 = scmp.ne.s32.totalorder %s409_s23, %s8782_s30  ;;  %p8790_p10 = scmp.lt.s32.totalorder %s409_s23, %s409_s23 }
  0x14   : > { %s9674_s25 = scalar_select %p9186_p3, 1, 0 }
  0x15   : > { %p7681_p4 = pneg %p9186_p3  ;;  %p8791_p11 = scmp.lt.s32.totalorder %s8782_s30, %s8782_s30 }
  0x17   : > { %p9194_p5 = pnand %p7681_p4, %p9661_p1  ;;  %p8792_p12 = por %p8791_p11, %p8790_p10 }
  0x19   : > { %p9200_p6 = pneg %p9194_p5 }
  0x1b   : > { %p8785_p8 = pnand %p8783_p7, %p9200_p6 }
  0x1d   : > { %p8786_p9 = pneg %p8785_p8 }
  0x1f   : > { %p8793_p13 = pnand %p8792_p12, %p8786_p9 }
  0x21   : > { %8796 = shalt.err (!%p8793_p13)
}
  0x22   : > { %s9061_s16 = smov 64   ;;  %s9062_s17 = smov 4  }
  0x23   : > { %s9677_s4 = sld [smem:[#allocation21_spill]]  ;;  %s8808_s15 = scalar_lea.vmem %s435_s27, 16384 }
  0x24   : > { %p8809_p0 = scmp.ne.s32.totalorder %s435_s27, %s8808_s15  ;;  %p8816_p7 = scmp.lt.s32.totalorder %s435_s27, %s435_s27 }
  0x25   : > { %p8817_p8 = scmp.lt.s32.totalorder %s8808_s15, %s8808_s15 }
  0x26   : > { %p8811_p2 = pnand %p8809_p0, %p9200_p6 }
  0x27   : > { %p8818_p1 = por %p8817_p8, %p8816_p7 }
  0x28   : > { %p8812_p4 = pneg %p8811_p2 }
  0x29   : > { %7684 = dma.hbm_to_vmem [thread:$0]  (!%p9194_p5), %s9677_s4, 512, %s409_s23, [#allocation5], %s9061_s16, %s9061_s16, %s9062_s17  }
  0x2a   : > { %p8819_p10 = pnand %p8818_p1, %p8812_p4 }
  0x2c   : > { %8822 = shalt.err (!%p8819_p10)
}
  0x2d   : > { %s9664_s30 = smov 256   ;;  %s9064_s13 = smov 16  }
  0x2e   : > { %s9678_s6 = sld [smem:[#allocation23_spill]]  ;;  %s9065_s16 = smov [#allocation10]  }
  0x2f   : > { %s460_s17 = sshll.u32 %s9065_s16, 4  ;;  %s9066_s26 = smov [#allocation13]   ;;  %s461_s17 = int_to_ptr.vmem [resolvable:$true] %s460_s17 }
  0x30   : > { %s486_s4 = sshll.u32 %s9066_s26, 4  ;;  %s8834_s15 = scalar_lea.vmem %s461_s17, 16384  ;;  %s487_s4 = int_to_ptr.vmem [resolvable:$true] %s486_s4 }
  0x31   : > { %p8835_p1 = scmp.ne.s32.totalorder %s461_s17, %s8834_s15  ;;  %p8842_p12 = scmp.lt.s32.totalorder %s461_s17, %s461_s17 }
  0x32   : > { %p8843_p13 = scmp.lt.s32.totalorder %s8834_s15, %s8834_s15 }
  0x33   : > { %p8837_p9 = pnand %p8835_p1, %p9200_p6 }
  0x34   : > { %7690 = dma.hbm_to_vmem [thread:$0]  (!%p9194_p5), %s9678_s6, 16384, %s435_s27, [#allocation8], %s9664_s30, %s9664_s30, %s9064_s13  }
  0x35   : > { %p8838_p11 = pneg %p8837_p9  ;;  %p8844_p0 = por %p8843_p13, %p8842_p12 }
  0x37   : > { %p8845_p2 = pnand %p8844_p0, %p8838_p11 }
  0x39   : > { %8848 = shalt.err (!%p8845_p2)
}
  0x3a   : > { %s9665_s12 = smov 128   ;;  %s9068_s27 = smov 8  }
  0x3b   : > { %7696 = dma.hbm_to_vmem [thread:$0]  (!%p9194_p5), %s9653_s8, 16384, %s461_s17, [#allocation11], %s9665_s12, %s9665_s12, %s9068_s27  }
  0x3c   : > { %s8860_s16 = scalar_lea.vmem %s487_s4, 4096  ;;  %p8868_p10 = scmp.lt.s32.totalorder %s487_s4, %s487_s4 }
  0x3d   : > { %p8861_p4 = scmp.ne.s32.totalorder %s487_s4, %s8860_s16  ;;  %p8869_p1 = scmp.lt.s32.totalorder %s8860_s16, %s8860_s16 }
  0x3f   : > { %p8863_p7 = pnand %p8861_p4, %p9200_p6  ;;  %p8870_p9 = por %p8869_p1, %p8868_p10 }
  0x41   : > { %p8864_p8 = pneg %p8863_p7 }
  0x43   : > { %p8871_p11 = pnand %p8870_p9, %p8864_p8 }
  0x45   : > { %8874 = shalt.err (!%p8871_p11)
}
  0x46   : > { %7702 = dma.hbm_to_vmem [thread:$0]  (!%p9194_p5), %s9655_s10, 4096, %s487_s4, [#allocation14], %s9665_s12, %s9665_s12, %s9068_s27  }
  0x47   : > { %s9069_s17 = smov [#allocation6]   ;;  %s9070_s23 = smov [#allocation9]  }
  0x48   : > { %s421_s22 = sshll.u32 %s9069_s17, 4  ;;  %s447_s30 = sshll.u32 %s9070_s23, 4  ;;  %s422_s22 = int_to_ptr.vmem [resolvable:$true] %s421_s22  ;;  %s448_s30 = int_to_ptr.vmem [resolvable:$true] %s447_s30 }
  0x49   : > { %s8886_s16 = scalar_lea.vmem %s422_s22, 4096  ;;  %p8894_p2 = scmp.lt.s32.totalorder %s422_s22, %s422_s22 }
  0x4a   : > { %p8887_p12 = scmp.ne.s32.totalorder %s422_s22, %s8886_s16  ;;  %p8895_p4 = scmp.lt.s32.totalorder %s8886_s16, %s8886_s16 }
  0x4c   : > { %p8889_p13 = pnand %p8887_p12, %p9200_p6  ;;  %p8896_p7 = por %p8895_p4, %p8894_p2 }
  0x4e   : > { %p8890_p0 = pneg %p8889_p13 }
  0x50   : > { %p8897_p8 = pnand %p8896_p7, %p8890_p0 }
  0x52   : > { %8900 = shalt.err (!%p8897_p8)
}
  0x53   : > { %s9679_s5 = sld [smem:[#allocation22_spill]]  ;;  %s8912_s15 = scalar_lea.vmem %s448_s30, 32768 }
  0x54   : > { %p8913_p10 = scmp.ne.s32.totalorder %s448_s30, %s8912_s15  ;;  %p8920_p11 = scmp.lt.s32.totalorder %s448_s30, %s448_s30 }
  0x55   : > { %p8921_p12 = scmp.lt.s32.totalorder %s8912_s15, %s8912_s15 }
  0x56   : > { %p8915_p1 = pnand %p8913_p10, %p9200_p6 }
  0x57   : > { %p8922_p13 = por %p8921_p12, %p8920_p11 }
  0x58   : > { %p8916_p9 = pneg %p8915_p1 }
  0x59   : > { %7687 = dma.hbm_to_vmem [thread:$0]  (!%p9194_p5), %s9679_s5, 4096, %s422_s22, [#allocation5], %s9665_s12, %s9665_s12, %s9068_s27  }
  0x5a   : > { %p8923_p0 = pnand %p8922_p13, %p8916_p9 }
  0x5c   : > { %8926 = shalt.err (!%p8923_p0)
}
  0x5d   : > { %s9680_s17 = smov 256   ;;  %s9071_s22 = smov [#allocation12]  }
  0x5e   : > { %7693 = dma.hbm_to_vmem [thread:$0]  (!%p9194_p5), %s9652_s7, 32768, %s448_s30, [#allocation8], %s9680_s17, %s9680_s17, %s9064_s13  }
  0x5f   : > { %s473_s4 = sshll.u32 %s9071_s22, 4  ;;  %s9072_s26 = smov [#allocation15]   ;;  %s474_s4 = int_to_ptr.vmem [resolvable:$true] %s473_s4 }
  0x60   : > { %s508_s12 = sshll.u32 %s9072_s26, 4  ;;  %s8938_s15 = scalar_lea.vmem %s474_s4, 8192  ;;  %s509_s12 = int_to_ptr.vmem [resolvable:$true] %s508_s12 }
  0x61   : > { %p8939_p2 = scmp.ne.s32.totalorder %s474_s4, %s8938_s15  ;;  %p8946_p8 = scmp.lt.s32.totalorder %s474_s4, %s474_s4 }
  0x62   : > { %p8947_p10 = scmp.lt.s32.totalorder %s8938_s15, %s8938_s15 }
  0x63   : > { %p8941_p4 = pnand %p8939_p2, %p9200_p6 }
  0x64   : > { %p8948_p1 = por %p8947_p10, %p8946_p8 }
  0x65   : > { %p8942_p7 = pneg %p8941_p4 }
  0x67   : > { %p8949_p9 = pnand %p8948_p1, %p8942_p7 }
  0x69   : > { %8952 = shalt.err (!%p8949_p9)
}
  0x6a   : > { %s9681_s13 = smov 128   ;;  %s8964_s23 = scalar_lea.vmem %s509_s12, 1024 }
  0x6b   : > { %7699 = dma.hbm_to_vmem [thread:$0]  (!%p9194_p5), %s9654_s9, 8192, %s474_s4, [#allocation11], %s9681_s13, %s9681_s13, %s9068_s27  }
  0x6c   : > { %p8965_p11 = scmp.ne.s32.totalorder %s509_s12, %s8964_s23  ;;  %p8972_p0 = scmp.lt.s32.totalorder %s509_s12, %s509_s12 }
  0x6d   : > { %p8973_p2 = scmp.lt.s32.totalorder %s8964_s23, %s8964_s23 }
  0x6e   : > { %p8967_p12 = pnand %p8965_p11, %p9200_p6 }
  0x6f   : > { %p8974_p4 = por %p8973_p2, %p8972_p0 }
  0x70   : > { %p8968_p13 = pneg %p8967_p12 }
  0x72   : > { %p8975_p7 = pnand %p8974_p4, %p8968_p13 }
  0x74   : > { %8978 = shalt.err (!%p8975_p7)
}
  0x75   : > { %s9073_s16 = smov 512   ;;  %s9074_s29 = smov 32  }
  0x76   : > { %7705 = dma.hbm_to_vmem [thread:$0]  (!%p9194_p5), %s9659_s14, 1024, %s509_s12, [#allocation14], %s9073_s16, %s9073_s16, %s9074_s29  }
  0x77   : > { %s9279_s4 = sadd.s32 1, %s9057_s21   ;;  %s91_s26 = sadd.s32 1, %s9053_s20 }
  0x78   : > { %s88_s15 = ssub.s32 %s9057_s21, %s9279_s4  ;;  %p98_p6 = scmp.ne.s32.totalorder %s9053_s20, %s9049_s19 }
  0x79   : > { %p89_p8 = scmp.eq.s32.totalorder %s88_s15, 0  ;;  %p99_p10 = scmp.eq.s32.totalorder %s9057_s21, 0 }
  0x7a   : > { %p104_p1 = scmp.ne.s32.totalorder %s9049_s19, %s9045_s18  ;;  %p7718_p9 = scmp.lt.s32.totalorder %s9057_s21, 4 }
  0x7b   : > { %s9291_s13 = scalar_select %p89_p8, %s9053_s20, %s91_s26  }
  0x7c   : > { %p100_p11 = por %p99_p10, %p98_p6  ;;  %p9682_p12 = scmp.eq.s32.totalorder %s9181_s24, 0 }
  0x7d   : > { %s538_s30 = sand.u32 1, %s9053_s20   ;;  %s6809_s12 = sshll.u32 %s9057_s21, 5 }
  0x7e   : > { %p9295_p13 = por %p9682_p12, %p104_p1  ;;  %s6808_s17 = sshll.u32 %s538_s30, 1 }
  0x7f   : > { %s9304_s29 = scalar_lea.hbm %s9647_s2, %s6809_s12  ;;  %s542_s18 = scalar_lea.vmem [#allocation2], %s6808_s17 }
  0x80   : > { %s9683_s28 = scalar_select %p9295_p13, 1, 0 }
  0x81   : > { %s549_s27 = sshll.u32 %s542_s18, 4  ;;  %p9306_p5 = pnand %p7718_p9, %p100_p11  ;;  %s550_s27 = int_to_ptr.vmem [resolvable:$true] %s549_s27 }
  0x82   : > { %s539_s26 = scalar_lea.sflag [#allocation3], %s538_s30  ;;  %s8979_s15 = scalar_lea.hbm %s9304_s29, 32 }
  0x83   : > { %p8980_p0 = scmp.ne.s32.totalorder %s9304_s29, %s8979_s15  ;;  %p8981_p2 = pneg %p9306_p5 }
  0x84   : > { %s8984_s23 = scalar_lea.hbm %s9647_s2, 128  ;;  %p8985_p6 = scmp.lt.s32.totalorder %s9304_s29, %s9647_s2 }
  0x85   : > { %p8982_p4 = pnand %p8981_p2, %p8980_p0  ;;  %p8986_p8 = scmp.lt.s32.totalorder %s8984_s23, %s8979_s15 }
  0x87   : > { %p8983_p7 = pneg %p8982_p4  ;;  %p8987_p10 = por %p8986_p8, %p8985_p6 }
  0x89   : > { %p8988_p1 = pnand %p8987_p10, %p8983_p7 }
  0x8b   : > { %8991 = shalt.err (!%p8988_p1)
}
  0x8c   : > { %s8992_s18 = scalar_lea.vmem %s550_s27, 32  ;;  %s9075_s30 = smov [#allocation2]  }
  0x8d   : > { %p8993_p9 = scmp.ne.s32.totalorder %s550_s27, %s8992_s18  ;;  %s8997_s5 = sshll.u32 %s9075_s30, 4  ;;  %s8998_s5 = int_to_ptr.vmem [resolvable:$false] %s8997_s5 }
  0x8e   : > { %s8999_s6 = scalar_lea.vmem %s8998_s5, 64  ;;  %p9000_p0 = scmp.lt.s32.totalorder %s550_s27, %s8998_s5 }
  0x8f   : > { %p8995_p11 = pnand %p8993_p9, %p8981_p2  ;;  %p9001_p4 = scmp.lt.s32.totalorder %s8999_s6, %s8992_s18 }
  0x91   : > { %p8996_p12 = pneg %p8995_p11  ;;  %p9002_p13 = por %p9001_p4, %p9000_p0 }
  0x93   : > { %p9003_p3 = pnand %p9002_p13, %p8996_p12 }
  0x95   : > { %9006 = shalt.err (!%p9003_p3)
}
  0x96   : > { %7709 = dma.hbm_to_vmem [thread:$0]  (!%p9306_p5), %s9304_s29, 32, %s550_s27, %s539_s26  }
  0x97   : > { %p9685_p7 = scmp.ne.s32.totalorder %s9674_s25, 0 }
  0x98   : > { %s560_s15 = sand.u32 (!%p9685_p7), 1, %s9049_s19   ;;  %p9686_p2 = scmp.ne.s32.totalorder (!%p9685_p7), %s9683_s28, 0 }
  0x99   : > { %558 = sbr.rel (%p9685_p7) target bundleno = 4382 (0x111e), region = 80  ;;  %s9327_s21 = sshll.u32 (!%p9685_p7), %s560_s15, 1 }
  0x9a   : > { %s561_s12 = scalar_lea.sflag (!%p9685_p7), [#allocation3], %s560_s15  ;;  %s564_s23 = scalar_lea.vmem (!%p9685_p7), [#allocation2], %s9327_s21 }
  0x9e   : > { %9024 = dma.done.wait (%p9686_p2), %s561_s12, 32  }
  0x9f   : > { %9026 = vsyncadd (%p9686_p2), %s561_s12, 4294967264  ;;  %p9687_p3 = scmp.eq.s32.totalorder %s9181_s24, 0 }
  0xa1   : > { %9028 = dma.done.wait (%p9687_p3), [#allocation5], 4608   ;;  %p9688_p13 = pmov %p9687_p3 }
  0xa2   : > { %p9689_p5 = pmov %p9687_p3 }
  0xa3   : > { %9030 = vsyncadd (%p9688_p13), [#allocation5], 4294962688 }
  0xa4   : > { %9032 = dma.done.wait (%p9689_p5), [#allocation8], 49152   ;;  %p9690_p6 = pmov %p9687_p3 }
  0xa5   : > { %p9691_p8 = pmov %p9687_p3 }
  0xa6   : > { %9034 = vsyncadd (%p9690_p6), [#allocation8], 4294918144 }
  0xa7   : > { %9036 = dma.done.wait (%p9691_p8), [#allocation11], 24576   ;;  %p9692_p10 = pmov %p9687_p3 }
  0xa8   : > { %p9693_p1 = pmov %p9687_p3 }
  0xa9   : > { %9038 = vsyncadd (%p9692_p10), [#allocation11], 4294942720 }
  0xaa   : > { %9040 = dma.done.wait (%p9693_p1), [#allocation14], 5120   ;;  %p9694_p9 = pmov %p9693_p1 }
  0xab   : > { %p652_p11 = scmp.lt.s32.totalorder %s9181_s24, 3  ;;  %v9076_v0 = vmov 0.0   ;;  %vm9077_vm0 = vmmov 0   ;;  %vm727_vm1 = vcmask 1041408   ;;  %vm728_vm2 = vcmask 1042432   ;;  %v7779_v35 = vld [vmem:[#allocation4 + $0x8] sm:$0xff]  }
  0xac   : > { %9042 = vsyncadd (%p9694_p9), [#allocation14], 4294962176  ;;  %7569 = vmatprep.subr.bf16.mxu1 %v9076_v0  ;;  %7571 = vmatprep.mubr.msk.bf16.mxu1 %vm9077_vm0, %v9076_v0  ;;  %v9078_v1 = vmov 65535   ;;  %v720_v8 = vld [vmem:[%s9648_s3] sm:$0x7]  ;;  %vm674_vm3 = vcmask 130048  }
  0xad   : > { %s9703_s24 = smov (!%p652_p11, %s9181_s24), 3  ;;  %7581 = vmatprep.subr.bf16.mxu0 %v9076_v0  ;;  %7583 = vmatprep.mubr.msk.bf16.mxu0 %vm9077_vm0, %v9076_v0  ;;  %v729_v2 = vsel %vm727_vm1, 4294967295, %v9078_v1  ;;  %v6826_v9 = vld [vmem:[%s9648_s3 + $0x4] sm:$0x7]  ;;  %vm723_vm4 = vcmask 39936   ;;  %vm891_vm5 = vcmask 261120  }
  0xae   : > { %s7515_s5 = sshll.u32 %s9703_s24, 4  ;;  %v730_v3 = vsel %vm728_vm2, %v729_v2, 0  ;;  %v672_v25 = vld [vmem:[#allocation15] ss:$0 sm:$0xff]  ;;  %v7781_v37 = vld [vmem:[#allocation4 + $0x18] sm:$0xff]   ;;  %v7782_v38 = vld [vmem:[#allocation4 + $0x10] sm:$0xff]  }
  0xaf   : > { %s656_s28 = scalar_lea.vmem %s9645_s0, %s7515_s5  ;;  %s661_s22 = scalar_lea.vmem %s9646_s1, %s7515_s5  ;;  %v779_v11 = vand.u32 %v730_v3, %v720_v8  ;;  %v732_v13 = vand.u32 %v6826_v9, %v730_v3  ;;  %v7780_v36 = vld [vmem:[#allocation4] sm:$0xff]   ;;  %v9079_v48 = vmov 0   ;;  %v7807_v49 = vld [vmem:[#allocation6 + $0xf0] ss:$8 sps:$4 sm:$0xff]   ;;  %v7809_v50 = vld [vmem:[#allocation6 + $0xf4] ss:$8 sps:$4 sm:$0xff]  }
  0xb0   : > { %v667_v4 = vld [vmem:[%s661_s22] sm:$0xff]  ;;  %v668_v5 = vld [vmem:[%s661_s22 + $0x8] sm:$0xff]  ;;  %v7813_v54 = vld [vmem:[#allocation6 + $0xd0] ss:$8 sps:$4 sm:$0xff]   ;;  %s9695_s12 = sld [smem:[#allocation24_spill]]  ;;  %vm6586_vm6 = vcmask 523264  }
  0xb1   : > { %v670_v6 = vld [vmem:[%s656_s28] sm:$0xff]  ;;  %v671_v7 = vld [vmem:[%s656_s28 + $0x8] sm:$0xff]  ;;  %v9373_v12 = vpack.c.bf16 %v668_v5, %v667_v4  ;;  %7582 = vmatpush3.bf16.msra.mxu0 %v779_v11  ;;  %v7819_v58 = vld [vmem:[#allocation6 + $0xb0] ss:$8 sps:$4 sm:$0xff]   ;;  %s6824_s22 = sshll.u32 %s9703_s24, 1  ;;  %s9697_s17 = sld [smem:[#allocation26_spill]] }
  0xb2   : > { %v673_v10 = vpack.c.bf16 %v671_v7, %v670_v6  ;;  %7593 = vmatprep.subr.bf16.mxu0 %v9076_v0  ;;  %v7812_v51 = vld [vmem:[#allocation6 + $0xe4] ss:$8 sps:$4 sm:$0xff]   ;;  %v7810_v52 = vld [vmem:[#allocation6 + $0xe0] ss:$8 sps:$4 sm:$0xff]   ;;  %v7815_v53 = vld [vmem:[#allocation6 + $0xd4] ss:$8 sps:$4 sm:$0xff]  }
  0xb3   : > { %v7818_v55 = vld [vmem:[#allocation6 + $0xc4] ss:$8 sps:$4 sm:$0xff]   ;;  %v7816_v56 = vld [vmem:[#allocation6 + $0xc0] ss:$8 sps:$4 sm:$0xff]   ;;  %v7821_v57 = vld [vmem:[#allocation6 + $0xb4] ss:$8 sps:$4 sm:$0xff]  }
  0xb4   : > { %7570 = vmatpush3.bf16.msra.mxu1 %v673_v10  ;;  %7584 = vmatmul.mubr.msk.bf16.vlgmr.msra.gmra.mxu0 %vm723_vm4, %v673_v10  ;;  %v7824_v59 = vld [vmem:[#allocation6 + $0xa4] ss:$8 sps:$4 sm:$0xff]   ;;  %v7822_v60 = vld [vmem:[#allocation6 + $0xa0] ss:$8 sps:$4 sm:$0xff]   ;;  %v7827_v61 = vld [vmem:[#allocation6 + $0x94] ss:$8 sps:$4 sm:$0xff]  }
  0xb5   : > { %7575 = vmatprep.subr.bf16.mxu1 %v9076_v0  ;;  %7597 = vmatprep.mubr.msk.bf16.mxu0 %vm9077_vm0, %v9076_v0  ;;  %v7825_v62 = vld [vmem:[#allocation6 + $0x90] ss:$8 sps:$4 sm:$0xff]   ;;  %v826_v2 = vld [vmem:[#allocation15 + $0x1] ss:$0 sm:$0xff]  ;;  %v7785_v11 = vld [vmem:[#allocation6 + $0x74] ss:$8 sps:$4 sm:$0xff]  }
  0xb6   : > { %7594 = vmatpush3.bf16.msra.mxu0 %v7781_v37  ;;  %v7833_v37 = vld [vmem:[#allocation7 + $0x2e4] ss:$16 sps:$4 sm:$0xff]   ;;  %vm6630_vm7 = vcmask 1024  }
  0xb7   : > { %7572 = vmatmul.mubr.msk.bf16.vlgmr.msra.gmra.mxu1 %vm674_vm3, %v9373_v12  ;;  %7595 = vmatprep.subr.bf16.mxu0 %v9076_v0  ;;  %s665_s18 = scalar_lea.vmem %s9697_s17, %s6824_s22 }
  0xb8   : > { %7576 = vmatpush3.bf16.msra.mxu1 %v732_v13  ;;  %7577 = vmatprep.mubr.msk.bf16.mxu1 %vm9077_vm0, %v9076_v0 }
  0xb9   : > { %7587 = vmatprep.subr.bf16.mxu1 %v9076_v0 }
  0xba   : > { %7596 = vmatpush3.bf16.msra.mxu0 %v7782_v38  ;;  %v7839_v38 = vld [vmem:[#allocation7 + $0x2c4] ss:$16 sps:$4 sm:$0xff]  }
  0xbb   : > { %7609 = vmatprep.subr.bf16.mxu0 %v9076_v0 }
 0x174   : > { %v815_v19 = vpop.f32.mrf.mxu0 }
 0x176   : > { %v7585_v20 = vpop.f32.mrf.mxu0 }
 0x177   : > { %v712_v14 = vpop.f32.mrf.mxu1  ;;  %v7792_v20 = vld [vmem:[#allocation6 + $0x40] ss:$8 sps:$4 sm:$0xff]  }
 0x178   : > { %v818_v21 = vpop.f32.mrf.mxu0 }
 0x179   : > { %v7573_v15 = vpop.f32.mrf.mxu1 }
 0x17a   : > { %v7586_v22 = vpop.f32.mrf.mxu0  ;;  %v7788_v15 = vld [vmem:[#allocation6 + $0x64] ss:$8 sps:$4 sm:$0xff]  }
 0x17b   : > { %v715_v16 = vpop.f32.mrf.mxu1  ;;  %v7795_v22 = vld [vmem:[#allocation6 + $0x30] ss:$8 sps:$4 sm:$0xff]  }
 0x17c   : > { %v719_v17 = vpack.c.bf16 %v715_v16, %v712_v14  ;;  %v7783_v14 = vld [vmem:[#allocation6 + $0x70] ss:$8 sps:$4 sm:$0xff]   ;;  %v7786_v16 = vld [vmem:[#allocation6 + $0x60] ss:$8 sps:$4 sm:$0xff]  }
 0x17d   : > { %v7574_v18 = vpop.f32.mrf.mxu1 }
 0x17e   : > { %7578 = vmatmul.mubr.msk.bf16.vlgmr.msra.gmra.mxu1 %vm723_vm4, %v719_v17  ;;  %v7791_v17 = vld [vmem:[#allocation6 + $0x54] ss:$8 sps:$4 sm:$0xff]   ;;  %v7789_v18 = vld [vmem:[#allocation6 + $0x50] ss:$8 sps:$4 sm:$0xff]  }
 0x17f   : > { %7589 = vmatprep.mubr.msk.bf16.mxu1 %vm9077_vm0, %v9076_v0 }
 0x23e   : > { %v768_v23 = vpop.f32.mrf.mxu1 }
 0x23f   : > { %v816_v24 = vadd.f32 %v815_v19, %v768_v23  ;;  %v7794_v19 = vld [vmem:[#allocation6 + $0x44] ss:$8 sps:$4 sm:$0xff]  }
 0x240   : > { %v7579_v26 = vpop.f32.mrf.mxu1  ;;  %v7800_v23 = vld [vmem:[#allocation6 + $0x24] ss:$8 sps:$4 sm:$0xff]  }
 0x241   : > { %v822_v28 = vadd.f32 %v816_v24, %v672_v25  ;;  %v7798_v24 = vld [vmem:[#allocation6 + $0x20] ss:$8 sps:$4 sm:$0xff]   ;;  %v7801_v26 = vld [vmem:[#allocation6 + $0x10] ss:$8 sps:$4 sm:$0xff]  }
 0x242   : > { %v771_v27 = vpop.f32.mrf.mxu1 }
 0x243   : > { %v819_v29 = vadd.f32 %v818_v21, %v771_v27  ;;  %v824_v32 = vmax.f32 %v822_v28, 0.0  ;;  %v7797_v21 = vld [vmem:[#allocation6 + $0x34] ss:$8 sps:$4 sm:$0xff]   ;;  %v7806_v27 = vld [vmem:[#allocation6 + $0x4] ss:$8 sps:$4 sm:$0xff]  }
 0x244   : > { %v7580_v30 = vpop.f32.mrf.mxu1  ;;  %v7804_v28 = vld [vmem:[#allocation6] ss:$8 sps:$4 sm:$0xff]  }
 0x245   : > { %v823_v31 = vadd.f32 %v819_v29, %v672_v25  ;;  %v7803_v25 = vld [vmem:[#allocation6 + $0x14] ss:$8 sps:$4 sm:$0xff]   ;;  %v7830_v29 = vld [vmem:[#allocation6 + $0x84] ss:$8 sps:$4 sm:$0xff]   ;;  %v7828_v30 = vld [vmem:[#allocation6 + $0x80] ss:$8 sps:$4 sm:$0xff]  }
 0x247   : > { %v825_v33 = vmax.f32 %v823_v31, 0.0 }
 0x249   : > { %v827_v34 = vpack.c.bf16 %v825_v33, %v824_v32 }
 0x24b   : > { %7588 = vmatpush3.bf16.msra.mxu1 %v827_v34 }
 0x24c   : > { %7601 = vmatprep.subr.bf16.mxu1 %v9076_v0 }
 0x24e   : > { %7590 = vmatmul.mubr.msk.bf16.vlgmr.msra.gmra.mxu1 %vm674_vm3, %v9373_v12 }
 0x24f   : > { %7602 = vmatpush3.bf16.msra.mxu1 %v7779_v35  ;;  %7605 = vmatprep.mubr.msk.bf16.mxu1 %vm9077_vm0, %v9076_v0 }
 0x250   : > { %7603 = vmatprep.subr.bf16.mxu1 %v9076_v0 }
 0x253   : > { %7604 = vmatpush3.bf16.msra.mxu1 %v7780_v36  ;;  %v7831_v36 = vld [vmem:[#allocation7 + $0x2e0] ss:$16 sps:$4 sm:$0xff]  }
 0x254   : > { %1154 = vmatprep.subr.bf16.mxu1 %v7809_v50  ;;  %v7867_v50 = vld [vmem:[#allocation7 + $0x220] ss:$16 sps:$4 sm:$0xff]  }
 0x256   : > { %7606 = vmatmul.mubr.msk.bf16.vlgmr.msra.gmra.mxu1 %vm891_vm5, %v827_v34 }
 0x257   : > { %1186 = vmatprep.mubr.bf16.mxu1 %v9079_v48  ;;  %1155 = vmatpush1.bf16.msra.mxu1 %v7807_v49  ;;  %v7869_v49 = vld [vmem:[#allocation7 + $0x224] ss:$16 sps:$4 sm:$0xff]  }
 0x258   : > { %1156 = vmatprep.subr.bf16.mxu1 %v7812_v51  ;;  %v7875_v51 = vld [vmem:[#allocation7 + $0x204] ss:$16 sps:$4 sm:$0xff]  }
 0x25b   : > { %1157 = vmatpush1.bf16.msra.mxu1 %v7810_v52  ;;  %v7873_v52 = vld [vmem:[#allocation7 + $0x200] ss:$16 sps:$4 sm:$0xff]  }
 0x25c   : > { %1158 = vmatprep.subr.bf16.mxu1 %v7815_v53  ;;  %v7881_v53 = vld [vmem:[#allocation7 + $0x3e4] ss:$16 sps:$4 sm:$0xff]  }
 0x25f   : > { %1159 = vmatpush1.bf16.msra.mxu1 %v7813_v54  ;;  %v7879_v54 = vld [vmem:[#allocation7 + $0x3e0] ss:$16 sps:$4 sm:$0xff]  }
 0x260   : > { %1160 = vmatprep.subr.bf16.mxu1 %v7818_v55  ;;  %v7887_v55 = vld [vmem:[#allocation7 + $0x3c4] ss:$16 sps:$4 sm:$0xff]  }
 0x263   : > { %1161 = vmatpush1.bf16.msra.mxu1 %v7816_v56  ;;  %v7885_v56 = vld [vmem:[#allocation7 + $0x3c0] ss:$16 sps:$4 sm:$0xff]  }
 0x264   : > { %1162 = vmatprep.subr.bf16.mxu1 %v7821_v57  ;;  %v7893_v57 = vld [vmem:[#allocation7 + $0x3a4] ss:$16 sps:$4 sm:$0xff]  }
 0x267   : > { %1163 = vmatpush1.bf16.msra.mxu1 %v7819_v58  ;;  %v7891_v58 = vld [vmem:[#allocation7 + $0x3a0] ss:$16 sps:$4 sm:$0xff]  }
 0x268   : > { %1164 = vmatprep.subr.bf16.mxu1 %v7824_v59  ;;  %v7899_v59 = vld [vmem:[#allocation7 + $0x384] ss:$16 sps:$4 sm:$0xff]  }
 0x26b   : > { %1165 = vmatpush1.bf16.msra.mxu1 %v7822_v60  ;;  %v7897_v60 = vld [vmem:[#allocation7 + $0x380] ss:$16 sps:$4 sm:$0xff]  }
 0x26c   : > { %1166 = vmatprep.subr.bf16.mxu1 %v7827_v61  ;;  %v7905_v61 = vld [vmem:[#allocation7 + $0x364] ss:$16 sps:$4 sm:$0xff]  }
 0x26f   : > { %1167 = vmatpush1.bf16.msra.mxu1 %v7825_v62  ;;  %v7903_v62 = vld [vmem:[#allocation7 + $0x360] ss:$16 sps:$4 sm:$0xff]  }
 0x270   : > { %1168 = vmatprep.subr.bf16.mxu1 %v7830_v29 }
 0x273   : > { %1169 = vmatpush1.bf16.msra.mxu1 %v7828_v30 }
 0x30e   : > { %v862_v39 = vpop.f32.mrf.mxu1 }
 0x310   : > { %v7591_v40 = vpop.f32.mrf.mxu1 }
 0x311   : > { %v7845_v40 = vld [vmem:[#allocation7 + $0x2a4] ss:$16 sps:$4 sm:$0xff]  }
 0x312   : > { %v865_v41 = vpop.f32.mrf.mxu1 }
 0x313   : > { %v869_v42 = vpack.c.bf16 %v865_v41, %v862_v39  ;;  %v7837_v39 = vld [vmem:[#allocation7 + $0x2c0] ss:$16 sps:$4 sm:$0xff]  }
 0x314   : > { %v7592_v43 = vpop.f32.mrf.mxu1  ;;  %v7843_v41 = vld [vmem:[#allocation7 + $0x2a0] ss:$16 sps:$4 sm:$0xff]  }
 0x315   : > { %7598 = vmatmul.mubr.msk.bf16.vlgmr.msra.gmra.mxu0 %vm891_vm5, %v869_v42  ;;  %v7851_v42 = vld [vmem:[#allocation7 + $0x284] ss:$16 sps:$4 sm:$0xff]   ;;  %v7849_v43 = vld [vmem:[#allocation7 + $0x280] ss:$16 sps:$4 sm:$0xff]  }
 0x316   : > { %v985_v44 = vpop.f32.mrf.mxu1  ;;  %7611 = vmatprep.mubr.msk.bf16.mxu0 %vm9077_vm0, %v9076_v0 }
 0x318   : > { %v7607_v45 = vpop.f32.mrf.mxu1 }
 0x319   : > { %v7855_v45 = vld [vmem:[#allocation7 + $0x260] ss:$16 sps:$4 sm:$0xff]  }
 0x31a   : > { %v988_v46 = vpop.f32.mrf.mxu1 }
 0x31c   : > { %v7608_v47 = vpop.f32.mrf.mxu1 }
 0x31d   : > { %v7861_v47 = vld [vmem:[#allocation7 + $0x240] ss:$16 sps:$4 sm:$0xff]  }
 0x3d5   : > { %v929_v63 = vpop.f32.mrf.mxu0 }
 0x3d6   : > { %v986_v1 = vadd.f32 %v985_v44, %v929_v63  ;;  %v7857_v44 = vld [vmem:[#allocation7 + $0x264] ss:$16 sps:$4 sm:$0xff]  }
 0x3d7   : > { %v7599_v3 = vpop.f32.mrf.mxu0  ;;  %v7911_v63 = vld [vmem:[#allocation7 + $0x344] ss:$16 sps:$4 sm:$0xff]  }
 0x3d8   : > { %v992_v5 = vadd.f32 %v986_v1, %v826_v2  ;;  %v7909_v1 = vld [vmem:[#allocation7 + $0x340] ss:$16 sps:$4 sm:$0xff]  }
 0x3d9   : > { %v932_v4 = vpop.f32.mrf.mxu0 }
 0x3da   : > { %v989_v6 = vadd.f32 %v988_v46, %v932_v4  ;;  %v994_v9 = vmax.f32 %v992_v5, 0.0  ;;  %v7863_v46 = vld [vmem:[#allocation7 + $0x244] ss:$16 sps:$4 sm:$0xff]  }
 0x3db   : > { %v7600_v7 = vpop.f32.mrf.mxu0 }
 0x3dc   : > { %v993_v8 = vadd.f32 %v989_v6, %v826_v2  ;;  %v1321_v2 = vlaneseq }
 0x3de   : > { %v995_v10 = vmax.f32 %v993_v8, 0.0  ;;  %v9401_v4 = vshrl.u32 %v1321_v2, 7  ;;  %v7923_v2 = vld [vmem:[#allocation7 + $0x304] ss:$16 sps:$4 sm:$0xff]  }
 0x3e0   : > { %v998_v13 = vpack.c.bf16 %v995_v10, %v994_v9  ;;  %v9404_v6 = vsub.s32 1, %v9401_v4  ;;  %v9407_v8 = vsub.s32 0, %v9401_v4  ;;  %v997_v9 = vld [vmem:[#allocation15 + $0x2] ss:$8 sm:$0x3] }
 0x3e2   : > { %7610 = vmatpush3.bf16.msra.mxu0 %v998_v13 }
 0x3e3   : > { %1277 = vmatprep.subr.bf16.mxu0 %v7785_v11 }
 0x3e5   : > { %7612 = vmatmul.mubr.msk.bf16.vlgmr.msra.gmra.mxu0 %vm674_vm3, %v9373_v12 }
 0x3e6   : > { %1278 = vmatpush1.bf16.msra.mxu0 %v7783_v14  ;;  %1309 = vmatprep.mubr.bf16.mxu0 %v9079_v48  ;;  %v1328_v14 = vrot.slane %v997_v9, %v9404_v6 }
 0x3e7   : > { %1279 = vmatprep.subr.bf16.mxu0 %v7788_v15 }
 0x3ea   : > { %1280 = vmatpush1.bf16.msra.mxu0 %v7786_v16  ;;  %v1324_v16 = vrot.slane %v997_v9, %v9407_v8  ;;  %v7929_v9 = vld [vmem:[#allocation7 + $0xe4] ss:$16 sps:$4 sm:$0xff]  }
 0x3eb   : > { %1281 = vmatprep.subr.bf16.mxu0 %v7791_v17 }
 0x3ee   : > { %1282 = vmatpush1.bf16.msra.mxu0 %v7789_v18 }
 0x3ef   : > { %1283 = vmatprep.subr.bf16.mxu0 %v7794_v19 }
 0x3f2   : > { %1284 = vmatpush1.bf16.msra.mxu0 %v7792_v20 }
 0x3f3   : > { %1285 = vmatprep.subr.bf16.mxu0 %v7797_v21 }
 0x3f6   : > { %1286 = vmatpush1.bf16.msra.mxu0 %v7795_v22 }
 0x3f7   : > { %1287 = vmatprep.subr.bf16.mxu0 %v7800_v23 }
 0x3fa   : > { %1288 = vmatpush1.bf16.msra.mxu0 %v7798_v24 }
 0x3fb   : > { %1289 = vmatprep.subr.bf16.mxu0 %v7803_v25 }
 0x3fe   : > { %1290 = vmatpush1.bf16.msra.mxu0 %v7801_v26 }
 0x3ff   : > { %1291 = vmatprep.subr.bf16.mxu0 %v7806_v27 }
 0x402   : > { %1292 = vmatpush1.bf16.msra.mxu0 %v7804_v28 }
 0x403   : > { %1837 = vmatprep.subr.bf16.mxu0 %v7833_v37  ;;  %v7846_v37 = vld [vmem:[#allocation7 + $0x2a8] ss:$16 sps:$4 sm:$0xff]  }
 0x405   : > { %1310 = vmatmul.mubr.bf16.vlgmr.msra.gmra.mxu0 %v998_v13 }
 0x406   : > { %1838 = vmatpush1.bf16.msra.mxu0 %v7831_v36  ;;  %v7848_v36 = vld [vmem:[#allocation7 + $0x2ac] ss:$16 sps:$4 sm:$0xff]  }
 0x407   : > { %1839 = vmatprep.subr.bf16.mxu0 %v7839_v38  ;;  %v7854_v38 = vld [vmem:[#allocation7 + $0x28c] ss:$16 sps:$4 sm:$0xff]  }
 0x40a   : > { %1840 = vmatpush1.bf16.msra.mxu0 %v7837_v39  ;;  %v7852_v39 = vld [vmem:[#allocation7 + $0x288] ss:$16 sps:$4 sm:$0xff]  }
 0x40b   : > { %1841 = vmatprep.subr.bf16.mxu0 %v7845_v40  ;;  %v7860_v40 = vld [vmem:[#allocation7 + $0x26c] ss:$16 sps:$4 sm:$0xff]  }
 0x40e   : > { %1842 = vmatpush1.bf16.msra.mxu0 %v7843_v41  ;;  %v7858_v41 = vld [vmem:[#allocation7 + $0x268] ss:$16 sps:$4 sm:$0xff]  }
 0x40f   : > { %1843 = vmatprep.subr.bf16.mxu0 %v7851_v42  ;;  %v7866_v42 = vld [vmem:[#allocation7 + $0x24c] ss:$16 sps:$4 sm:$0xff]  }
 0x412   : > { %1844 = vmatpush1.bf16.msra.mxu0 %v7849_v43  ;;  %v7864_v43 = vld [vmem:[#allocation7 + $0x248] ss:$16 sps:$4 sm:$0xff]  }
 0x413   : > { %1845 = vmatprep.subr.bf16.mxu0 %v7857_v44  ;;  %v7872_v44 = vld [vmem:[#allocation7 + $0x22c] ss:$16 sps:$4 sm:$0xff]  }
 0x416   : > { %1846 = vmatpush1.bf16.msra.mxu0 %v7855_v45  ;;  %v7870_v45 = vld [vmem:[#allocation7 + $0x228] ss:$16 sps:$4 sm:$0xff]  }
 0x417   : > { %1847 = vmatprep.subr.bf16.mxu0 %v7863_v46  ;;  %v7878_v46 = vld [vmem:[#allocation7 + $0x20c] ss:$16 sps:$4 sm:$0xff]  }
 0x41a   : > { %1848 = vmatpush1.bf16.msra.mxu0 %v7861_v47  ;;  %v7876_v47 = vld [vmem:[#allocation7 + $0x208] ss:$16 sps:$4 sm:$0xff]  }
 0x41b   : > { %1849 = vmatprep.subr.bf16.mxu0 %v7869_v49  ;;  %v7884_v49 = vld [vmem:[#allocation7 + $0x3ec] ss:$16 sps:$4 sm:$0xff]  }
 0x41e   : > { %1850 = vmatpush1.bf16.msra.mxu0 %v7867_v50  ;;  %v7882_v50 = vld [vmem:[#allocation7 + $0x3e8] ss:$16 sps:$4 sm:$0xff]  }
 0x41f   : > { %1851 = vmatprep.subr.bf16.mxu0 %v7875_v51  ;;  %v7890_v51 = vld [vmem:[#allocation7 + $0x3cc] ss:$16 sps:$4 sm:$0xff]  }
 0x422   : > { %1852 = vmatpush1.bf16.msra.mxu0 %v7873_v52  ;;  %v7888_v52 = vld [vmem:[#allocation7 + $0x3c8] ss:$16 sps:$4 sm:$0xff]  }
 0x423   : > { %1853 = vmatprep.subr.bf16.mxu0 %v7881_v53  ;;  %v7896_v53 = vld [vmem:[#allocation7 + $0x3ac] ss:$16 sps:$4 sm:$0xff]  }
 0x426   : > { %1854 = vmatpush2.bf16.msra.mxu0 %v7879_v54  ;;  %v7894_v54 = vld [vmem:[#allocation7 + $0x3a8] ss:$16 sps:$4 sm:$0xff]  }
 0x427   : > { %1855 = vmatprep.subr.bf16.mxu0 %v7887_v55  ;;  %v7902_v55 = vld [vmem:[#allocation7 + $0x38c] ss:$16 sps:$4 sm:$0xff]  }
 0x42a   : > { %1856 = vmatpush2.bf16.msra.mxu0 %v7885_v56  ;;  %v7900_v56 = vld [vmem:[#allocation7 + $0x388] ss:$16 sps:$4 sm:$0xff]  }
 0x42b   : > { %1857 = vmatprep.subr.bf16.mxu0 %v7893_v57  ;;  %v7908_v57 = vld [vmem:[#allocation7 + $0x36c] ss:$16 sps:$4 sm:$0xff]  }
 0x42e   : > { %1858 = vmatpush2.bf16.msra.mxu0 %v7891_v58  ;;  %v7906_v58 = vld [vmem:[#allocation7 + $0x368] ss:$16 sps:$4 sm:$0xff]  }
 0x42f   : > { %1859 = vmatprep.subr.bf16.mxu0 %v7899_v59  ;;  %v7914_v59 = vld [vmem:[#allocation7 + $0x34c] ss:$16 sps:$4 sm:$0xff]  }
 0x432   : > { %1860 = vmatpush2.bf16.msra.mxu0 %v7897_v60  ;;  %v7912_v60 = vld [vmem:[#allocation7 + $0x348] ss:$16 sps:$4 sm:$0xff]  }
 0x433   : > { %1861 = vmatprep.subr.bf16.mxu0 %v7905_v61  ;;  %v7917_v61 = vld [vmem:[#allocation7 + $0x324] ss:$16 sps:$4 sm:$0xff]  }
 0x436   : > { %1862 = vmatpush2.bf16.msra.mxu0 %v7903_v62  ;;  %v7920_v62 = vld [vmem:[#allocation7 + $0x32c] ss:$16 sps:$4 sm:$0xff]  }
 0x437   : > { %1863 = vmatprep.subr.bf16.mxu0 %v7911_v63  ;;  %v7915_v63 = vld [vmem:[#allocation7 + $0x320] ss:$16 sps:$4 sm:$0xff]  }
 0x43a   : > { %1864 = vmatpush2.bf16.msra.mxu0 %v7909_v1  ;;  %v7918_v1 = vld [vmem:[#allocation7 + $0x328] ss:$16 sps:$4 sm:$0xff]  }
 0x43b   : > { %1865 = vmatprep.subr.bf16.mxu0 %v7917_v61  ;;  %v7990_v61 = vld [vmem:[#allocation7 + $0x1a8] ss:$16 sps:$4 sm:$0xff]  }
 0x43e   : > { %1866 = vmatpush2.bf16.msra.mxu0 %v7915_v63  ;;  %v7998_v63 = vld [vmem:[#allocation7 + $0x18c] ss:$16 sps:$4 sm:$0xff]  }
 0x43f   : > { %1867 = vmatprep.subr.bf16.mxu0 %v7923_v2  ;;  %v7996_v2 = vld [vmem:[#allocation7 + $0x188] ss:$16 sps:$4 sm:$0xff]  }
 0x4a5   : > { %v1033_v31 = vpop.f32.mrf.mxu0 }
 0x4a7   : > { %v7613_v32 = vpop.f32.mrf.mxu0 }
 0x4a9   : > { %v1036_v33 = vpop.f32.mrf.mxu0 }
 0x4aa   : > { %v1040_v34 = vpack.c.bf16 %v1036_v33, %v1033_v31  ;;  %v7836_v31 = vld [vmem:[#allocation7 + $0x2ec] ss:$16 sps:$4 sm:$0xff]   ;;  %v7834_v33 = vld [vmem:[#allocation7 + $0x2e8] ss:$16 sps:$4 sm:$0xff]  }
 0x4ab   : > { %v7614_v35 = vpop.f32.mrf.mxu0 }
 0x4ac   : > { %1187 = vmatmul.mubr.bf16.vlgmr.msra.gmra.mxu1 %v1040_v34  ;;  %v7842_v34 = vld [vmem:[#allocation7 + $0x2cc] ss:$16 sps:$4 sm:$0xff]   ;;  %v7840_v35 = vld [vmem:[#allocation7 + $0x2c8] ss:$16 sps:$4 sm:$0xff]  }
 0x4ad   : > { %1375 = vmatprep.mubr.bf16.mxu1 %v9079_v48 }
 0x4c5   : > { %v1311_v3 = vpop.f32.mrf.mxu0 }
 0x4c7   : > { %v1313_v5 = vpop.f32.mrf.mxu0 }
 0x4c9   : > { %v1315_v10 = vpop.f32.mrf.mxu0 }
 0x4cb   : > { %v1317_v19 = vpop.f32.mrf.mxu0 }
 0x56c   : > { %v1188_v7 = vpop.f32.mrf.mxu1 }
 0x56d   : > { %v1312_v15 = vadd.f32 %v1311_v3, %v1188_v7  ;;  %v7926_v3 = vld [vmem:[#allocation7 + $0x30c] ss:$16 sps:$4 sm:$0xff]   ;;  %v7924_v7 = vld [vmem:[#allocation7 + $0x308] ss:$16 sps:$4 sm:$0xff]  }
 0x56e   : > { %v1190_v11 = vpop.f32.mrf.mxu1 }
 0x56f   : > { %v1314_v13 = vadd.f32 %v1313_v5, %v1190_v11  ;;  %v1331_v24 = vadd.f32 %v1324_v16, %v1312_v15  ;;  %v7921_v5 = vld [vmem:[#allocation7 + $0x300] ss:$16 sps:$4 sm:$0xff]  }
 0x570   : > { %v1192_v17 = vpop.f32.mrf.mxu1  ;;  %1868 = vmatpush2.bf16.msra.mxu0 %v7921_v5  ;;  %v8004_v5 = vld [vmem:[#allocation7 + $0x16c] ss:$16 sps:$4 sm:$0xff]  }
 0x571   : > { %v1316_v18 = vadd.f32 %v1315_v10, %v1192_v17  ;;  %v1332_v21 = vadd.f32 %v1328_v14, %v1314_v13  ;;  %v1335_v29 = vmax.f32 %v1331_v24, 0.0  ;;  %v7932_v10 = vld [vmem:[#allocation7 + $0xec] ss:$16 sps:$4 sm:$0xff]   ;;  %2243 = vmatprep.subr.bf16.mxu0 %v7929_v9  ;;  %v7927_v17 = vld [vmem:[#allocation7 + $0xe0] ss:$16 sps:$4 sm:$0xff]  }
 0x572   : > { %v1194_v20 = vpop.f32.mrf.mxu1  ;;  %v7941_v24 = vld [vmem:[#allocation7 + $0xa4] ss:$16 sps:$4 sm:$0xff]   ;;  %v8002_v9 = vld [vmem:[#allocation7 + $0x168] ss:$16 sps:$4 sm:$0xff]  }
 0x573   : > { %v1333_v22 = vadd.f32 %v1324_v16, %v1316_v18  ;;  %v1318_v23 = vadd.f32 %v1317_v19, %v1194_v20  ;;  %v1336_v27 = vmax.f32 %v1332_v21, 0.0  ;;  %v7930_v18 = vld [vmem:[#allocation7 + $0xe8] ss:$16 sps:$4 sm:$0xff]   ;;  %v7935_v20 = vld [vmem:[#allocation7 + $0xc4] ss:$16 sps:$4 sm:$0xff]  }
 0x574   : > { %v7938_v21 = vld [vmem:[#allocation7 + $0xcc] ss:$16 sps:$4 sm:$0xff]  }
 0x575   : > { %v1334_v25 = vadd.f32 %v1328_v14, %v1318_v23  ;;  %v1337_v26 = vmax.f32 %v1333_v22, 0.0  ;;  %v7933_v22 = vld [vmem:[#allocation7 + $0xc0] ss:$16 sps:$4 sm:$0xff]   ;;  %v7936_v23 = vld [vmem:[#allocation7 + $0xc8] ss:$16 sps:$4 sm:$0xff]  }
 0x577   : > { %v1338_v28 = vmax.f32 %v1334_v25, 0.0  ;;  %v9413_v32 = vpack.c.bf16 %v1337_v26, %v1335_v29  ;;  %v7944_v25 = vld [vmem:[#allocation7 + $0xac] ss:$16 sps:$4 sm:$0xff]   ;;  %v7939_v26 = vld [vmem:[#allocation7 + $0xa0] ss:$16 sps:$4 sm:$0xff]  }
 0x578   : > { %v7950_v29 = vld [vmem:[#allocation7 + $0x8c] ss:$16 sps:$4 sm:$0xff]  }
 0x579   : > { %v9411_v30 = vpack.c.bf16 %v1338_v28, %v1336_v27  ;;  %v7942_v27 = vld [vmem:[#allocation7 + $0xa8] ss:$16 sps:$4 sm:$0xff]   ;;  %v7947_v28 = vld [vmem:[#allocation7 + $0x84] ss:$16 sps:$4 sm:$0xff]  }
 0x57b   : > { %1357 = vmatprep.subr.bf16.mxu1 %v9411_v30 }
 0x57c   : > { %1358 = vmatpush1.bf16.msra.mxu1 %v9413_v32 }
 0x57d   : > { %1880 = vmatprep.subr.bf16.mxu1 %v7836_v31  ;;  %v7945_v31 = vld [vmem:[#allocation7 + $0x80] ss:$16 sps:$4 sm:$0xff]  }
 0x57f   : > { %6869 = vmatmul.mubr.msk.bf16.vlgmr.msra.gmra.mxu1 %vm674_vm3, %v9373_v12 }
 0x580   : > { %1881 = vmatpush1.bf16.msra.mxu1 %v7834_v33  ;;  %v7948_v33 = vld [vmem:[#allocation7 + $0x88] ss:$16 sps:$4 sm:$0xff]  }
 0x581   : > { %1882 = vmatprep.subr.bf16.mxu1 %v7842_v34  ;;  %v7953_v34 = vld [vmem:[#allocation7 + $0x64] ss:$16 sps:$4 sm:$0xff]  }
 0x584   : > { %1883 = vmatpush1.bf16.msra.mxu1 %v7840_v35  ;;  %v7951_v35 = vld [vmem:[#allocation7 + $0x60] ss:$16 sps:$4 sm:$0xff]  }
 0x585   : > { %1884 = vmatprep.subr.bf16.mxu1 %v7848_v36  ;;  %v7954_v36 = vld [vmem:[#allocation7 + $0x68] ss:$16 sps:$4 sm:$0xff]  }
 0x588   : > { %1885 = vmatpush1.bf16.msra.mxu1 %v7846_v37  ;;  %v7959_v37 = vld [vmem:[#allocation7 + $0x44] ss:$16 sps:$4 sm:$0xff]  }
 0x589   : > { %1886 = vmatprep.subr.bf16.mxu1 %v7854_v38  ;;  %v7962_v38 = vld [vmem:[#allocation7 + $0x4c] ss:$16 sps:$4 sm:$0xff]  }
 0x58c   : > { %1887 = vmatpush1.bf16.msra.mxu1 %v7852_v39  ;;  %v7957_v39 = vld [vmem:[#allocation7 + $0x40] ss:$16 sps:$4 sm:$0xff]  }
 0x58d   : > { %1888 = vmatprep.subr.bf16.mxu1 %v7860_v40  ;;  %v7960_v40 = vld [vmem:[#allocation7 + $0x48] ss:$16 sps:$4 sm:$0xff]  }
 0x590   : > { %1889 = vmatpush1.bf16.msra.mxu1 %v7858_v41  ;;  %v7965_v41 = vld [vmem:[#allocation7 + $0x24] ss:$16 sps:$4 sm:$0xff]  }
 0x591   : > { %1890 = vmatprep.subr.bf16.mxu1 %v7866_v42  ;;  %v7968_v42 = vld [vmem:[#allocation7 + $0x2c] ss:$16 sps:$4 sm:$0xff]  }
 0x594   : > { %1891 = vmatpush1.bf16.msra.mxu1 %v7864_v43  ;;  %v7963_v43 = vld [vmem:[#allocation7 + $0x20] ss:$16 sps:$4 sm:$0xff]  }
 0x595   : > { %1892 = vmatprep.subr.bf16.mxu1 %v7872_v44  ;;  %v7966_v44 = vld [vmem:[#allocation7 + $0x28] ss:$16 sps:$4 sm:$0xff]  }
 0x598   : > { %1893 = vmatpush1.bf16.msra.mxu1 %v7870_v45  ;;  %v7971_v45 = vld [vmem:[#allocation7 + $0x4] ss:$16 sps:$4 sm:$0xff]  }
 0x599   : > { %1894 = vmatprep.subr.bf16.mxu1 %v7878_v46  ;;  %v7974_v46 = vld [vmem:[#allocation7 + $0xc] ss:$16 sps:$4 sm:$0xff]  }
 0x59c   : > { %1895 = vmatpush1.bf16.msra.mxu1 %v7876_v47  ;;  %v7969_v47 = vld [vmem:[#allocation7] ss:$16 sps:$4 sm:$0xff]  }
 0x59d   : > { %1896 = vmatprep.subr.bf16.mxu1 %v7884_v49  ;;  %v7972_v49 = vld [vmem:[#allocation7 + $0x8] ss:$16 sps:$4 sm:$0xff]  }
 0x5a0   : > { %1897 = vmatpush2.bf16.msra.mxu1 %v7882_v50  ;;  %v7977_v50 = vld [vmem:[#allocation7 + $0x1e4] ss:$16 sps:$4 sm:$0xff]  }
 0x5a1   : > { %1898 = vmatprep.subr.bf16.mxu1 %v7890_v51  ;;  %v7980_v51 = vld [vmem:[#allocation7 + $0x1ec] ss:$16 sps:$4 sm:$0xff]  }
 0x5a4   : > { %1899 = vmatpush2.bf16.msra.mxu1 %v7888_v52  ;;  %v7975_v52 = vld [vmem:[#allocation7 + $0x1e0] ss:$16 sps:$4 sm:$0xff]  }
 0x5a5   : > { %1900 = vmatprep.subr.bf16.mxu1 %v7896_v53  ;;  %v7978_v53 = vld [vmem:[#allocation7 + $0x1e8] ss:$16 sps:$4 sm:$0xff]  }
 0x5a8   : > { %1901 = vmatpush2.bf16.msra.mxu1 %v7894_v54  ;;  %v7983_v54 = vld [vmem:[#allocation7 + $0x1c4] ss:$16 sps:$4 sm:$0xff]  }
 0x5a9   : > { %1902 = vmatprep.subr.bf16.mxu1 %v7902_v55  ;;  %v7986_v55 = vld [vmem:[#allocation7 + $0x1cc] ss:$16 sps:$4 sm:$0xff]  }
 0x5ac   : > { %1903 = vmatpush2.bf16.msra.mxu1 %v7900_v56  ;;  %v7981_v56 = vld [vmem:[#allocation7 + $0x1c0] ss:$16 sps:$4 sm:$0xff]  }
 0x5ad   : > { %1904 = vmatprep.subr.bf16.mxu1 %v7908_v57  ;;  %v7984_v57 = vld [vmem:[#allocation7 + $0x1c8] ss:$16 sps:$4 sm:$0xff]  }
 0x5b0   : > { %1905 = vmatpush2.bf16.msra.mxu1 %v7906_v58  ;;  %v7989_v58 = vld [vmem:[#allocation7 + $0x1a4] ss:$16 sps:$4 sm:$0xff]  }
 0x5b1   : > { %1906 = vmatprep.subr.bf16.mxu1 %v7914_v59  ;;  %v7992_v59 = vld [vmem:[#allocation7 + $0x1ac] ss:$16 sps:$4 sm:$0xff]  }
 0x5b4   : > { %1907 = vmatpush2.bf16.msra.mxu1 %v7912_v60  ;;  %v7987_v60 = vld [vmem:[#allocation7 + $0x1a0] ss:$16 sps:$4 sm:$0xff]  }
 0x5b5   : > { %1908 = vmatprep.subr.bf16.mxu1 %v7920_v62  ;;  %v7995_v62 = vld [vmem:[#allocation7 + $0x184] ss:$16 sps:$4 sm:$0xff]  }
 0x5b8   : > { %1909 = vmatpush2.bf16.msra.mxu1 %v7918_v1  ;;  %v7993_v1 = vld [vmem:[#allocation7 + $0x180] ss:$16 sps:$4 sm:$0xff]  }
 0x5b9   : > { %1910 = vmatprep.subr.bf16.mxu1 %v7926_v3  ;;  %v8001_v3 = vld [vmem:[#allocation7 + $0x164] ss:$16 sps:$4 sm:$0xff]  }
 0x5bc   : > { %1911 = vmatpush2.bf16.msra.mxu1 %v7924_v7  ;;  %v7999_v7 = vld [vmem:[#allocation7 + $0x160] ss:$16 sps:$4 sm:$0xff]  }
 0x5bd   : > { %2286 = vmatprep.subr.bf16.mxu1 %v7932_v10  ;;  %v8007_v10 = vld [vmem:[#allocation7 + $0x144] ss:$16 sps:$4 sm:$0xff]  }
 0x63f   : > { %v1377_v11 = vpop.f32.mrf.mxu1 }
 0x641   : > { %v1379_v13 = vpop.f32.mrf.mxu1 }
 0x643   : > { %v1381_v14 = vpop.f32.mrf.mxu1 }
 0x644   : > { %v1386_v19 = vpack.c.bf16 %v1381_v14, %v1377_v11  ;;  %v8010_v11 = vld [vmem:[#allocation7 + $0x14c] ss:$16 sps:$4 sm:$0xff]   ;;  %v8008_v14 = vld [vmem:[#allocation7 + $0x148] ss:$16 sps:$4 sm:$0xff]  }
 0x645   : > { %v1383_v15 = vpop.f32.mrf.mxu1 }
 0x646   : > { %v1387_v16 = vpack.c.bf16 %v1383_v15, %v1379_v13  ;;  %v8005_v13 = vld [vmem:[#allocation7 + $0x140] ss:$16 sps:$4 sm:$0xff]   ;;  %v8013_v15 = vld [vmem:[#allocation7 + $0x124] ss:$16 sps:$4 sm:$0xff]  }
 0x648   : > { %1869 = vmatprep.mubr.bf16.mxu0 %v1387_v16  ;;  %1912 = vmatprep.mubr.bf16.mxu1 %v1387_v16  ;;  %v8016_v16 = vld [vmem:[#allocation7 + $0x12c] ss:$16 sps:$4 sm:$0xff]  }
 0x649   : > { %1870 = vmatmul.mubr.bf16.vlgmr.msra.gmra.mxu0 %v1386_v19  ;;  %1913 = vmatmul.mubr.bf16.vlgmr.msra.gmra.mxu1 %v1386_v19  ;;  %v8019_v19 = vld [vmem:[#allocation7 + $0x104] ss:$16 sps:$4 sm:$0xff]  }
 0x64a   : > { %2244 = vmatpush1.bf16.msra.mxu0 %v7927_v17  ;;  %2287 = vmatpush1.bf16.msra.mxu1 %v7930_v18  ;;  %v8011_v17 = vld [vmem:[#allocation7 + $0x120] ss:$16 sps:$4 sm:$0xff]   ;;  %v8014_v18 = vld [vmem:[#allocation7 + $0x128] ss:$16 sps:$4 sm:$0xff]  }
 0x64b   : > { %2275 = vmatprep.mubr.bf16.mxu0 %v9411_v30  ;;  %2318 = vmatprep.mubr.bf16.mxu1 %v9411_v30  ;;  %v7956_v30 = vld [vmem:[#allocation7 + $0x6c] ss:$16 sps:$4 sm:$0xff]  }
 0x64c   : > { %2245 = vmatprep.subr.bf16.mxu0 %v7935_v20  ;;  %2288 = vmatprep.subr.bf16.mxu1 %v7938_v21  ;;  %v8022_v20 = vld [vmem:[#allocation7 + $0x10c] ss:$16 sps:$4 sm:$0xff]   ;;  %v8017_v21 = vld [vmem:[#allocation7 + $0x100] ss:$16 sps:$4 sm:$0xff]  }
 0x64e   : > { %2246 = vmatpush1.bf16.msra.mxu0 %v7933_v22  ;;  %2289 = vmatpush1.bf16.msra.mxu1 %v7936_v23  ;;  %v8020_v22 = vld [vmem:[#allocation7 + $0x108] ss:$16 sps:$4 sm:$0xff]  }
 0x64f   : > { %2247 = vmatprep.subr.bf16.mxu0 %v7941_v24  ;;  %2290 = vmatprep.subr.bf16.mxu1 %v7944_v25 }
 0x652   : > { %2248 = vmatpush1.bf16.msra.mxu0 %v7939_v26  ;;  %2291 = vmatpush1.bf16.msra.mxu1 %v7942_v27 }
 0x653   : > { %2249 = vmatprep.subr.bf16.mxu0 %v7947_v28  ;;  %2292 = vmatprep.subr.bf16.mxu1 %v7950_v29 }
 0x656   : > { %2250 = vmatpush1.bf16.msra.mxu0 %v7945_v31  ;;  %2293 = vmatpush1.bf16.msra.mxu1 %v7948_v33  ;;  %v2344_v33 = vsub.s32 3, %v9401_v4 }
 0x657   : > { %2251 = vmatprep.subr.bf16.mxu0 %v7953_v34  ;;  %2294 = vmatprep.subr.bf16.mxu1 %v7956_v30 }
 0x65a   : > { %2252 = vmatpush1.bf16.msra.mxu0 %v7951_v35  ;;  %2295 = vmatpush1.bf16.msra.mxu1 %v7954_v36  ;;  %v2340_v35 = vsub.s32 2, %v9401_v4  ;;  %v1340_v36 = vld [vmem:[#allocation15 + $0x3] ss:$8 sm:$0xf] }
 0x65b   : > { %2253 = vmatprep.subr.bf16.mxu0 %v7959_v37  ;;  %2296 = vmatprep.subr.bf16.mxu1 %v7962_v38 }
 0x65e   : > { %2254 = vmatpush1.bf16.msra.mxu0 %v7957_v39  ;;  %2297 = vmatpush1.bf16.msra.mxu1 %v7960_v40  ;;  %v2337_v39 = vrot.slane %v1340_v36, %v9404_v6 }
 0x65f   : > { %2255 = vmatprep.subr.bf16.mxu0 %v7965_v41  ;;  %2298 = vmatprep.subr.bf16.mxu1 %v7968_v42  ;;  %v2345_v41 = vrot.slane %v1340_v36, %v2344_v33 }
 0x662   : > { %2256 = vmatpush1.bf16.msra.mxu0 %v7963_v43  ;;  %2299 = vmatpush1.bf16.msra.mxu1 %v7966_v44  ;;  %v2333_v43 = vrot.slane %v1340_v36, %v9407_v8 }
 0x663   : > { %2257 = vmatprep.subr.bf16.mxu0 %v7971_v45  ;;  %2300 = vmatprep.subr.bf16.mxu1 %v7974_v46  ;;  %v2341_v45 = vrot.slane %v1340_v36, %v2340_v35  ;;  %v8052_v36 = vld [vmem:[#allocation9 + $0x664] ss:$16 sps:$4 sm:$0xff]  }
 0x666   : > { %2258 = vmatpush1.bf16.msra.mxu0 %v7969_v47  ;;  %2301 = vmatpush1.bf16.msra.mxu1 %v7972_v49 }
 0x667   : > { %2259 = vmatprep.subr.bf16.mxu0 %v7977_v50  ;;  %2302 = vmatprep.subr.bf16.mxu1 %v7980_v51 }
 0x66a   : > { %2260 = vmatpush2.bf16.msra.mxu0 %v7975_v52  ;;  %2303 = vmatpush2.bf16.msra.mxu1 %v7978_v53 }
 0x66b   : > { %2261 = vmatprep.subr.bf16.mxu0 %v7983_v54  ;;  %2304 = vmatprep.subr.bf16.mxu1 %v7986_v55 }
 0x66e   : > { %2262 = vmatpush2.bf16.msra.mxu0 %v7981_v56  ;;  %2305 = vmatpush2.bf16.msra.mxu1 %v7984_v57 }
 0x66f   : > { %2263 = vmatprep.subr.bf16.mxu0 %v7989_v58  ;;  %2306 = vmatprep.subr.bf16.mxu1 %v7992_v59 }
 0x672   : > { %2264 = vmatpush2.bf16.msra.mxu0 %v7987_v60  ;;  %2307 = vmatpush2.bf16.msra.mxu1 %v7990_v61 }
 0x673   : > { %2265 = vmatprep.subr.bf16.mxu0 %v7995_v62  ;;  %2308 = vmatprep.subr.bf16.mxu1 %v7998_v63 }
 0x676   : > { %2266 = vmatpush2.bf16.msra.mxu0 %v7993_v1  ;;  %2309 = vmatpush2.bf16.msra.mxu1 %v7996_v2 }
 0x677   : > { %2267 = vmatprep.subr.bf16.mxu0 %v8001_v3  ;;  %2310 = vmatprep.subr.bf16.mxu1 %v8004_v5 }
 0x67a   : > { %2268 = vmatpush2.bf16.msra.mxu0 %v7999_v7  ;;  %2311 = vmatpush2.bf16.msra.mxu1 %v8002_v9 }
 0x67b   : > { %2269 = vmatprep.subr.bf16.mxu0 %v8007_v10  ;;  %2312 = vmatprep.subr.bf16.mxu1 %v8010_v11 }
 0x67e   : > { %2270 = vmatpush2.bf16.msra.mxu0 %v8005_v13  ;;  %2313 = vmatpush2.bf16.msra.mxu1 %v8008_v14  ;;  %v8025_v14 = vld [vmem:[#allocation9 + $0x4e4] ss:$16 sps:$4 sm:$0xff]  }
 0x67f   : > { %2271 = vmatprep.subr.bf16.mxu0 %v8013_v15  ;;  %2314 = vmatprep.subr.bf16.mxu1 %v8016_v16  ;;  %v8028_v15 = vld [vmem:[#allocation9 + $0x6e4] ss:$16 sps:$4 sm:$0xff]  }
 0x682   : > { %2272 = vmatpush2.bf16.msra.mxu0 %v8011_v17  ;;  %2315 = vmatpush2.bf16.msra.mxu1 %v8014_v18  ;;  %v8023_v18 = vld [vmem:[#allocation9 + $0x4e0] ss:$16 sps:$4 sm:$0xff]  }
 0x683   : > { %2273 = vmatprep.subr.bf16.mxu0 %v8019_v19  ;;  %2316 = vmatprep.subr.bf16.mxu1 %v8022_v20  ;;  %v8026_v19 = vld [vmem:[#allocation9 + $0x6e0] ss:$16 sps:$4 sm:$0xff]   ;;  %v8031_v20 = vld [vmem:[#allocation9 + $0x4c4] ss:$16 sps:$4 sm:$0xff]  }
 0x686   : > { %2274 = vmatpush2.bf16.msra.mxu0 %v8017_v21  ;;  %2317 = vmatpush2.bf16.msra.mxu1 %v8020_v22  ;;  %v8034_v21 = vld [vmem:[#allocation9 + $0x6c4] ss:$16 sps:$4 sm:$0xff]   ;;  %v8029_v22 = vld [vmem:[#allocation9 + $0x4c0] ss:$16 sps:$4 sm:$0xff]  }
 0x689   : > { %2276 = vmatmul.mubr.bf16.vlgmr.msra.gmra.mxu0 %v9413_v32  ;;  %2319 = vmatmul.mubr.bf16.vlgmr.msra.gmra.mxu1 %v9413_v32 }
 0x68a   : > { %2404 = vmatprep.mubr.bf16.mxu0 %v9079_v48  ;;  %2447 = vmatprep.mubr.bf16.mxu1 %v9079_v48 }
 0x709   : > { %v1871_v23 = vpop.f32.mrf.mxu0  ;;  %v1914_v24 = vpop.f32.mrf.mxu1 }
 0x70b   : > { %v1873_v25 = vpop.f32.mrf.mxu0  ;;  %v1916_v26 = vpop.f32.mrf.mxu1 }
 0x70d   : > { %v1875_v27 = vpop.f32.mrf.mxu0  ;;  %v1918_v28 = vpop.f32.mrf.mxu1 }
 0x70f   : > { %v1877_v29 = vpop.f32.mrf.mxu0  ;;  %v1920_v31 = vpop.f32.mrf.mxu1 }
 0x749   : > { %v2277_v34 = vpop.f32.mrf.mxu0  ;;  %v2320_v30 = vpop.f32.mrf.mxu1 }
 0x74a   : > { %v2278_v42 = vadd.f32 %v2277_v34, %v1871_v23  ;;  %v2321_v44 = vadd.f32 %v2320_v30, %v1914_v24  ;;  %v8032_v23 = vld [vmem:[#allocation9 + $0x6c0] ss:$16 sps:$4 sm:$0xff]   ;;  %v8037_v24 = vld [vmem:[#allocation9 + $0x4a4] ss:$16 sps:$4 sm:$0xff]  }
 0x74b   : > { %v2279_v32 = vpop.f32.mrf.mxu0  ;;  %v2322_v37 = vpop.f32.mrf.mxu1  ;;  %v8044_v34 = vld [vmem:[#allocation9 + $0x680] ss:$16 sps:$4 sm:$0xff]   ;;  %v8049_v30 = vld [vmem:[#allocation9 + $0x464] ss:$16 sps:$4 sm:$0xff]  }
 0x74c   : > { %v2280_v38 = vadd.f32 %v2279_v32, %v1873_v25  ;;  %v2323_v40 = vadd.f32 %v2322_v37, %v1916_v26  ;;  %v2350_v57 = vadd.f32 %v2333_v43, %v2278_v42  ;;  %v2352_v58 = vadd.f32 %v2341_v45, %v2321_v44  ;;  %v8040_v25 = vld [vmem:[#allocation9 + $0x6a4] ss:$16 sps:$4 sm:$0xff]   ;;  %v8035_v26 = vld [vmem:[#allocation9 + $0x4a0] ss:$16 sps:$4 sm:$0xff]  }
 0x74d   : > { %v2281_v46 = vpop.f32.mrf.mxu0  ;;  %v2324_v47 = vpop.f32.mrf.mxu1  ;;  %v8047_v32 = vld [vmem:[#allocation9 + $0x460] ss:$16 sps:$4 sm:$0xff]   ;;  %v8061_v42 = vld [vmem:[#allocation9 + $0x424] ss:$16 sps:$4 sm:$0xff]  }
 0x74e   : > { %v2282_v49 = vadd.f32 %v2281_v46, %v1875_v27  ;;  %v2325_v50 = vadd.f32 %v2324_v47, %v1918_v28  ;;  %v2351_v53 = vadd.f32 %v2337_v39, %v2280_v38  ;;  %v2353_v54 = vadd.f32 %v2345_v41, %v2323_v40  ;;  %v8038_v27 = vld [vmem:[#allocation9 + $0x6a0] ss:$16 sps:$4 sm:$0xff]   ;;  %v8043_v28 = vld [vmem:[#allocation9 + $0x484] ss:$16 sps:$4 sm:$0xff]  }
 0x74f   : > { %v2283_v51 = vpop.f32.mrf.mxu0  ;;  %v2326_v52 = vpop.f32.mrf.mxu1  ;;  %v2358_v9 = vmax.f32 %v2350_v57, 0.0  ;;  %v2360_v10 = vmax.f32 %v2352_v58, 0.0  ;;  %v8050_v37 = vld [vmem:[#allocation9 + $0x660] ss:$16 sps:$4 sm:$0xff]   ;;  %v8055_v38 = vld [vmem:[#allocation9 + $0x444] ss:$16 sps:$4 sm:$0xff]  }
 0x750   : > { %v2284_v55 = vadd.f32 %v2283_v51, %v1877_v29  ;;  %v2327_v56 = vadd.f32 %v2326_v52, %v1920_v31  ;;  %v2354_v59 = vadd.f32 %v2333_v43, %v2282_v49  ;;  %v2356_v60 = vadd.f32 %v2341_v45, %v2325_v50  ;;  %v8046_v29 = vld [vmem:[#allocation9 + $0x684] ss:$16 sps:$4 sm:$0xff]   ;;  %v8041_v31 = vld [vmem:[#allocation9 + $0x480] ss:$16 sps:$4 sm:$0xff]  }
 0x751   : > { %v2359_v2 = vmax.f32 %v2351_v53, 0.0  ;;  %v2361_v3 = vmax.f32 %v2353_v54, 0.0  ;;  %v8053_v40 = vld [vmem:[#allocation9 + $0x440] ss:$16 sps:$4 sm:$0xff]   ;;  %v8064_v43 = vld [vmem:[#allocation9 + $0x624] ss:$16 sps:$4 sm:$0xff]  }
 0x752   : > { %v2355_v61 = vadd.f32 %v2337_v39, %v2284_v55  ;;  %v2357_v62 = vadd.f32 %v2345_v41, %v2327_v56  ;;  %v2362_v63 = vmax.f32 %v2354_v59, 0.0  ;;  %v2364_v1 = vmax.f32 %v2356_v60, 0.0  ;;  %v8058_v39 = vld [vmem:[#allocation9 + $0x644] ss:$16 sps:$4 sm:$0xff]   ;;  %v8056_v41 = vld [vmem:[#allocation9 + $0x640] ss:$16 sps:$4 sm:$0xff]  }
 0x753   : > { %v8059_v44 = vld [vmem:[#allocation9 + $0x420] ss:$16 sps:$4 sm:$0xff]   ;;  %v8067_v46 = vld [vmem:[#allocation9 + $0x404] ss:$16 sps:$4 sm:$0xff]  }
 0x754   : > { %v2363_v5 = vmax.f32 %v2355_v61, 0.0  ;;  %v2365_v7 = vmax.f32 %v2357_v62, 0.0  ;;  %v9437_v16 = vpack.c.bf16 %v2362_v63, %v2358_v9  ;;  %v9439_v17 = vpack.c.bf16 %v2364_v1, %v2360_v10  ;;  %v8062_v45 = vld [vmem:[#allocation9 + $0x620] ss:$16 sps:$4 sm:$0xff]   ;;  %v8070_v47 = vld [vmem:[#allocation9 + $0x604] ss:$16 sps:$4 sm:$0xff]  }
 0x755   : > { %v8065_v49 = vld [vmem:[#allocation9 + $0x400] ss:$16 sps:$4 sm:$0xff]   ;;  %v8073_v51 = vld [vmem:[#allocation9 + $0x5e4] ss:$16 sps:$4 sm:$0xff]  }
 0x756   : > { %v9433_v11 = vpack.c.bf16 %v2363_v5, %v2359_v2  ;;  %v9435_v13 = vpack.c.bf16 %v2365_v7, %v2361_v3  ;;  %v8068_v50 = vld [vmem:[#allocation9 + $0x600] ss:$16 sps:$4 sm:$0xff]   ;;  %v8076_v52 = vld [vmem:[#allocation9 + $0x7e4] ss:$16 sps:$4 sm:$0xff]  }
 0x757   : > { %v8071_v53 = vld [vmem:[#allocation9 + $0x5e0] ss:$16 sps:$4 sm:$0xff]   ;;  %v8079_v55 = vld [vmem:[#allocation9 + $0x5c4] ss:$16 sps:$4 sm:$0xff]  }
 0x758   : > { %2386 = vmatprep.subr.bf16.mxu0 %v9433_v11  ;;  %2429 = vmatprep.subr.bf16.mxu1 %v9435_v13  ;;  %v8074_v54 = vld [vmem:[#allocation9 + $0x7e0] ss:$16 sps:$4 sm:$0xff]   ;;  %v8082_v56 = vld [vmem:[#allocation9 + $0x7c4] ss:$16 sps:$4 sm:$0xff]  }
 0x759   : > { %2387 = vmatpush1.bf16.msra.mxu0 %v9437_v16  ;;  %2430 = vmatpush1.bf16.msra.mxu1 %v9439_v17  ;;  %v8077_v57 = vld [vmem:[#allocation9 + $0x5c0] ss:$16 sps:$4 sm:$0xff]   ;;  %v8085_v59 = vld [vmem:[#allocation9 + $0x5a4] ss:$16 sps:$4 sm:$0xff]  }
 0x75a   : > { %3359 = vmatprep.subr.bf16.mxu0 %v8025_v14  ;;  %3402 = vmatprep.subr.bf16.mxu1 %v8028_v15  ;;  %v8080_v58 = vld [vmem:[#allocation9 + $0x7c0] ss:$16 sps:$4 sm:$0xff]   ;;  %v8088_v60 = vld [vmem:[#allocation9 + $0x7a4] ss:$16 sps:$4 sm:$0xff]  }
 0x75b   : > { %v8083_v61 = vld [vmem:[#allocation9 + $0x5a0] ss:$16 sps:$4 sm:$0xff]   ;;  %v8091_v63 = vld [vmem:[#allocation9 + $0x584] ss:$16 sps:$4 sm:$0xff]  }
 0x75c   : > { %6998 = vmatmul.mubr.msk.bf16.vlgmr.msra.gmra.mxu0 %vm674_vm3, %v9373_v12  ;;  %6999 = vmatmul.mubr.msk.bf16.vlgmr.msra.gmra.mxu1 %vm674_vm3, %v9373_v12  ;;  %v8086_v62 = vld [vmem:[#allocation9 + $0x7a0] ss:$16 sps:$4 sm:$0xff]   ;;  %v8094_v1 = vld [vmem:[#allocation9 + $0x784] ss:$16 sps:$4 sm:$0xff]  }
 0x75d   : > { %3360 = vmatpush1.bf16.msra.mxu0 %v8023_v18  ;;  %3403 = vmatpush1.bf16.msra.mxu1 %v8026_v19  ;;  %v8089_v2 = vld [vmem:[#allocation9 + $0x580] ss:$16 sps:$4 sm:$0xff]   ;;  %v8097_v5 = vld [vmem:[#allocation9 + $0x564] ss:$16 sps:$4 sm:$0xff]  }
 0x75e   : > { %3361 = vmatprep.subr.bf16.mxu0 %v8031_v20  ;;  %3404 = vmatprep.subr.bf16.mxu1 %v8034_v21  ;;  %v8092_v3 = vld [vmem:[#allocation9 + $0x780] ss:$16 sps:$4 sm:$0xff]   ;;  %v8100_v7 = vld [vmem:[#allocation9 + $0x764] ss:$16 sps:$4 sm:$0xff]  }
 0x75f   : > { %v8095_v9 = vld [vmem:[#allocation9 + $0x560] ss:$16 sps:$4 sm:$0xff]   ;;  %v8103_v14 = vld [vmem:[#allocation9 + $0x544] ss:$16 sps:$4 sm:$0xff]  }
 0x760   : > { %v8098_v10 = vld [vmem:[#allocation9 + $0x760] ss:$16 sps:$4 sm:$0xff]   ;;  %v8106_v15 = vld [vmem:[#allocation9 + $0x744] ss:$16 sps:$4 sm:$0xff]  }
 0x761   : > { %3362 = vmatpush1.bf16.msra.mxu0 %v8029_v22  ;;  %3405 = vmatpush1.bf16.msra.mxu1 %v8032_v23  ;;  %v8101_v18 = vld [vmem:[#allocation9 + $0x540] ss:$16 sps:$4 sm:$0xff]   ;;  %v8109_v21 = vld [vmem:[#allocation9 + $0x524] ss:$16 sps:$4 sm:$0xff]  }
 0x762   : > { %3363 = vmatprep.subr.bf16.mxu0 %v8037_v24  ;;  %3406 = vmatprep.subr.bf16.mxu1 %v8040_v25  ;;  %v8104_v19 = vld [vmem:[#allocation9 + $0x740] ss:$16 sps:$4 sm:$0xff]   ;;  %v8112_v23 = vld [vmem:[#allocation9 + $0x724] ss:$16 sps:$4 sm:$0xff]  }
 0x763   : > { %v8107_v20 = vld [vmem:[#allocation9 + $0x520] ss:$16 sps:$4 sm:$0xff]   ;;  %v8115_v24 = vld [vmem:[#allocation9 + $0x504] ss:$16 sps:$4 sm:$0xff]  }
 0x764   : > { %v8110_v22 = vld [vmem:[#allocation9 + $0x720] ss:$16 sps:$4 sm:$0xff]   ;;  %v8118_v25 = vld [vmem:[#allocation9 + $0x704] ss:$16 sps:$4 sm:$0xff]  }
 0x765   : > { %3364 = vmatpush1.bf16.msra.mxu0 %v8035_v26  ;;  %3407 = vmatpush1.bf16.msra.mxu1 %v8038_v27  ;;  %v8113_v26 = vld [vmem:[#allocation9 + $0x500] ss:$16 sps:$4 sm:$0xff]  }
 0x766   : > { %3365 = vmatprep.subr.bf16.mxu0 %v8043_v28  ;;  %3408 = vmatprep.subr.bf16.mxu1 %v8046_v29  ;;  %v8116_v27 = vld [vmem:[#allocation9 + $0x700] ss:$16 sps:$4 sm:$0xff]   ;;  %v8121_v28 = vld [vmem:[#allocation9 + $0x4ec] ss:$16 sps:$4 sm:$0xff]  }
 0x767   : > { %v8124_v29 = vld [vmem:[#allocation9 + $0x6ec] ss:$16 sps:$4 sm:$0xff]  }
 0x769   : > { %3366 = vmatpush1.bf16.msra.mxu0 %v8041_v31  ;;  %3409 = vmatpush1.bf16.msra.mxu1 %v8044_v34 }
 0x76a   : > { %3367 = vmatprep.subr.bf16.mxu0 %v8049_v30  ;;  %3410 = vmatprep.subr.bf16.mxu1 %v8052_v36 }
 0x76d   : > { %3368 = vmatpush1.bf16.msra.mxu0 %v8047_v32  ;;  %3411 = vmatpush1.bf16.msra.mxu1 %v8050_v37 }
 0x76e   : > { %3369 = vmatprep.subr.bf16.mxu0 %v8055_v38  ;;  %3412 = vmatprep.subr.bf16.mxu1 %v8058_v39 }
 0x771   : > { %3370 = vmatpush1.bf16.msra.mxu0 %v8053_v40  ;;  %3413 = vmatpush1.bf16.msra.mxu1 %v8056_v41 }
 0x772   : > { %3371 = vmatprep.subr.bf16.mxu0 %v8061_v42  ;;  %3414 = vmatprep.subr.bf16.mxu1 %v8064_v43  ;;  %v8119_v42 = vld [vmem:[#allocation9 + $0x4e8] ss:$16 sps:$4 sm:$0xff]  }
 0x773   : > { %v8122_v43 = vld [vmem:[#allocation9 + $0x6e8] ss:$16 sps:$4 sm:$0xff]  }
 0x775   : > { %3372 = vmatpush1.bf16.msra.mxu0 %v8059_v44  ;;  %3415 = vmatpush1.bf16.msra.mxu1 %v8062_v45 }
 0x776   : > { %3373 = vmatprep.subr.bf16.mxu0 %v8067_v46  ;;  %3416 = vmatprep.subr.bf16.mxu1 %v8070_v47  ;;  %v8127_v46 = vld [vmem:[#allocation9 + $0x4cc] ss:$16 sps:$4 sm:$0xff]  }
 0x777   : > { %v8130_v47 = vld [vmem:[#allocation9 + $0x6cc] ss:$16 sps:$4 sm:$0xff]  }
 0x779   : > { %3374 = vmatpush1.bf16.msra.mxu0 %v8065_v49  ;;  %3417 = vmatpush1.bf16.msra.mxu1 %v8068_v50  ;;  %v8125_v49 = vld [vmem:[#allocation9 + $0x4c8] ss:$16 sps:$4 sm:$0xff]  }
 0x77a   : > { %3375 = vmatprep.subr.bf16.mxu0 %v8073_v51  ;;  %3418 = vmatprep.subr.bf16.mxu1 %v8076_v52  ;;  %v8128_v50 = vld [vmem:[#allocation9 + $0x6c8] ss:$16 sps:$4 sm:$0xff]   ;;  %v8133_v51 = vld [vmem:[#allocation9 + $0x4ac] ss:$16 sps:$4 sm:$0xff]  }
 0x77b   : > { %v8136_v52 = vld [vmem:[#allocation9 + $0x6ac] ss:$16 sps:$4 sm:$0xff]  }
 0x77d   : > { %3376 = vmatpush2.bf16.msra.mxu0 %v8071_v53  ;;  %3419 = vmatpush2.bf16.msra.mxu1 %v8074_v54  ;;  %v8131_v53 = vld [vmem:[#allocation9 + $0x4a8] ss:$16 sps:$4 sm:$0xff]  }
 0x77e   : > { %3377 = vmatprep.subr.bf16.mxu0 %v8079_v55  ;;  %3420 = vmatprep.subr.bf16.mxu1 %v8082_v56  ;;  %v8134_v54 = vld [vmem:[#allocation9 + $0x6a8] ss:$16 sps:$4 sm:$0xff]   ;;  %v8139_v55 = vld [vmem:[#allocation9 + $0x48c] ss:$16 sps:$4 sm:$0xff]  }
 0x77f   : > { %v8142_v56 = vld [vmem:[#allocation9 + $0x68c] ss:$16 sps:$4 sm:$0xff]  }
 0x781   : > { %3378 = vmatpush2.bf16.msra.mxu0 %v8077_v57  ;;  %3421 = vmatpush2.bf16.msra.mxu1 %v8080_v58  ;;  %v8137_v57 = vld [vmem:[#allocation9 + $0x488] ss:$16 sps:$4 sm:$0xff]  }
 0x782   : > { %3379 = vmatprep.subr.bf16.mxu0 %v8085_v59  ;;  %3422 = vmatprep.subr.bf16.mxu1 %v8088_v60  ;;  %v8140_v58 = vld [vmem:[#allocation9 + $0x688] ss:$16 sps:$4 sm:$0xff]   ;;  %v8145_v59 = vld [vmem:[#allocation9 + $0x46c] ss:$16 sps:$4 sm:$0xff]  }
 0x783   : > { %v8148_v60 = vld [vmem:[#allocation9 + $0x66c] ss:$16 sps:$4 sm:$0xff]  }
 0x785   : > { %3380 = vmatpush2.bf16.msra.mxu0 %v8083_v61  ;;  %3423 = vmatpush2.bf16.msra.mxu1 %v8086_v62  ;;  %v8143_v61 = vld [vmem:[#allocation9 + $0x468] ss:$16 sps:$4 sm:$0xff]  }
 0x786   : > { %3381 = vmatprep.subr.bf16.mxu0 %v8091_v63  ;;  %3424 = vmatprep.subr.bf16.mxu1 %v8094_v1  ;;  %v8146_v62 = vld [vmem:[#allocation9 + $0x668] ss:$16 sps:$4 sm:$0xff]   ;;  %v8151_v63 = vld [vmem:[#allocation9 + $0x44c] ss:$16 sps:$4 sm:$0xff]  }
 0x787   : > { %v8154_v1 = vld [vmem:[#allocation9 + $0x64c] ss:$16 sps:$4 sm:$0xff]  }
 0x789   : > { %3382 = vmatpush2.bf16.msra.mxu0 %v8089_v2  ;;  %3425 = vmatpush2.bf16.msra.mxu1 %v8092_v3  ;;  %v8149_v2 = vld [vmem:[#allocation9 + $0x448] ss:$16 sps:$4 sm:$0xff]  }
 0x78a   : > { %3383 = vmatprep.subr.bf16.mxu0 %v8097_v5  ;;  %3426 = vmatprep.subr.bf16.mxu1 %v8100_v7  ;;  %v8152_v3 = vld [vmem:[#allocation9 + $0x648] ss:$16 sps:$4 sm:$0xff]   ;;  %v8157_v5 = vld [vmem:[#allocation9 + $0x42c] ss:$16 sps:$4 sm:$0xff]  }
 0x78b   : > { %v8160_v7 = vld [vmem:[#allocation9 + $0x62c] ss:$16 sps:$4 sm:$0xff]  }
 0x78d   : > { %3384 = vmatpush2.bf16.msra.mxu0 %v8095_v9  ;;  %3427 = vmatpush2.bf16.msra.mxu1 %v8098_v10  ;;  %v8155_v9 = vld [vmem:[#allocation9 + $0x428] ss:$16 sps:$4 sm:$0xff]  }
 0x78e   : > { %3385 = vmatprep.subr.bf16.mxu0 %v8103_v14  ;;  %3428 = vmatprep.subr.bf16.mxu1 %v8106_v15  ;;  %v8158_v10 = vld [vmem:[#allocation9 + $0x628] ss:$16 sps:$4 sm:$0xff]   ;;  %v8163_v14 = vld [vmem:[#allocation9 + $0x40c] ss:$16 sps:$4 sm:$0xff]  }
 0x78f   : > { %v8166_v15 = vld [vmem:[#allocation9 + $0x60c] ss:$16 sps:$4 sm:$0xff]  }
 0x791   : > { %3386 = vmatpush2.bf16.msra.mxu0 %v8101_v18  ;;  %3429 = vmatpush2.bf16.msra.mxu1 %v8104_v19  ;;  %v8161_v18 = vld [vmem:[#allocation9 + $0x408] ss:$16 sps:$4 sm:$0xff]  }
 0x792   : > { %3387 = vmatprep.subr.bf16.mxu0 %v8109_v21  ;;  %3430 = vmatprep.subr.bf16.mxu1 %v8112_v23  ;;  %v8164_v19 = vld [vmem:[#allocation9 + $0x608] ss:$16 sps:$4 sm:$0xff]   ;;  %v8172_v21 = vld [vmem:[#allocation9 + $0x7ec] ss:$16 sps:$4 sm:$0xff]  }
 0x793   : > { %v8170_v23 = vld [vmem:[#allocation9 + $0x7e8] ss:$16 sps:$4 sm:$0xff]  }
 0x795   : > { %3388 = vmatpush2.bf16.msra.mxu0 %v8107_v20  ;;  %3431 = vmatpush2.bf16.msra.mxu1 %v8110_v22  ;;  %v8169_v20 = vld [vmem:[#allocation9 + $0x5ec] ss:$16 sps:$4 sm:$0xff]   ;;  %v8167_v22 = vld [vmem:[#allocation9 + $0x5e8] ss:$16 sps:$4 sm:$0xff]  }
 0x796   : > { %3389 = vmatprep.subr.bf16.mxu0 %v8115_v24  ;;  %3432 = vmatprep.subr.bf16.mxu1 %v8118_v25  ;;  %v8175_v24 = vld [vmem:[#allocation9 + $0x5cc] ss:$16 sps:$4 sm:$0xff]  }
 0x797   : > { %v8178_v25 = vld [vmem:[#allocation9 + $0x7cc] ss:$16 sps:$4 sm:$0xff]  }
 0x799   : > { %3390 = vmatpush2.bf16.msra.mxu0 %v8113_v26  ;;  %3433 = vmatpush2.bf16.msra.mxu1 %v8116_v27  ;;  %v8173_v26 = vld [vmem:[#allocation9 + $0x5c8] ss:$16 sps:$4 sm:$0xff]  }
 0x79a   : > { %3445 = vmatprep.subr.bf16.mxu0 %v8121_v28  ;;  %3488 = vmatprep.subr.bf16.mxu1 %v8124_v29  ;;  %v8176_v27 = vld [vmem:[#allocation9 + $0x7c8] ss:$16 sps:$4 sm:$0xff]   ;;  %v8181_v28 = vld [vmem:[#allocation9 + $0x5ac] ss:$16 sps:$4 sm:$0xff]  }
 0x79b   : > { %v8184_v29 = vld [vmem:[#allocation9 + $0x7ac] ss:$16 sps:$4 sm:$0xff]  }
 0x81c   : > { %v2406_v31 = vpop.f32.mrf.mxu0  ;;  %v2449_v34 = vpop.f32.mrf.mxu1 }
 0x81e   : > { %v2408_v30 = vpop.f32.mrf.mxu0  ;;  %v2451_v36 = vpop.f32.mrf.mxu1 }
 0x820   : > { %v2410_v32 = vpop.f32.mrf.mxu0  ;;  %v2453_v37 = vpop.f32.mrf.mxu1 }
 0x821   : > { %v9449_v44 = vpack.c.bf16 %v2410_v32, %v2406_v31  ;;  %v9451_v45 = vpack.c.bf16 %v2453_v37, %v2449_v34  ;;  %v8179_v31 = vld [vmem:[#allocation9 + $0x5a8] ss:$16 sps:$4 sm:$0xff]  }
 0x822   : > { %v2412_v38 = vpop.f32.mrf.mxu0  ;;  %v2455_v39 = vpop.f32.mrf.mxu1  ;;  %v8182_v34 = vld [vmem:[#allocation9 + $0x7a8] ss:$16 sps:$4 sm:$0xff]  }
 0x823   : > { %v2459_v40 = vpack.c.bf16 %v2412_v38, %v2408_v30  ;;  %v2461_v41 = vpack.c.bf16 %v2455_v39, %v2451_v36  ;;  %v8187_v30 = vld [vmem:[#allocation9 + $0x58c] ss:$16 sps:$4 sm:$0xff]   ;;  %v8185_v32 = vld [vmem:[#allocation9 + $0x588] ss:$16 sps:$4 sm:$0xff]  }
 0x824   : > { %v8190_v36 = vld [vmem:[#allocation9 + $0x78c] ss:$16 sps:$4 sm:$0xff]   ;;  %v8188_v37 = vld [vmem:[#allocation9 + $0x788] ss:$16 sps:$4 sm:$0xff]  }
 0x825   : > { %3391 = vmatprep.mubr.bf16.mxu0 %v2459_v40  ;;  %3434 = vmatprep.mubr.bf16.mxu1 %v2461_v41  ;;  %v8193_v38 = vld [vmem:[#allocation9 + $0x56c] ss:$16 sps:$4 sm:$0xff]  }
 0x826   : > { %3392 = vmatmul.mubr.bf16.vlgmr.msra.gmra.mxu0 %v9449_v44  ;;  %3435 = vmatmul.mubr.bf16.vlgmr.msra.gmra.mxu1 %v9451_v45  ;;  %v8196_v39 = vld [vmem:[#allocation9 + $0x76c] ss:$16 sps:$4 sm:$0xff]  }
 0x827   : > { %3446 = vmatpush1.bf16.msra.mxu0 %v8119_v42  ;;  %3489 = vmatpush1.bf16.msra.mxu1 %v8122_v43  ;;  %v8199_v42 = vld [vmem:[#allocation9 + $0x54c] ss:$16 sps:$4 sm:$0xff]  }
 0x828   : > { %3477 = vmatprep.mubr.bf16.mxu0 %v2459_v40  ;;  %3520 = vmatprep.mubr.bf16.mxu1 %v2461_v41  ;;  %v8191_v40 = vld [vmem:[#allocation9 + $0x568] ss:$16 sps:$4 sm:$0xff]   ;;  %v8202_v43 = vld [vmem:[#allocation9 + $0x74c] ss:$16 sps:$4 sm:$0xff]  }
 0x829   : > { %3447 = vmatprep.subr.bf16.mxu0 %v8127_v46  ;;  %3490 = vmatprep.subr.bf16.mxu1 %v8130_v47  ;;  %v8194_v41 = vld [vmem:[#allocation9 + $0x768] ss:$16 sps:$4 sm:$0xff]  }
 0x82a   : > { %v8197_v46 = vld [vmem:[#allocation9 + $0x548] ss:$16 sps:$4 sm:$0xff]  }
 0x82b   : > { %3448 = vmatpush1.bf16.msra.mxu0 %v8125_v49  ;;  %3491 = vmatpush1.bf16.msra.mxu1 %v8128_v50  ;;  %v8200_v47 = vld [vmem:[#allocation9 + $0x748] ss:$16 sps:$4 sm:$0xff]   ;;  %v8205_v49 = vld [vmem:[#allocation9 + $0x52c] ss:$16 sps:$4 sm:$0xff]  }
 0x82c   : > { %3449 = vmatprep.subr.bf16.mxu0 %v8133_v51  ;;  %3492 = vmatprep.subr.bf16.mxu1 %v8136_v52  ;;  %v8208_v50 = vld [vmem:[#allocation9 + $0x72c] ss:$16 sps:$4 sm:$0xff]   ;;  %v8203_v51 = vld [vmem:[#allocation9 + $0x528] ss:$16 sps:$4 sm:$0xff]  }
 0x82d   : > { %v8206_v52 = vld [vmem:[#allocation9 + $0x728] ss:$16 sps:$4 sm:$0xff]  }
 0x82f   : > { %3450 = vmatpush1.bf16.msra.mxu0 %v8131_v53  ;;  %3493 = vmatpush1.bf16.msra.mxu1 %v8134_v54  ;;  %v8211_v53 = vld [vmem:[#allocation9 + $0x50c] ss:$16 sps:$4 sm:$0xff]  }
 0x830   : > { %3451 = vmatprep.subr.bf16.mxu0 %v8139_v55  ;;  %3494 = vmatprep.subr.bf16.mxu1 %v8142_v56  ;;  %v8214_v54 = vld [vmem:[#allocation9 + $0x70c] ss:$16 sps:$4 sm:$0xff]   ;;  %v8209_v55 = vld [vmem:[#allocation9 + $0x508] ss:$16 sps:$4 sm:$0xff]  }
 0x831   : > { %v8212_v56 = vld [vmem:[#allocation9 + $0x708] ss:$16 sps:$4 sm:$0xff]  }
 0x833   : > { %3452 = vmatpush1.bf16.msra.mxu0 %v8137_v57  ;;  %3495 = vmatpush1.bf16.msra.mxu1 %v8140_v58  ;;  %v8217_v57 = vld [vmem:[#allocation9 + $0xe4] ss:$16 sps:$4 sm:$0xff]  }
 0x834   : > { %3453 = vmatprep.subr.bf16.mxu0 %v8145_v59  ;;  %3496 = vmatprep.subr.bf16.mxu1 %v8148_v60  ;;  %v8220_v58 = vld [vmem:[#allocation9 + $0x2e4] ss:$16 sps:$4 sm:$0xff]   ;;  %v8215_v59 = vld [vmem:[#allocation9 + $0xe0] ss:$16 sps:$4 sm:$0xff]  }
 0x835   : > { %v8218_v60 = vld [vmem:[#allocation9 + $0x2e0] ss:$16 sps:$4 sm:$0xff]  }
 0x837   : > { %3454 = vmatpush1.bf16.msra.mxu0 %v8143_v61  ;;  %3497 = vmatpush1.bf16.msra.mxu1 %v8146_v62  ;;  %v8223_v61 = vld [vmem:[#allocation9 + $0xc4] ss:$16 sps:$4 sm:$0xff]  }
 0x838   : > { %3455 = vmatprep.subr.bf16.mxu0 %v8151_v63  ;;  %3498 = vmatprep.subr.bf16.mxu1 %v8154_v1  ;;  %v8226_v62 = vld [vmem:[#allocation9 + $0x2c4] ss:$16 sps:$4 sm:$0xff]   ;;  %v8221_v63 = vld [vmem:[#allocation9 + $0xc0] ss:$16 sps:$4 sm:$0xff]  }
 0x839   : > { %v8224_v1 = vld [vmem:[#allocation9 + $0x2c0] ss:$16 sps:$4 sm:$0xff]  }
 0x83b   : > { %3456 = vmatpush1.bf16.msra.mxu0 %v8149_v2  ;;  %3499 = vmatpush1.bf16.msra.mxu1 %v8152_v3  ;;  %v8229_v2 = vld [vmem:[#allocation9 + $0xa4] ss:$16 sps:$4 sm:$0xff]  }
 0x83c   : > { %3457 = vmatprep.subr.bf16.mxu0 %v8157_v5  ;;  %3500 = vmatprep.subr.bf16.mxu1 %v8160_v7  ;;  %v8232_v3 = vld [vmem:[#allocation9 + $0x2a4] ss:$16 sps:$4 sm:$0xff]   ;;  %v8227_v5 = vld [vmem:[#allocation9 + $0xa0] ss:$16 sps:$4 sm:$0xff]  }
 0x83d   : > { %v8230_v7 = vld [vmem:[#allocation9 + $0x2a0] ss:$16 sps:$4 sm:$0xff]  }
 0x83f   : > { %3458 = vmatpush1.bf16.msra.mxu0 %v8155_v9  ;;  %3501 = vmatpush1.bf16.msra.mxu1 %v8158_v10  ;;  %v8233_v9 = vld [vmem:[#allocation9 + $0x80] ss:$16 sps:$4 sm:$0xff]  }
 0x840   : > { %3459 = vmatprep.subr.bf16.mxu0 %v8163_v14  ;;  %3502 = vmatprep.subr.bf16.mxu1 %v8166_v15  ;;  %v8236_v10 = vld [vmem:[#allocation9 + $0x280] ss:$16 sps:$4 sm:$0xff]   ;;  %v8241_v14 = vld [vmem:[#allocation9 + $0x64] ss:$16 sps:$4 sm:$0xff]  }
 0x841   : > { %v8244_v15 = vld [vmem:[#allocation9 + $0x264] ss:$16 sps:$4 sm:$0xff]  }
 0x843   : > { %3460 = vmatpush1.bf16.msra.mxu0 %v8161_v18  ;;  %3503 = vmatpush1.bf16.msra.mxu1 %v8164_v19  ;;  %v8239_v18 = vld [vmem:[#allocation9 + $0x60] ss:$16 sps:$4 sm:$0xff]  }
 0x844   : > { %3461 = vmatprep.subr.bf16.mxu0 %v8169_v20  ;;  %3504 = vmatprep.subr.bf16.mxu1 %v8172_v21  ;;  %v8242_v19 = vld [vmem:[#allocation9 + $0x260] ss:$16 sps:$4 sm:$0xff]   ;;  %v8247_v20 = vld [vmem:[#allocation9 + $0x44] ss:$16 sps:$4 sm:$0xff]  }
 0x845   : > { %v8250_v21 = vld [vmem:[#allocation9 + $0x244] ss:$16 sps:$4 sm:$0xff]  }
 0x847   : > { %3462 = vmatpush2.bf16.msra.mxu0 %v8167_v22  ;;  %3505 = vmatpush2.bf16.msra.mxu1 %v8170_v23  ;;  %v8245_v22 = vld [vmem:[#allocation9 + $0x40] ss:$16 sps:$4 sm:$0xff]  }
 0x848   : > { %3463 = vmatprep.subr.bf16.mxu0 %v8175_v24  ;;  %3506 = vmatprep.subr.bf16.mxu1 %v8178_v25  ;;  %v8248_v23 = vld [vmem:[#allocation9 + $0x240] ss:$16 sps:$4 sm:$0xff]   ;;  %v8253_v24 = vld [vmem:[#allocation9 + $0x24] ss:$16 sps:$4 sm:$0xff]  }
 0x849   : > { %v8256_v25 = vld [vmem:[#allocation9 + $0x224] ss:$16 sps:$4 sm:$0xff]  }
 0x84b   : > { %3464 = vmatpush2.bf16.msra.mxu0 %v8173_v26  ;;  %3507 = vmatpush2.bf16.msra.mxu1 %v8176_v27  ;;  %v8251_v26 = vld [vmem:[#allocation9 + $0x20] ss:$16 sps:$4 sm:$0xff]  }
 0x84c   : > { %3465 = vmatprep.subr.bf16.mxu0 %v8181_v28  ;;  %3508 = vmatprep.subr.bf16.mxu1 %v8184_v29  ;;  %v8254_v27 = vld [vmem:[#allocation9 + $0x220] ss:$16 sps:$4 sm:$0xff]   ;;  %v8259_v28 = vld [vmem:[#allocation9 + $0x4] ss:$16 sps:$4 sm:$0xff]  }
 0x84d   : > { %v8262_v29 = vld [vmem:[#allocation9 + $0x204] ss:$16 sps:$4 sm:$0xff]  }
 0x84f   : > { %3466 = vmatpush2.bf16.msra.mxu0 %v8179_v31  ;;  %3509 = vmatpush2.bf16.msra.mxu1 %v8182_v34  ;;  %v8257_v31 = vld [vmem:[#allocation9] ss:$16 sps:$4 sm:$0xff]  }
 0x850   : > { %3467 = vmatprep.subr.bf16.mxu0 %v8187_v30  ;;  %3510 = vmatprep.subr.bf16.mxu1 %v8190_v36  ;;  %v8260_v34 = vld [vmem:[#allocation9 + $0x200] ss:$16 sps:$4 sm:$0xff]   ;;  %v8265_v30 = vld [vmem:[#allocation9 + $0x1e4] ss:$16 sps:$4 sm:$0xff]  }
 0x851   : > { %v8268_v36 = vld [vmem:[#allocation9 + $0x3e4] ss:$16 sps:$4 sm:$0xff]  }
 0x853   : > { %3468 = vmatpush2.bf16.msra.mxu0 %v8185_v32  ;;  %3511 = vmatpush2.bf16.msra.mxu1 %v8188_v37  ;;  %v8263_v32 = vld [vmem:[#allocation9 + $0x1e0] ss:$16 sps:$4 sm:$0xff]  }
 0x854   : > { %3469 = vmatprep.subr.bf16.mxu0 %v8193_v38  ;;  %3512 = vmatprep.subr.bf16.mxu1 %v8196_v39  ;;  %v8266_v37 = vld [vmem:[#allocation9 + $0x3e0] ss:$16 sps:$4 sm:$0xff]   ;;  %v8271_v38 = vld [vmem:[#allocation9 + $0x1c4] ss:$16 sps:$4 sm:$0xff]  }
 0x855   : > { %v8274_v39 = vld [vmem:[#allocation9 + $0x3c4] ss:$16 sps:$4 sm:$0xff]  }
 0x857   : > { %3470 = vmatpush2.bf16.msra.mxu0 %v8191_v40  ;;  %3513 = vmatpush2.bf16.msra.mxu1 %v8194_v41  ;;  %v8269_v40 = vld [vmem:[#allocation9 + $0x1c0] ss:$16 sps:$4 sm:$0xff]  }
 0x858   : > { %3471 = vmatprep.subr.bf16.mxu0 %v8199_v42  ;;  %3514 = vmatprep.subr.bf16.mxu1 %v8202_v43  ;;  %v8272_v41 = vld [vmem:[#allocation9 + $0x3c0] ss:$16 sps:$4 sm:$0xff]   ;;  %v8277_v42 = vld [vmem:[#allocation9 + $0x1a4] ss:$16 sps:$4 sm:$0xff]  }
 0x859   : > { %v8280_v43 = vld [vmem:[#allocation9 + $0x3a4] ss:$16 sps:$4 sm:$0xff]  }
 0x85b   : > { %3472 = vmatpush2.bf16.msra.mxu0 %v8197_v46  ;;  %3515 = vmatpush2.bf16.msra.mxu1 %v8200_v47  ;;  %v8275_v46 = vld [vmem:[#allocation9 + $0x1a0] ss:$16 sps:$4 sm:$0xff]  }
 0x85c   : > { %3473 = vmatprep.subr.bf16.mxu0 %v8205_v49  ;;  %3516 = vmatprep.subr.bf16.mxu1 %v8208_v50  ;;  %v8278_v47 = vld [vmem:[#allocation9 + $0x3a0] ss:$16 sps:$4 sm:$0xff]   ;;  %v8283_v49 = vld [vmem:[#allocation9 + $0x184] ss:$16 sps:$4 sm:$0xff]  }
 0x85d   : > { %v8286_v50 = vld [vmem:[#allocation9 + $0x384] ss:$16 sps:$4 sm:$0xff]  }
 0x85f   : > { %3474 = vmatpush2.bf16.msra.mxu0 %v8203_v51  ;;  %3517 = vmatpush2.bf16.msra.mxu1 %v8206_v52  ;;  %v8281_v51 = vld [vmem:[#allocation9 + $0x180] ss:$16 sps:$4 sm:$0xff]  }
 0x860   : > { %3475 = vmatprep.subr.bf16.mxu0 %v8211_v53  ;;  %3518 = vmatprep.subr.bf16.mxu1 %v8214_v54  ;;  %v8284_v52 = vld [vmem:[#allocation9 + $0x380] ss:$16 sps:$4 sm:$0xff]   ;;  %v8289_v53 = vld [vmem:[#allocation9 + $0x164] ss:$16 sps:$4 sm:$0xff]  }
 0x861   : > { %v8292_v54 = vld [vmem:[#allocation9 + $0x364] ss:$16 sps:$4 sm:$0xff]  }
 0x863   : > { %3476 = vmatpush2.bf16.msra.mxu0 %v8209_v55  ;;  %3519 = vmatpush2.bf16.msra.mxu1 %v8212_v56  ;;  %v8287_v55 = vld [vmem:[#allocation9 + $0x160] ss:$16 sps:$4 sm:$0xff]  }
 0x864   : > { %4171 = vmatprep.subr.bf16.mxu0 %v8217_v57  ;;  %4214 = vmatprep.subr.bf16.mxu1 %v8220_v58  ;;  %v8290_v56 = vld [vmem:[#allocation9 + $0x360] ss:$16 sps:$4 sm:$0xff]   ;;  %v8295_v57 = vld [vmem:[#allocation9 + $0x144] ss:$16 sps:$4 sm:$0xff]  }
 0x865   : > { %v8298_v58 = vld [vmem:[#allocation9 + $0x344] ss:$16 sps:$4 sm:$0xff]  }
 0x866   : > { %3478 = vmatmul.mubr.bf16.vlgmr.msra.gmra.mxu0 %v9449_v44  ;;  %3521 = vmatmul.mubr.bf16.vlgmr.msra.gmra.mxu1 %v9451_v45  ;;  %v8235_v44 = vld [vmem:[#allocation9 + $0x84] ss:$16 sps:$4 sm:$0xff]  }
 0x867   : > { %4172 = vmatpush1.bf16.msra.mxu0 %v8215_v59  ;;  %4203 = vmatprep.mubr.bf16.mxu0 %v9433_v11  ;;  %v8238_v45 = vld [vmem:[#allocation9 + $0x284] ss:$16 sps:$4 sm:$0xff]   ;;  %v8293_v59 = vld [vmem:[#allocation9 + $0x140] ss:$16 sps:$4 sm:$0xff]  }
 0x868   : > { %4215 = vmatpush1.bf16.msra.mxu1 %v8218_v60  ;;  %4246 = vmatprep.mubr.bf16.mxu1 %v9435_v13  ;;  %v8296_v60 = vld [vmem:[#allocation9 + $0x340] ss:$16 sps:$4 sm:$0xff]  }
 0x869   : > { %4173 = vmatprep.subr.bf16.mxu0 %v8223_v61  ;;  %4216 = vmatprep.subr.bf16.mxu1 %v8226_v62  ;;  %v8301_v61 = vld [vmem:[#allocation9 + $0x124] ss:$16 sps:$4 sm:$0xff]  }
 0x86a   : > { %v8304_v62 = vld [vmem:[#allocation9 + $0x324] ss:$16 sps:$4 sm:$0xff]  }
 0x86b   : > { %4174 = vmatpush1.bf16.msra.mxu0 %v8221_v63  ;;  %v8299_v63 = vld [vmem:[#allocation9 + $0x120] ss:$16 sps:$4 sm:$0xff]  }
 0x86c   : > { %4217 = vmatpush1.bf16.msra.mxu1 %v8224_v1  ;;  %4175 = vmatprep.subr.bf16.mxu0 %v8229_v2  ;;  %v8302_v1 = vld [vmem:[#allocation9 + $0x320] ss:$16 sps:$4 sm:$0xff]   ;;  %v8307_v2 = vld [vmem:[#allocation9 + $0x104] ss:$16 sps:$4 sm:$0xff]  }
 0x86d   : > { %4218 = vmatprep.subr.bf16.mxu1 %v8232_v3  ;;  %v8310_v3 = vld [vmem:[#allocation9 + $0x304] ss:$16 sps:$4 sm:$0xff]  }
 0x86f   : > { %4176 = vmatpush1.bf16.msra.mxu0 %v8227_v5  ;;  %v8305_v5 = vld [vmem:[#allocation9 + $0x100] ss:$16 sps:$4 sm:$0xff]  }
 0x870   : > { %4219 = vmatpush1.bf16.msra.mxu1 %v8230_v7  ;;  %4177 = vmatprep.subr.bf16.mxu0 %v8235_v44  ;;  %v8308_v7 = vld [vmem:[#allocation9 + $0x300] ss:$16 sps:$4 sm:$0xff]   ;;  %v8313_v44 = vld [vmem:[#allocation9 + $0xec] ss:$16 sps:$4 sm:$0xff]  }
 0x871   : > { %4220 = vmatprep.subr.bf16.mxu1 %v8238_v45  ;;  %v8316_v45 = vld [vmem:[#allocation9 + $0x2ec] ss:$16 sps:$4 sm:$0xff]  }
 0x873   : > { %4178 = vmatpush1.bf16.msra.mxu0 %v8233_v9  ;;  %v8311_v9 = vld [vmem:[#allocation9 + $0xe8] ss:$16 sps:$4 sm:$0xff]  }
 0x874   : > { %4221 = vmatpush1.bf16.msra.mxu1 %v8236_v10  ;;  %4179 = vmatprep.subr.bf16.mxu0 %v8241_v14  ;;  %v8314_v10 = vld [vmem:[#allocation9 + $0x2e8] ss:$16 sps:$4 sm:$0xff]   ;;  %v8319_v14 = vld [vmem:[#allocation9 + $0xcc] ss:$16 sps:$4 sm:$0xff]  }
 0x875   : > { %4222 = vmatprep.subr.bf16.mxu1 %v8244_v15  ;;  %v8322_v15 = vld [vmem:[#allocation9 + $0x2cc] ss:$16 sps:$4 sm:$0xff]  }
 0x877   : > { %4180 = vmatpush1.bf16.msra.mxu0 %v8239_v18  ;;  %v8317_v18 = vld [vmem:[#allocation9 + $0xc8] ss:$16 sps:$4 sm:$0xff]  }
 0x878   : > { %4223 = vmatpush1.bf16.msra.mxu1 %v8242_v19  ;;  %4181 = vmatprep.subr.bf16.mxu0 %v8247_v20  ;;  %v8320_v19 = vld [vmem:[#allocation9 + $0x2c8] ss:$16 sps:$4 sm:$0xff]   ;;  %v8325_v20 = vld [vmem:[#allocation9 + $0xac] ss:$16 sps:$4 sm:$0xff]  }
 0x879   : > { %4224 = vmatprep.subr.bf16.mxu1 %v8250_v21  ;;  %v8328_v21 = vld [vmem:[#allocation9 + $0x2ac] ss:$16 sps:$4 sm:$0xff]  }
 0x87b   : > { %4182 = vmatpush1.bf16.msra.mxu0 %v8245_v22  ;;  %v8323_v22 = vld [vmem:[#allocation9 + $0xa8] ss:$16 sps:$4 sm:$0xff]  }
 0x87c   : > { %4225 = vmatpush1.bf16.msra.mxu1 %v8248_v23  ;;  %4183 = vmatprep.subr.bf16.mxu0 %v8253_v24  ;;  %v8326_v23 = vld [vmem:[#allocation9 + $0x2a8] ss:$16 sps:$4 sm:$0xff]   ;;  %v8331_v24 = vld [vmem:[#allocation9 + $0x8c] ss:$16 sps:$4 sm:$0xff]  }
 0x87d   : > { %4226 = vmatprep.subr.bf16.mxu1 %v8256_v25  ;;  %v8334_v25 = vld [vmem:[#allocation9 + $0x28c] ss:$16 sps:$4 sm:$0xff]  }
 0x87f   : > { %4184 = vmatpush1.bf16.msra.mxu0 %v8251_v26  ;;  %v8329_v26 = vld [vmem:[#allocation9 + $0x88] ss:$16 sps:$4 sm:$0xff]  }
 0x880   : > { %4227 = vmatpush1.bf16.msra.mxu1 %v8254_v27  ;;  %4185 = vmatprep.subr.bf16.mxu0 %v8259_v28  ;;  %v8337_v27 = vld [vmem:[#allocation9 + $0x6c] ss:$16 sps:$4 sm:$0xff]  }
 0x881   : > { %4228 = vmatprep.subr.bf16.mxu1 %v8262_v29  ;;  %v8340_v28 = vld [vmem:[#allocation9 + $0x26c] ss:$16 sps:$4 sm:$0xff]   ;;  %v8338_v29 = vld [vmem:[#allocation9 + $0x268] ss:$16 sps:$4 sm:$0xff]  }
 0x883   : > { %4186 = vmatpush1.bf16.msra.mxu0 %v8257_v31  ;;  %v8343_v31 = vld [vmem:[#allocation9 + $0x4c] ss:$16 sps:$4 sm:$0xff]  }
 0x884   : > { %4229 = vmatpush1.bf16.msra.mxu1 %v8260_v34  ;;  %4187 = vmatprep.subr.bf16.mxu0 %v8265_v30  ;;  %v8346_v34 = vld [vmem:[#allocation9 + $0x24c] ss:$16 sps:$4 sm:$0xff]   ;;  %v8341_v30 = vld [vmem:[#allocation9 + $0x48] ss:$16 sps:$4 sm:$0xff]  }
 0x885   : > { %4230 = vmatprep.subr.bf16.mxu1 %v8268_v36  ;;  %v8344_v36 = vld [vmem:[#allocation9 + $0x248] ss:$16 sps:$4 sm:$0xff]  }
 0x887   : > { %4188 = vmatpush2.bf16.msra.mxu0 %v8263_v32  ;;  %v8349_v32 = vld [vmem:[#allocation9 + $0x2c] ss:$16 sps:$4 sm:$0xff]  }
 0x888   : > { %4231 = vmatpush2.bf16.msra.mxu1 %v8266_v37  ;;  %4189 = vmatprep.subr.bf16.mxu0 %v8271_v38  ;;  %v8352_v37 = vld [vmem:[#allocation9 + $0x22c] ss:$16 sps:$4 sm:$0xff]   ;;  %v8347_v38 = vld [vmem:[#allocation9 + $0x28] ss:$16 sps:$4 sm:$0xff]  }
 0x889   : > { %4232 = vmatprep.subr.bf16.mxu1 %v8274_v39  ;;  %v8350_v39 = vld [vmem:[#allocation9 + $0x228] ss:$16 sps:$4 sm:$0xff]  }
 0x88b   : > { %4190 = vmatpush2.bf16.msra.mxu0 %v8269_v40  ;;  %v8355_v40 = vld [vmem:[#allocation9 + $0xc] ss:$16 sps:$4 sm:$0xff]  }
 0x88c   : > { %4233 = vmatpush2.bf16.msra.mxu1 %v8272_v41  ;;  %4191 = vmatprep.subr.bf16.mxu0 %v8277_v42  ;;  %v8358_v41 = vld [vmem:[#allocation9 + $0x20c] ss:$16 sps:$4 sm:$0xff]   ;;  %v8353_v42 = vld [vmem:[#allocation9 + $0x8] ss:$16 sps:$4 sm:$0xff]  }
 0x88d   : > { %4234 = vmatprep.subr.bf16.mxu1 %v8280_v43  ;;  %v8356_v43 = vld [vmem:[#allocation9 + $0x208] ss:$16 sps:$4 sm:$0xff]  }
 0x88f   : > { %4192 = vmatpush2.bf16.msra.mxu0 %v8275_v46  ;;  %v8361_v46 = vld [vmem:[#allocation9 + $0x1ec] ss:$16 sps:$4 sm:$0xff]  }
 0x890   : > { %4235 = vmatpush2.bf16.msra.mxu1 %v8278_v47  ;;  %4193 = vmatprep.subr.bf16.mxu0 %v8283_v49  ;;  %v8364_v47 = vld [vmem:[#allocation9 + $0x3ec] ss:$16 sps:$4 sm:$0xff]   ;;  %v8359_v49 = vld [vmem:[#allocation9 + $0x1e8] ss:$16 sps:$4 sm:$0xff]  }
 0x891   : > { %4236 = vmatprep.subr.bf16.mxu1 %v8286_v50  ;;  %v8362_v50 = vld [vmem:[#allocation9 + $0x3e8] ss:$16 sps:$4 sm:$0xff]  }
 0x893   : > { %4194 = vmatpush2.bf16.msra.mxu0 %v8281_v51  ;;  %v8367_v51 = vld [vmem:[#allocation9 + $0x1cc] ss:$16 sps:$4 sm:$0xff]  }
 0x894   : > { %4237 = vmatpush2.bf16.msra.mxu1 %v8284_v52  ;;  %4195 = vmatprep.subr.bf16.mxu0 %v8289_v53  ;;  %v8370_v52 = vld [vmem:[#allocation9 + $0x3cc] ss:$16 sps:$4 sm:$0xff]   ;;  %v8365_v53 = vld [vmem:[#allocation9 + $0x1c8] ss:$16 sps:$4 sm:$0xff]  }
 0x895   : > { %4238 = vmatprep.subr.bf16.mxu1 %v8292_v54  ;;  %v8368_v54 = vld [vmem:[#allocation9 + $0x3c8] ss:$16 sps:$4 sm:$0xff]  }
 0x897   : > { %4196 = vmatpush2.bf16.msra.mxu0 %v8287_v55  ;;  %v8373_v55 = vld [vmem:[#allocation9 + $0x1ac] ss:$16 sps:$4 sm:$0xff]  }
 0x898   : > { %4239 = vmatpush2.bf16.msra.mxu1 %v8290_v56  ;;  %4197 = vmatprep.subr.bf16.mxu0 %v8295_v57  ;;  %v8376_v56 = vld [vmem:[#allocation9 + $0x3ac] ss:$16 sps:$4 sm:$0xff]   ;;  %v8371_v57 = vld [vmem:[#allocation9 + $0x1a8] ss:$16 sps:$4 sm:$0xff]  }
 0x899   : > { %4240 = vmatprep.subr.bf16.mxu1 %v8298_v58  ;;  %v8374_v58 = vld [vmem:[#allocation9 + $0x3a8] ss:$16 sps:$4 sm:$0xff]  }
 0x89b   : > { %4198 = vmatpush2.bf16.msra.mxu0 %v8293_v59  ;;  %v8379_v59 = vld [vmem:[#allocation9 + $0x18c] ss:$16 sps:$4 sm:$0xff]  }
 0x89c   : > { %4241 = vmatpush2.bf16.msra.mxu1 %v8296_v60  ;;  %4199 = vmatprep.subr.bf16.mxu0 %v8301_v61  ;;  %v8382_v60 = vld [vmem:[#allocation9 + $0x38c] ss:$16 sps:$4 sm:$0xff]   ;;  %v8377_v61 = vld [vmem:[#allocation9 + $0x188] ss:$16 sps:$4 sm:$0xff]  }
 0x89d   : > { %4242 = vmatprep.subr.bf16.mxu1 %v8304_v62  ;;  %v8380_v62 = vld [vmem:[#allocation9 + $0x388] ss:$16 sps:$4 sm:$0xff]  }
 0x89f   : > { %4200 = vmatpush2.bf16.msra.mxu0 %v8299_v63  ;;  %v8385_v63 = vld [vmem:[#allocation9 + $0x16c] ss:$16 sps:$4 sm:$0xff]  }
 0x8a0   : > { %4243 = vmatpush2.bf16.msra.mxu1 %v8302_v1  ;;  %4201 = vmatprep.subr.bf16.mxu0 %v8307_v2  ;;  %v8388_v1 = vld [vmem:[#allocation9 + $0x36c] ss:$16 sps:$4 sm:$0xff]   ;;  %v8383_v2 = vld [vmem:[#allocation9 + $0x168] ss:$16 sps:$4 sm:$0xff]  }
 0x8a1   : > { %4244 = vmatprep.subr.bf16.mxu1 %v8310_v3  ;;  %v8386_v3 = vld [vmem:[#allocation9 + $0x368] ss:$16 sps:$4 sm:$0xff]  }
 0x8a3   : > { %4202 = vmatpush2.bf16.msra.mxu0 %v8305_v5  ;;  %v8391_v5 = vld [vmem:[#allocation9 + $0x14c] ss:$16 sps:$4 sm:$0xff]  }
 0x8a4   : > { %4245 = vmatpush2.bf16.msra.mxu1 %v8308_v7  ;;  %4257 = vmatprep.subr.bf16.mxu0 %v8313_v44  ;;  %v8394_v7 = vld [vmem:[#allocation9 + $0x34c] ss:$16 sps:$4 sm:$0xff]   ;;  %v8389_v44 = vld [vmem:[#allocation9 + $0x148] ss:$16 sps:$4 sm:$0xff]  }
 0x8a5   : > { %4300 = vmatprep.subr.bf16.mxu1 %v8316_v45  ;;  %v8392_v45 = vld [vmem:[#allocation9 + $0x348] ss:$16 sps:$4 sm:$0xff]  }
 0x8a6   : > { %4204 = vmatmul.mubr.bf16.vlgmr.msra.gmra.mxu0 %v9437_v16 }
 0x8a7   : > { %4247 = vmatmul.mubr.bf16.vlgmr.msra.gmra.mxu1 %v9439_v17  ;;  %4258 = vmatpush1.bf16.msra.mxu0 %v8311_v9  ;;  %v8397_v9 = vld [vmem:[#allocation9 + $0x12c] ss:$16 sps:$4 sm:$0xff]  }
 0x8a8   : > { %4289 = vmatprep.mubr.bf16.mxu0 %v9433_v11  ;;  %4301 = vmatpush1.bf16.msra.mxu1 %v8314_v10  ;;  %v8332_v11 = vld [vmem:[#allocation9 + $0x288] ss:$16 sps:$4 sm:$0xff]   ;;  %v8400_v10 = vld [vmem:[#allocation9 + $0x32c] ss:$16 sps:$4 sm:$0xff]  }
 0x8a9   : > { %4332 = vmatprep.mubr.bf16.mxu1 %v9435_v13  ;;  %4259 = vmatprep.subr.bf16.mxu0 %v8319_v14  ;;  %v8335_v13 = vld [vmem:[#allocation9 + $0x68] ss:$16 sps:$4 sm:$0xff]  }
 0x8aa   : > { %4302 = vmatprep.subr.bf16.mxu1 %v8322_v15  ;;  %v8395_v14 = vld [vmem:[#allocation9 + $0x128] ss:$16 sps:$4 sm:$0xff]  }
 0x8ab   : > { %4260 = vmatpush1.bf16.msra.mxu0 %v8317_v18  ;;  %v8398_v15 = vld [vmem:[#allocation9 + $0x328] ss:$16 sps:$4 sm:$0xff]   ;;  %v8403_v18 = vld [vmem:[#allocation9 + $0x10c] ss:$16 sps:$4 sm:$0xff]  }
 0x8ac   : > { %4303 = vmatpush1.bf16.msra.mxu1 %v8320_v19  ;;  %4261 = vmatprep.subr.bf16.mxu0 %v8325_v20  ;;  %v8406_v19 = vld [vmem:[#allocation9 + $0x30c] ss:$16 sps:$4 sm:$0xff]   ;;  %v8401_v20 = vld [vmem:[#allocation9 + $0x108] ss:$16 sps:$4 sm:$0xff]  }
 0x8ad   : > { %4304 = vmatprep.subr.bf16.mxu1 %v8328_v21  ;;  %v8404_v21 = vld [vmem:[#allocation9 + $0x308] ss:$16 sps:$4 sm:$0xff]  }
 0x8af   : > { %4262 = vmatpush1.bf16.msra.mxu0 %v8323_v22 }
 0x8b0   : > { %4305 = vmatpush1.bf16.msra.mxu1 %v8326_v23  ;;  %4263 = vmatprep.subr.bf16.mxu0 %v8331_v24 }
 0x8b1   : > { %4306 = vmatprep.subr.bf16.mxu1 %v8334_v25 }
 0x8b3   : > { %4264 = vmatpush1.bf16.msra.mxu0 %v8329_v26 }
 0x8b4   : > { %4307 = vmatpush1.bf16.msra.mxu1 %v8332_v11  ;;  %4265 = vmatprep.subr.bf16.mxu0 %v8337_v27 }
 0x8b5   : > { %4308 = vmatprep.subr.bf16.mxu1 %v8340_v28 }
 0x8b7   : > { %4266 = vmatpush1.bf16.msra.mxu0 %v8335_v13 }
 0x8b8   : > { %4309 = vmatpush1.bf16.msra.mxu1 %v8338_v29  ;;  %4267 = vmatprep.subr.bf16.mxu0 %v8343_v31 }
 0x8b9   : > { %4310 = vmatprep.subr.bf16.mxu1 %v8346_v34 }
 0x8bb   : > { %4268 = vmatpush1.bf16.msra.mxu0 %v8341_v30 }
 0x8bc   : > { %4311 = vmatpush1.bf16.msra.mxu1 %v8344_v36  ;;  %4269 = vmatprep.subr.bf16.mxu0 %v8349_v32 }
 0x8bd   : > { %4312 = vmatprep.subr.bf16.mxu1 %v8352_v37 }
 0x8bf   : > { %4270 = vmatpush1.bf16.msra.mxu0 %v8347_v38 }
 0x8c0   : > { %4313 = vmatpush1.bf16.msra.mxu1 %v8350_v39  ;;  %4271 = vmatprep.subr.bf16.mxu0 %v8355_v40 }
 0x8c1   : > { %4314 = vmatprep.subr.bf16.mxu1 %v8358_v41 }
 0x8c3   : > { %4272 = vmatpush1.bf16.msra.mxu0 %v8353_v42 }
 0x8c4   : > { %4315 = vmatpush1.bf16.msra.mxu1 %v8356_v43  ;;  %4273 = vmatprep.subr.bf16.mxu0 %v8361_v46 }
 0x8c5   : > { %4316 = vmatprep.subr.bf16.mxu1 %v8364_v47 }
 0x8c7   : > { %4274 = vmatpush2.bf16.msra.mxu0 %v8359_v49 }
 0x8c8   : > { %4317 = vmatpush2.bf16.msra.mxu1 %v8362_v50  ;;  %4275 = vmatprep.subr.bf16.mxu0 %v8367_v51  ;;  %v9475_v50 = vld [vmem:[#allocation15 + $0x4] ss:$8 sm:$0xf] }
 0x8c9   : > { %4318 = vmatprep.subr.bf16.mxu1 %v8370_v52 }
 0x8cb   : > { %4276 = vmatpush2.bf16.msra.mxu0 %v8365_v53 }
 0x8cc   : > { %4319 = vmatpush2.bf16.msra.mxu1 %v8368_v54  ;;  %4277 = vmatprep.subr.bf16.mxu0 %v8373_v55 }
 0x8cd   : > { %4320 = vmatprep.subr.bf16.mxu1 %v8376_v56  ;;  %v4351_v56 = vrot.slane %v9475_v50, %v9404_v6 }
 0x8cf   : > { %4278 = vmatpush2.bf16.msra.mxu0 %v8371_v57 }
 0x8d0   : > { %4321 = vmatpush2.bf16.msra.mxu1 %v8374_v58  ;;  %4279 = vmatprep.subr.bf16.mxu0 %v8379_v59 }
 0x8d1   : > { %4322 = vmatprep.subr.bf16.mxu1 %v8382_v60  ;;  %v4347_v60 = vrot.slane %v9475_v50, %v9407_v8 }
 0x8d3   : > { %4280 = vmatpush2.bf16.msra.mxu0 %v8377_v61 }
 0x8d4   : > { %4323 = vmatpush2.bf16.msra.mxu1 %v8380_v62  ;;  %4281 = vmatprep.subr.bf16.mxu0 %v8385_v63 }
 0x8d5   : > { %4324 = vmatprep.subr.bf16.mxu1 %v8388_v1 }
 0x8d7   : > { %4282 = vmatpush2.bf16.msra.mxu0 %v8383_v2 }
 0x8d8   : > { %4325 = vmatpush2.bf16.msra.mxu1 %v8386_v3  ;;  %4283 = vmatprep.subr.bf16.mxu0 %v8391_v5 }
 0x8d9   : > { %4326 = vmatprep.subr.bf16.mxu1 %v8394_v7 }
 0x8db   : > { %4284 = vmatpush2.bf16.msra.mxu0 %v8389_v44 }
 0x8dc   : > { %4327 = vmatpush2.bf16.msra.mxu1 %v8392_v45  ;;  %4285 = vmatprep.subr.bf16.mxu0 %v8397_v9 }
 0x8dd   : > { %4328 = vmatprep.subr.bf16.mxu1 %v8400_v10 }
 0x8df   : > { %4286 = vmatpush2.bf16.msra.mxu0 %v8395_v14 }
 0x8e0   : > { %4329 = vmatpush2.bf16.msra.mxu1 %v8398_v15  ;;  %4287 = vmatprep.subr.bf16.mxu0 %v8403_v18  ;;  %v8409_v18 = vld [vmem:[#allocation10 + $0x274] ss:$8 sps:$4 sm:$0xff]  }
 0x8e1   : > { %4330 = vmatprep.subr.bf16.mxu1 %v8406_v19 }
 0x8e3   : > { %4288 = vmatpush2.bf16.msra.mxu0 %v8401_v20  ;;  %v8407_v20 = vld [vmem:[#allocation10 + $0x270] ss:$8 sps:$4 sm:$0xff]  }
 0x8e4   : > { %4331 = vmatpush2.bf16.msra.mxu1 %v8404_v21  ;;  %v8412_v21 = vld [vmem:[#allocation10 + $0x264] ss:$8 sps:$4 sm:$0xff]  }
 0x8e6   : > { %4290 = vmatmul.mubr.bf16.vlgmr.msra.gmra.mxu0 %v9437_v16  ;;  %v3393_v22 = vpop.f32.mrf.mxu0  ;;  %v3436_v23 = vpop.f32.mrf.mxu1 }
 0x8e7   : > { %4333 = vmatmul.mubr.bf16.vlgmr.msra.gmra.mxu1 %v9439_v17  ;;  %4418 = vmatprep.mubr.bf16.mxu0 %v9079_v48  ;;  %v3437_v40 = vadd.f32 %v3436_v23, %v3393_v22  ;;  %v8410_v22 = vld [vmem:[#allocation10 + $0x260] ss:$8 sps:$4 sm:$0xff]   ;;  %v8415_v23 = vld [vmem:[#allocation10 + $0x254] ss:$8 sps:$4 sm:$0xff]  }
 0x8e8   : > { %4461 = vmatprep.mubr.bf16.mxu1 %v9079_v48  ;;  %v3395_v24 = vpop.f32.mrf.mxu0  ;;  %v3438_v25 = vpop.f32.mrf.mxu1 }
 0x8e9   : > { %v3439_v42 = vadd.f32 %v3438_v25, %v3395_v24  ;;  %v8413_v24 = vld [vmem:[#allocation10 + $0x250] ss:$8 sps:$4 sm:$0xff]   ;;  %v8418_v25 = vld [vmem:[#allocation10 + $0x244] ss:$8 sps:$4 sm:$0xff]  }
 0x8ea   : > { %v3397_v26 = vpop.f32.mrf.mxu0  ;;  %v3440_v11 = vpop.f32.mrf.mxu1 }
 0x8eb   : > { %v3441_v49 = vadd.f32 %v3440_v11, %v3397_v26  ;;  %v8416_v26 = vld [vmem:[#allocation10 + $0x240] ss:$8 sps:$4 sm:$0xff]   ;;  %v8421_v11 = vld [vmem:[#allocation10 + $0x234] ss:$8 sps:$4 sm:$0xff]  }
 0x8ec   : > { %v3399_v27 = vpop.f32.mrf.mxu0  ;;  %v3442_v28 = vpop.f32.mrf.mxu1 }
 0x8ed   : > { %v3443_v54 = vadd.f32 %v3442_v28, %v3399_v27  ;;  %v8419_v27 = vld [vmem:[#allocation10 + $0x230] ss:$8 sps:$4 sm:$0xff]   ;;  %v8424_v28 = vld [vmem:[#allocation10 + $0x224] ss:$8 sps:$4 sm:$0xff]  }
 0x926   : > { %v3479_v13 = vpop.f32.mrf.mxu0  ;;  %v3522_v29 = vpop.f32.mrf.mxu1 }
 0x927   : > { %v9467_v31 = vadd.f32 %v3522_v29, %v3479_v13  ;;  %v8422_v13 = vld [vmem:[#allocation10 + $0x220] ss:$8 sps:$4 sm:$0xff]   ;;  %v8427_v29 = vld [vmem:[#allocation10 + $0x214] ss:$8 sps:$4 sm:$0xff]  }
 0x928   : > { %v3481_v34 = vpop.f32.mrf.mxu0  ;;  %v3524_v16 = vpop.f32.mrf.mxu1 }
 0x929   : > { %v9469_v30 = vadd.f32 %v3524_v16, %v3481_v34  ;;  %v8425_v34 = vld [vmem:[#allocation10 + $0x210] ss:$8 sps:$4 sm:$0xff]   ;;  %v8430_v16 = vld [vmem:[#allocation10 + $0x204] ss:$8 sps:$4 sm:$0xff]  }
 0x92a   : > { %v3483_v17 = vpop.f32.mrf.mxu0  ;;  %v3526_v36 = vpop.f32.mrf.mxu1 }
 0x92b   : > { %v9471_v32 = vadd.f32 %v3526_v36, %v3483_v17  ;;  %v8428_v17 = vld [vmem:[#allocation10 + $0x200] ss:$8 sps:$4 sm:$0xff]   ;;  %v8433_v36 = vld [vmem:[#allocation10 + $0x2f4] ss:$8 sps:$4 sm:$0xff]  }
 0x92c   : > { %v3485_v37 = vpop.f32.mrf.mxu0  ;;  %v3528_v38 = vpop.f32.mrf.mxu1 }
 0x92d   : > { %v9473_v39 = vadd.f32 %v3528_v38, %v3485_v37  ;;  %v8431_v37 = vld [vmem:[#allocation10 + $0x2f0] ss:$8 sps:$4 sm:$0xff]   ;;  %v8436_v38 = vld [vmem:[#allocation10 + $0x2e4] ss:$8 sps:$4 sm:$0xff]  }
 0x966   : > { %v4205_v41 = vpop.f32.mrf.mxu0 }
 0x967   : > { %v4248_v43 = vpop.f32.mrf.mxu1  ;;  %v4206_v46 = vadd.f32 %v4205_v41, %v3437_v40  ;;  %v8434_v40 = vld [vmem:[#allocation10 + $0x2e0] ss:$8 sps:$4 sm:$0xff]   ;;  %v8439_v41 = vld [vmem:[#allocation10 + $0x2d4] ss:$8 sps:$4 sm:$0xff]  }
 0x968   : > { %v4207_v47 = vpop.f32.mrf.mxu0 }
 0x969   : > { %v4208_v51 = vadd.f32 %v4207_v47, %v3439_v42  ;;  %v4250_v52 = vpop.f32.mrf.mxu1  ;;  %v4249_v59 = vadd.f32 %v4248_v43, %v4206_v46  ;;  %v8437_v42 = vld [vmem:[#allocation10 + $0x2d0] ss:$8 sps:$4 sm:$0xff]   ;;  %v8442_v43 = vld [vmem:[#allocation10 + $0x2c4] ss:$8 sps:$4 sm:$0xff]   ;;  %v8440_v46 = vld [vmem:[#allocation10 + $0x2c0] ss:$8 sps:$4 sm:$0xff]  }
 0x96a   : > { %v4209_v53 = vpop.f32.mrf.mxu0  ;;  %v8445_v47 = vld [vmem:[#allocation10 + $0x2b4] ss:$8 sps:$4 sm:$0xff]  }
 0x96b   : > { %v4251_v55 = vadd.f32 %v4250_v52, %v4208_v51  ;;  %v4210_v57 = vadd.f32 %v4209_v53, %v3441_v49  ;;  %v4252_v58 = vpop.f32.mrf.mxu1  ;;  %v4364_v7 = vadd.f32 %v4347_v60, %v4249_v59  ;;  %v8448_v59 = vld [vmem:[#allocation10 + $0x2a4] ss:$8 sps:$4 sm:$0xff]  }
 0x96c   : > { %v4211_v61 = vpop.f32.mrf.mxu0 }
 0x96d   : > { %v4253_v62 = vadd.f32 %v4252_v58, %v4210_v57  ;;  %v4212_v63 = vadd.f32 %v4211_v61, %v3443_v54  ;;  %v4254_v1 = vpop.f32.mrf.mxu1  ;;  %v4365_v2 = vadd.f32 %v4351_v56, %v4251_v55  ;;  %v4372_v14 = vmax.f32 %v4364_v7, 0.0  ;;  %v8443_v54 = vld [vmem:[#allocation10 + $0x2b0] ss:$8 sps:$4 sm:$0xff]  }
 0x96f   : > { %v4368_v3 = vadd.f32 %v4347_v60, %v4253_v62  ;;  %v4255_v5 = vadd.f32 %v4254_v1, %v4212_v63  ;;  %v4373_v9 = vmax.f32 %v4365_v2, 0.0  ;;  %v8446_v2 = vld [vmem:[#allocation10 + $0x2a0] ss:$8 sps:$4 sm:$0xff]  }
 0x971   : > { %v4369_v44 = vadd.f32 %v4351_v56, %v4255_v5  ;;  %v4376_v45 = vmax.f32 %v4368_v3, 0.0  ;;  %v4355_v56 = vrot.slane %v9475_v50, %v2340_v35 }
 0x973   : > { %v4377_v10 = vmax.f32 %v4369_v44, 0.0  ;;  %v9483_v19 = vpack.c.bf16 %v4376_v45, %v4372_v14 }
 0x975   : > { %v9481_v15 = vpack.c.bf16 %v4377_v10, %v4373_v9 }
 0x977   : > { %4400 = vmatprep.subr.bf16.mxu0 %v9481_v15 }
 0x978   : > { %4401 = vmatpush1.bf16.msra.mxu0 %v9483_v19 }
 0x979   : > { %4925 = vmatprep.subr.bf16.mxu0 %v8409_v18  ;;  %v8451_v18 = vld [vmem:[#allocation10 + $0x294] ss:$8 sps:$4 sm:$0xff]  }
 0x97b   : > { %7256 = vmatmul.mubr.msk.bf16.vlgmr.msra.gmra.mxu0 %vm674_vm3, %v9373_v12 }
 0x97c   : > { %4926 = vmatpush1.bf16.msra.mxu0 %v8407_v20  ;;  %v8452_v20 = vld [vmem:[#allocation10 + $0x280] ss:$8 sps:$4 sm:$0xff]  }
 0x97d   : > { %4927 = vmatprep.subr.bf16.mxu0 %v8412_v21  ;;  %v8454_v21 = vld [vmem:[#allocation10 + $0x284] ss:$8 sps:$4 sm:$0xff]  }
 0x980   : > { %4928 = vmatpush1.bf16.msra.mxu0 %v8410_v22  ;;  %v8455_v22 = vld [vmem:[#allocation10 + $0x370] ss:$8 sps:$4 sm:$0xff]  }
 0x981   : > { %4929 = vmatprep.subr.bf16.mxu0 %v8415_v23  ;;  %v8457_v23 = vld [vmem:[#allocation10 + $0x374] ss:$8 sps:$4 sm:$0xff]  }
 0x984   : > { %4930 = vmatpush1.bf16.msra.mxu0 %v8413_v24  ;;  %v8460_v24 = vld [vmem:[#allocation10 + $0x74] ss:$8 sps:$4 sm:$0xff]  }
 0x985   : > { %4931 = vmatprep.subr.bf16.mxu0 %v8418_v25  ;;  %v8463_v25 = vld [vmem:[#allocation10 + $0x364] ss:$8 sps:$4 sm:$0xff]  }
 0x988   : > { %4932 = vmatpush1.bf16.msra.mxu0 %v8416_v26  ;;  %v8461_v26 = vld [vmem:[#allocation10 + $0x360] ss:$8 sps:$4 sm:$0xff]  }
 0x989   : > { %4933 = vmatprep.subr.bf16.mxu0 %v8421_v11  ;;  %v8469_v11 = vld [vmem:[#allocation10 + $0x354] ss:$8 sps:$4 sm:$0xff]  }
 0x98c   : > { %4934 = vmatpush1.bf16.msra.mxu0 %v8419_v27  ;;  %v8467_v27 = vld [vmem:[#allocation10 + $0x350] ss:$8 sps:$4 sm:$0xff]  }
 0x98d   : > { %4935 = vmatprep.subr.bf16.mxu0 %v8424_v28  ;;  %v8475_v28 = vld [vmem:[#allocation10 + $0x344] ss:$8 sps:$4 sm:$0xff]  }
 0x990   : > { %4936 = vmatpush1.bf16.msra.mxu0 %v8422_v13  ;;  %v8473_v13 = vld [vmem:[#allocation10 + $0x340] ss:$8 sps:$4 sm:$0xff]  }
 0x991   : > { %4937 = vmatprep.subr.bf16.mxu0 %v8427_v29  ;;  %v8481_v29 = vld [vmem:[#allocation10 + $0x334] ss:$8 sps:$4 sm:$0xff]  }
 0x994   : > { %4938 = vmatpush1.bf16.msra.mxu0 %v8425_v34  ;;  %v8479_v34 = vld [vmem:[#allocation10 + $0x330] ss:$8 sps:$4 sm:$0xff]  }
 0x995   : > { %4939 = vmatprep.subr.bf16.mxu0 %v8430_v16  ;;  %v8487_v16 = vld [vmem:[#allocation10 + $0x324] ss:$8 sps:$4 sm:$0xff]  }
 0x998   : > { %4940 = vmatpush1.bf16.msra.mxu0 %v8428_v17  ;;  %v8485_v17 = vld [vmem:[#allocation10 + $0x320] ss:$8 sps:$4 sm:$0xff]  }
 0x999   : > { %4941 = vmatprep.subr.bf16.mxu0 %v8433_v36  ;;  %v8493_v36 = vld [vmem:[#allocation10 + $0x314] ss:$8 sps:$4 sm:$0xff]  }
 0x99c   : > { %4942 = vmatpush2.bf16.msra.mxu0 %v8431_v37  ;;  %v8491_v37 = vld [vmem:[#allocation10 + $0x310] ss:$8 sps:$4 sm:$0xff]  }
 0x99d   : > { %4943 = vmatprep.subr.bf16.mxu0 %v8436_v38  ;;  %v8499_v38 = vld [vmem:[#allocation10 + $0x304] ss:$8 sps:$4 sm:$0xff]  }
 0x9a0   : > { %4944 = vmatpush2.bf16.msra.mxu0 %v8434_v40  ;;  %v8497_v40 = vld [vmem:[#allocation10 + $0x300] ss:$8 sps:$4 sm:$0xff]  }
 0x9a1   : > { %4945 = vmatprep.subr.bf16.mxu0 %v8439_v41  ;;  %v8505_v41 = vld [vmem:[#allocation10 + $0x3f4] ss:$8 sps:$4 sm:$0xff]  }
 0x9a4   : > { %4946 = vmatpush2.bf16.msra.mxu0 %v8437_v42  ;;  %v8503_v42 = vld [vmem:[#allocation10 + $0x3f0] ss:$8 sps:$4 sm:$0xff]  }
 0x9a5   : > { %4947 = vmatprep.subr.bf16.mxu0 %v8442_v43  ;;  %v8511_v43 = vld [vmem:[#allocation10 + $0x3e4] ss:$8 sps:$4 sm:$0xff]  }
 0x9a6   : > { %v4291_v49 = vpop.f32.mrf.mxu0 }
 0x9a7   : > { %v4292_v51 = vadd.f32 %v4291_v49, %v9467_v31  ;;  %v4334_v52 = vpop.f32.mrf.mxu1  ;;  %v4359_v31 = vrot.slane %v9475_v50, %v2344_v33  ;;  %v8515_v49 = vld [vmem:[#allocation10 + $0x3d0] ss:$8 sps:$4 sm:$0xff]  }
 0x9a8   : > { %v4293_v53 = vpop.f32.mrf.mxu0  ;;  %4948 = vmatpush2.bf16.msra.mxu0 %v8440_v46  ;;  %v8509_v46 = vld [vmem:[#allocation10 + $0x3e0] ss:$8 sps:$4 sm:$0xff]  }
 0x9a9   : > { %v4335_v55 = vadd.f32 %v4334_v52, %v4292_v51  ;;  %v4294_v57 = vadd.f32 %v4293_v53, %v9469_v30  ;;  %v4336_v58 = vpop.f32.mrf.mxu1  ;;  %4949 = vmatprep.subr.bf16.mxu0 %v8445_v47  ;;  %v8517_v47 = vld [vmem:[#allocation10 + $0x3d4] ss:$8 sps:$4 sm:$0xff]   ;;  %v8523_v51 = vld [vmem:[#allocation10 + $0x3c4] ss:$8 sps:$4 sm:$0xff]   ;;  %v8521_v52 = vld [vmem:[#allocation10 + $0x3c0] ss:$8 sps:$4 sm:$0xff]  }
 0x9aa   : > { %v4295_v60 = vpop.f32.mrf.mxu0  ;;  %v8529_v53 = vld [vmem:[#allocation10 + $0x3b4] ss:$8 sps:$4 sm:$0xff]  }
 0x9ab   : > { %v4337_v61 = vadd.f32 %v4336_v58, %v4294_v57  ;;  %v4296_v62 = vadd.f32 %v4295_v60, %v9471_v32  ;;  %v4338_v63 = vpop.f32.mrf.mxu1  ;;  %v4366_v3 = vadd.f32 %v4355_v56, %v4335_v55  ;;  %v8535_v55 = vld [vmem:[#allocation10 + $0x3a4] ss:$8 sps:$4 sm:$0xff]   ;;  %v8539_v57 = vld [vmem:[#allocation10 + $0x390] ss:$8 sps:$4 sm:$0xff]   ;;  %v8541_v58 = vld [vmem:[#allocation10 + $0x394] ss:$8 sps:$4 sm:$0xff]  }
 0x9ac   : > { %v4297_v1 = vpop.f32.mrf.mxu0  ;;  %4950 = vmatpush2.bf16.msra.mxu0 %v8443_v54  ;;  %v8527_v54 = vld [vmem:[#allocation10 + $0x3b0] ss:$8 sps:$4 sm:$0xff]   ;;  %v8547_v60 = vld [vmem:[#allocation10 + $0x384] ss:$8 sps:$4 sm:$0xff]  }
 0x9ad   : > { %v4339_v5 = vadd.f32 %v4338_v63, %v4296_v62  ;;  %v4298_v35 = vadd.f32 %v4297_v1, %v9473_v39  ;;  %4951 = vmatprep.subr.bf16.mxu0 %v8448_v59  ;;  %v4340_v30 = vpop.f32.mrf.mxu1  ;;  %v4367_v7 = vadd.f32 %v4359_v31, %v4337_v61  ;;  %v4374_v9 = vmax.f32 %v4366_v3, 0.0  ;;  %v8449_v39 = vld [vmem:[#allocation10 + $0x290] ss:$8 sps:$4 sm:$0xff]   ;;  %v8545_v59 = vld [vmem:[#allocation10 + $0x380] ss:$8 sps:$4 sm:$0xff]  }
 0x9ae   : > { %v8553_v61 = vld [vmem:[#allocation10 + $0x174] ss:$8 sps:$4 sm:$0xff]  }
 0x9af   : > { %v4370_v44 = vadd.f32 %v4355_v56, %v4339_v5  ;;  %v4341_v45 = vadd.f32 %v4340_v30, %v4298_v35  ;;  %v4375_v33 = vmax.f32 %v4367_v7, 0.0  ;;  %v8533_v56 = vld [vmem:[#allocation10 + $0x3a0] ss:$8 sps:$4 sm:$0xff]   ;;  %v8458_v5 = vld [vmem:[#allocation10 + $0x70] ss:$8 sps:$4 sm:$0xff]  }
 0x9b0   : > { %4952 = vmatpush2.bf16.msra.mxu0 %v8446_v2  ;;  %v8466_v35 = vld [vmem:[#allocation10 + $0x64] ss:$8 sps:$4 sm:$0xff]   ;;  %v8464_v30 = vld [vmem:[#allocation10 + $0x60] ss:$8 sps:$4 sm:$0xff]   ;;  %v8472_v7 = vld [vmem:[#allocation10 + $0x54] ss:$8 sps:$4 sm:$0xff]  }
 0x9b1   : > { %v4378_v4 = vmax.f32 %v4370_v44, 0.0  ;;  %v4371_v10 = vadd.f32 %v4359_v31, %v4341_v45  ;;  %4953 = vmatprep.subr.bf16.mxu0 %v8451_v18  ;;  %v8470_v44 = vld [vmem:[#allocation10 + $0x50] ss:$8 sps:$4 sm:$0xff]   ;;  %v8478_v45 = vld [vmem:[#allocation10 + $0x44] ss:$8 sps:$4 sm:$0xff]  }
 0x9b2   : > { %v8502_v18 = vld [vmem:[#allocation10 + $0x4] ss:$8 sps:$4 sm:$0xff]  }
 0x9b3   : > { %v9499_v50 = vpack.c.bf16 %v4378_v4, %v4374_v9  ;;  %v4379_v32 = vmax.f32 %v4371_v10, 0.0  ;;  %v8476_v9 = vld [vmem:[#allocation10 + $0x40] ss:$8 sps:$4 sm:$0xff]   ;;  %v8484_v4 = vld [vmem:[#allocation10 + $0x34] ss:$8 sps:$4 sm:$0xff]  }
 0x9b4   : > { %4954 = vmatpush2.bf16.msra.mxu0 %v8449_v39  ;;  %v8482_v10 = vld [vmem:[#allocation10 + $0x30] ss:$8 sps:$4 sm:$0xff]   ;;  %v8496_v39 = vld [vmem:[#allocation10 + $0x14] ss:$8 sps:$4 sm:$0xff]  }
 0x9b5   : > { %v9501_v14 = vpack.c.bf16 %v4379_v32, %v4375_v33  ;;  %4955 = vmatprep.subr.bf16.mxu0 %v8454_v21  ;;  %v8490_v33 = vld [vmem:[#allocation10 + $0x24] ss:$8 sps:$4 sm:$0xff]   ;;  %v8488_v32 = vld [vmem:[#allocation10 + $0x20] ss:$8 sps:$4 sm:$0xff]   ;;  %v8508_v21 = vld [vmem:[#allocation10 + $0xf4] ss:$8 sps:$4 sm:$0xff]  }
 0x9b7   : > { %4443 = vmatprep.subr.bf16.mxu1 %v9501_v14 }
 0x9b8   : > { %4444 = vmatpush1.bf16.msra.mxu1 %v9499_v50  ;;  %4956 = vmatpush2.bf16.msra.mxu0 %v8452_v20  ;;  %v8500_v20 = vld [vmem:[#allocation10] ss:$8 sps:$4 sm:$0xff]  }
 0x9b9   : > { %4968 = vmatprep.subr.bf16.mxu1 %v8457_v23  ;;  %5331 = vmatprep.subr.bf16.mxu0 %v8460_v24  ;;  %v8514_v23 = vld [vmem:[#allocation10 + $0xe4] ss:$8 sps:$4 sm:$0xff]   ;;  %v8512_v24 = vld [vmem:[#allocation10 + $0xe0] ss:$8 sps:$4 sm:$0xff]  }
 0x9bb   : > { %7257 = vmatmul.mubr.msk.bf16.vlgmr.msra.gmra.mxu1 %vm674_vm3, %v9373_v12 }
 0x9bc   : > { %4969 = vmatpush1.bf16.msra.mxu1 %v8455_v22  ;;  %v8506_v22 = vld [vmem:[#allocation10 + $0xf0] ss:$8 sps:$4 sm:$0xff]  }
 0x9bd   : > { %4970 = vmatprep.subr.bf16.mxu1 %v8463_v25  ;;  %v8520_v25 = vld [vmem:[#allocation10 + $0xd4] ss:$8 sps:$4 sm:$0xff]  }
 0x9c0   : > { %4971 = vmatpush1.bf16.msra.mxu1 %v8461_v26  ;;  %v8518_v26 = vld [vmem:[#allocation10 + $0xd0] ss:$8 sps:$4 sm:$0xff]  }
 0x9c1   : > { %4972 = vmatprep.subr.bf16.mxu1 %v8469_v11  ;;  %v8526_v11 = vld [vmem:[#allocation10 + $0xc4] ss:$8 sps:$4 sm:$0xff]  }
 0x9c4   : > { %4973 = vmatpush1.bf16.msra.mxu1 %v8467_v27  ;;  %v8524_v27 = vld [vmem:[#allocation10 + $0xc0] ss:$8 sps:$4 sm:$0xff]  }
 0x9c5   : > { %4974 = vmatprep.subr.bf16.mxu1 %v8475_v28  ;;  %v8532_v28 = vld [vmem:[#allocation10 + $0xb4] ss:$8 sps:$4 sm:$0xff]  }
 0x9c8   : > { %4975 = vmatpush1.bf16.msra.mxu1 %v8473_v13  ;;  %v8530_v13 = vld [vmem:[#allocation10 + $0xb0] ss:$8 sps:$4 sm:$0xff]  }
 0x9c9   : > { %4976 = vmatprep.subr.bf16.mxu1 %v8481_v29  ;;  %v8538_v29 = vld [vmem:[#allocation10 + $0xa4] ss:$8 sps:$4 sm:$0xff]  }
 0x9cc   : > { %4977 = vmatpush1.bf16.msra.mxu1 %v8479_v34  ;;  %v8536_v34 = vld [vmem:[#allocation10 + $0xa0] ss:$8 sps:$4 sm:$0xff]  }
 0x9cd   : > { %4978 = vmatprep.subr.bf16.mxu1 %v8487_v16  ;;  %v8544_v16 = vld [vmem:[#allocation10 + $0x94] ss:$8 sps:$4 sm:$0xff]  }
 0x9d0   : > { %4979 = vmatpush1.bf16.msra.mxu1 %v8485_v17  ;;  %v8542_v17 = vld [vmem:[#allocation10 + $0x90] ss:$8 sps:$4 sm:$0xff]  }
 0x9d1   : > { %4980 = vmatprep.subr.bf16.mxu1 %v8493_v36 }
 0x9d4   : > { %4981 = vmatpush1.bf16.msra.mxu1 %v8491_v37  ;;  %v8550_v37 = vld [vmem:[#allocation10 + $0x84] ss:$8 sps:$4 sm:$0xff]  }
 0x9d5   : > { %4982 = vmatprep.subr.bf16.mxu1 %v8499_v38 }
 0x9d8   : > { %4983 = vmatpush1.bf16.msra.mxu1 %v8497_v40  ;;  %v8548_v40 = vld [vmem:[#allocation10 + $0x80] ss:$8 sps:$4 sm:$0xff]  }
 0x9d9   : > { %4984 = vmatprep.subr.bf16.mxu1 %v8505_v41 }
 0x9dc   : > { %4985 = vmatpush2.bf16.msra.mxu1 %v8503_v42 }
 0x9dd   : > { %4986 = vmatprep.subr.bf16.mxu1 %v8511_v43 }
 0x9e0   : > { %4987 = vmatpush2.bf16.msra.mxu1 %v8509_v46  ;;  %v8551_v46 = vld [vmem:[#allocation10 + $0x170] ss:$8 sps:$4 sm:$0xff]  }
 0x9e1   : > { %4988 = vmatprep.subr.bf16.mxu1 %v8517_v47 }
 0x9e4   : > { %4989 = vmatpush2.bf16.msra.mxu1 %v8515_v49  ;;  %v8556_v49 = vld [vmem:[#allocation10 + $0x164] ss:$8 sps:$4 sm:$0xff]  }
 0x9e5   : > { %4990 = vmatprep.subr.bf16.mxu1 %v8523_v51  ;;  %v8554_v51 = vld [vmem:[#allocation10 + $0x160] ss:$8 sps:$4 sm:$0xff]  }
 0x9e8   : > { %4991 = vmatpush2.bf16.msra.mxu1 %v8521_v52  ;;  %v8559_v52 = vld [vmem:[#allocation10 + $0x154] ss:$8 sps:$4 sm:$0xff]  }
 0x9e9   : > { %4992 = vmatprep.subr.bf16.mxu1 %v8529_v53  ;;  %v8557_v53 = vld [vmem:[#allocation10 + $0x150] ss:$8 sps:$4 sm:$0xff]  }
 0x9ec   : > { %4993 = vmatpush2.bf16.msra.mxu1 %v8527_v54  ;;  %v8562_v54 = vld [vmem:[#allocation10 + $0x144] ss:$8 sps:$4 sm:$0xff]  }
 0x9ed   : > { %4994 = vmatprep.subr.bf16.mxu1 %v8535_v55  ;;  %v8560_v55 = vld [vmem:[#allocation10 + $0x140] ss:$8 sps:$4 sm:$0xff]  }
 0x9f0   : > { %4995 = vmatpush2.bf16.msra.mxu1 %v8533_v56  ;;  %v8565_v56 = vld [vmem:[#allocation10 + $0x134] ss:$8 sps:$4 sm:$0xff]  }
 0x9f1   : > { %4996 = vmatprep.subr.bf16.mxu1 %v8541_v58  ;;  %v8566_v58 = vld [vmem:[#allocation10 + $0x120] ss:$8 sps:$4 sm:$0xff]  }
 0x9f4   : > { %4997 = vmatpush2.bf16.msra.mxu1 %v8539_v57  ;;  %v8563_v57 = vld [vmem:[#allocation10 + $0x130] ss:$8 sps:$4 sm:$0xff]  }
 0x9f5   : > { %4998 = vmatprep.subr.bf16.mxu1 %v8547_v60  ;;  %v8574_v60 = vld [vmem:[#allocation10 + $0x104] ss:$8 sps:$4 sm:$0xff]  }
 0x9f8   : > { %4999 = vmatpush2.bf16.msra.mxu1 %v8545_v59  ;;  %v8569_v59 = vld [vmem:[#allocation10 + $0x110] ss:$8 sps:$4 sm:$0xff]  }
 0x9f9   : > { %5374 = vmatprep.subr.bf16.mxu1 %v8553_v61  ;;  %v8572_v61 = vld [vmem:[#allocation10 + $0x100] ss:$8 sps:$4 sm:$0xff]  }
 0xa3b   : > { %v4420_v31 = vpop.f32.mrf.mxu0 }
 0xa3d   : > { %v4422_v62 = vpop.f32.mrf.mxu0 }
 0xa3f   : > { %v4424_v63 = vpop.f32.mrf.mxu0 }
 0xa40   : > { %v4472_v1 = vpack.c.bf16 %v4424_v63, %v4420_v31  ;;  %v8577_v31 = vld [vmem:[#allocation10 + $0x1f4] ss:$8 sps:$4 sm:$0xff]   ;;  %v8580_v63 = vld [vmem:[#allocation10 + $0x1e4] ss:$8 sps:$4 sm:$0xff]  }
 0xa41   : > { %v4426_v2 = vpop.f32.mrf.mxu0 }
 0xa42   : > { %v4473_v3 = vpack.c.bf16 %v4426_v2, %v4422_v62  ;;  %v8575_v62 = vld [vmem:[#allocation10 + $0x1f0] ss:$8 sps:$4 sm:$0xff]   ;;  %v8583_v2 = vld [vmem:[#allocation10 + $0x1d4] ss:$8 sps:$4 sm:$0xff]  }
 0xa44   : > { %4957 = vmatprep.mubr.bf16.mxu0 %v4473_v3  ;;  %v8581_v3 = vld [vmem:[#allocation10 + $0x1d0] ss:$8 sps:$4 sm:$0xff]  }
 0xa45   : > { %4958 = vmatmul.mubr.bf16.vlgmr.msra.gmra.mxu0 %v4472_v1  ;;  %v8578_v1 = vld [vmem:[#allocation10 + $0x1e0] ss:$8 sps:$4 sm:$0xff]  }
 0xa46   : > { %5332 = vmatpush1.bf16.msra.mxu0 %v8458_v5  ;;  %5363 = vmatprep.mubr.bf16.mxu0 %v9481_v15  ;;  %v8494_v15 = vld [vmem:[#allocation10 + $0x10] ss:$8 sps:$4 sm:$0xff]   ;;  %v8586_v5 = vld [vmem:[#allocation10 + $0x1c4] ss:$8 sps:$4 sm:$0xff]  }
 0xa47   : > { %5333 = vmatprep.subr.bf16.mxu0 %v8466_v35  ;;  %v8584_v35 = vld [vmem:[#allocation10 + $0x1c0] ss:$8 sps:$4 sm:$0xff]  }
 0xa4a   : > { %5334 = vmatpush1.bf16.msra.mxu0 %v8464_v30  ;;  %v8589_v30 = vld [vmem:[#allocation10 + $0x1b4] ss:$8 sps:$4 sm:$0xff]  }
 0xa4b   : > { %5335 = vmatprep.subr.bf16.mxu0 %v8472_v7  ;;  %v8587_v7 = vld [vmem:[#allocation10 + $0x1b0] ss:$8 sps:$4 sm:$0xff]  }
 0xa4e   : > { %5336 = vmatpush1.bf16.msra.mxu0 %v8470_v44  ;;  %v8592_v44 = vld [vmem:[#allocation10 + $0x1a4] ss:$8 sps:$4 sm:$0xff]  }
 0xa4f   : > { %5337 = vmatprep.subr.bf16.mxu0 %v8478_v45  ;;  %v8590_v45 = vld [vmem:[#allocation10 + $0x1a0] ss:$8 sps:$4 sm:$0xff]  }
 0xa52   : > { %5338 = vmatpush1.bf16.msra.mxu0 %v8476_v9  ;;  %v8595_v9 = vld [vmem:[#allocation10 + $0x194] ss:$8 sps:$4 sm:$0xff]  }
 0xa53   : > { %5339 = vmatprep.subr.bf16.mxu0 %v8484_v4  ;;  %v8593_v4 = vld [vmem:[#allocation10 + $0x190] ss:$8 sps:$4 sm:$0xff]  }
 0xa56   : > { %5340 = vmatpush1.bf16.msra.mxu0 %v8482_v10  ;;  %v8598_v10 = vld [vmem:[#allocation10 + $0x184] ss:$8 sps:$4 sm:$0xff]  }
 0xa57   : > { %5341 = vmatprep.subr.bf16.mxu0 %v8490_v33  ;;  %v8596_v33 = vld [vmem:[#allocation10 + $0x180] ss:$8 sps:$4 sm:$0xff]  }
 0xa5a   : > { %5342 = vmatpush1.bf16.msra.mxu0 %v8488_v32  ;;  %v8647_v32 = vld [vmem:[#allocation12 + $0x170] ss:$8 sps:$4 sm:$0xff]  }
 0xa5b   : > { %5343 = vmatprep.subr.bf16.mxu0 %v8496_v39  ;;  %v8649_v39 = vld [vmem:[#allocation12 + $0x174] ss:$8 sps:$4 sm:$0xff]  }
 0xa5e   : > { %5344 = vmatpush1.bf16.msra.mxu0 %v8494_v15  ;;  %v8652_v15 = vld [vmem:[#allocation12 + $0x164] ss:$8 sps:$4 sm:$0xff]  }
 0xa5f   : > { %5345 = vmatprep.subr.bf16.mxu0 %v8502_v18  ;;  %v8650_v18 = vld [vmem:[#allocation12 + $0x160] ss:$8 sps:$4 sm:$0xff]  }
 0xa62   : > { %5346 = vmatpush1.bf16.msra.mxu0 %v8500_v20  ;;  %v8655_v20 = vld [vmem:[#allocation12 + $0x154] ss:$8 sps:$4 sm:$0xff]  }
 0xa63   : > { %5347 = vmatprep.subr.bf16.mxu0 %v8508_v21  ;;  %v8653_v21 = vld [vmem:[#allocation12 + $0x150] ss:$8 sps:$4 sm:$0xff]  }
 0xa66   : > { %5348 = vmatpush2.bf16.msra.mxu0 %v8506_v22  ;;  %v8658_v22 = vld [vmem:[#allocation12 + $0x144] ss:$8 sps:$4 sm:$0xff]  }
 0xa67   : > { %5349 = vmatprep.subr.bf16.mxu0 %v8514_v23  ;;  %v8656_v23 = vld [vmem:[#allocation12 + $0x140] ss:$8 sps:$4 sm:$0xff]  }
 0xa6a   : > { %5350 = vmatpush2.bf16.msra.mxu0 %v8512_v24  ;;  %v8661_v24 = vld [vmem:[#allocation12 + $0x134] ss:$8 sps:$4 sm:$0xff]  }
 0xa6b   : > { %5351 = vmatprep.subr.bf16.mxu0 %v8520_v25  ;;  %v8659_v25 = vld [vmem:[#allocation12 + $0x130] ss:$8 sps:$4 sm:$0xff]  }
 0xa6e   : > { %5352 = vmatpush2.bf16.msra.mxu0 %v8518_v26  ;;  %v8662_v26 = vld [vmem:[#allocation12 + $0x120] ss:$8 sps:$4 sm:$0xff]  }
 0xa6f   : > { %5353 = vmatprep.subr.bf16.mxu0 %v8526_v11  ;;  %v8667_v11 = vld [vmem:[#allocation12 + $0x114] ss:$8 sps:$4 sm:$0xff]  }
 0xa72   : > { %5354 = vmatpush2.bf16.msra.mxu0 %v8524_v27 }
 0xa73   : > { %5355 = vmatprep.subr.bf16.mxu0 %v8532_v28  ;;  %v8665_v28 = vld [vmem:[#allocation12 + $0x110] ss:$8 sps:$4 sm:$0xff]  }
 0xa76   : > { %5356 = vmatpush2.bf16.msra.mxu0 %v8530_v13  ;;  %v8670_v13 = vld [vmem:[#allocation12 + $0x104] ss:$8 sps:$4 sm:$0xff]  }
 0xa77   : > { %5357 = vmatprep.subr.bf16.mxu0 %v8538_v29 }
 0xa7a   : > { %5358 = vmatpush2.bf16.msra.mxu0 %v8536_v34  ;;  %v8668_v34 = vld [vmem:[#allocation12 + $0x100] ss:$8 sps:$4 sm:$0xff]  }
 0xa7b   : > { %v4463_v36 = vpop.f32.mrf.mxu1  ;;  %5359 = vmatprep.subr.bf16.mxu0 %v8544_v16  ;;  %v8673_v16 = vld [vmem:[#allocation12 + $0x1f4] ss:$8 sps:$4 sm:$0xff]  }
 0xa7d   : > { %v4465_v38 = vpop.f32.mrf.mxu1 }
 0xa7e   : > { %5360 = vmatpush2.bf16.msra.mxu0 %v8542_v17 }
 0xa7f   : > { %v4467_v41 = vpop.f32.mrf.mxu1  ;;  %5361 = vmatprep.subr.bf16.mxu0 %v8550_v37  ;;  %v8671_v37 = vld [vmem:[#allocation12 + $0x1f0] ss:$8 sps:$4 sm:$0xff]  }
 0xa80   : > { %v4474_v47 = vpack.c.bf16 %v4467_v41, %v4463_v36 }
 0xa81   : > { %v4469_v42 = vpop.f32.mrf.mxu1 }
 0xa82   : > { %v4475_v43 = vpack.c.bf16 %v4469_v42, %v4465_v38  ;;  %5362 = vmatpush2.bf16.msra.mxu0 %v8548_v40  ;;  %v8676_v38 = vld [vmem:[#allocation12 + $0x1e4] ss:$8 sps:$4 sm:$0xff]   ;;  %v8674_v42 = vld [vmem:[#allocation12 + $0x1e0] ss:$8 sps:$4 sm:$0xff]  }
 0xa84   : > { %5000 = vmatprep.mubr.bf16.mxu1 %v4475_v43  ;;  %v8679_v43 = vld [vmem:[#allocation12 + $0x1d4] ss:$8 sps:$4 sm:$0xff]  }
 0xa85   : > { %5364 = vmatmul.mubr.bf16.vlgmr.msra.gmra.mxu0 %v9483_v19  ;;  %5001 = vmatmul.mubr.bf16.vlgmr.msra.gmra.mxu1 %v4474_v47  ;;  %v8568_v19 = vld [vmem:[#allocation10 + $0x124] ss:$8 sps:$4 sm:$0xff]  }
 0xa86   : > { %5375 = vmatpush1.bf16.msra.mxu1 %v8551_v46  ;;  %5406 = vmatprep.mubr.bf16.mxu1 %v9501_v14  ;;  %v8571_v14 = vld [vmem:[#allocation10 + $0x114] ss:$8 sps:$4 sm:$0xff]  }
 0xa87   : > { %5376 = vmatprep.subr.bf16.mxu1 %v8556_v49  ;;  %5472 = vmatprep.mubr.bf16.mxu0 %v9079_v48  ;;  %v8677_v49 = vld [vmem:[#allocation12 + $0x1d0] ss:$8 sps:$4 sm:$0xff]  }
 0xa8a   : > { %5377 = vmatpush1.bf16.msra.mxu1 %v8554_v51  ;;  %v8682_v51 = vld [vmem:[#allocation12 + $0x1c4] ss:$8 sps:$4 sm:$0xff]  }
 0xa8b   : > { %5378 = vmatprep.subr.bf16.mxu1 %v8559_v52 }
 0xa8e   : > { %5379 = vmatpush1.bf16.msra.mxu1 %v8557_v53 }
 0xa8f   : > { %5380 = vmatprep.subr.bf16.mxu1 %v8562_v54 }
 0xa92   : > { %5381 = vmatpush1.bf16.msra.mxu1 %v8560_v55 }
 0xa93   : > { %5382 = vmatprep.subr.bf16.mxu1 %v8565_v56  ;;  %v8680_v56 = vld [vmem:[#allocation12 + $0x1c0] ss:$8 sps:$4 sm:$0xff]  }
 0xa96   : > { %5383 = vmatpush1.bf16.msra.mxu1 %v8563_v57 }
 0xa97   : > { %5384 = vmatprep.subr.bf16.mxu1 %v8568_v19  ;;  %v8685_v19 = vld [vmem:[#allocation12 + $0x1b4] ss:$8 sps:$4 sm:$0xff]  }
 0xa9a   : > { %5385 = vmatpush1.bf16.msra.mxu1 %v8566_v58 }
 0xa9b   : > { %5386 = vmatprep.subr.bf16.mxu1 %v8571_v14 }
 0xa9e   : > { %5387 = vmatpush1.bf16.msra.mxu1 %v8569_v59 }
 0xa9f   : > { %5388 = vmatprep.subr.bf16.mxu1 %v8574_v60  ;;  %v4381_v60 = vld [vmem:[#allocation15 + $0x5] ss:$8 sm:$0x3] }
 0xaa2   : > { %5389 = vmatpush1.bf16.msra.mxu1 %v8572_v61 }
 0xaa3   : > { %5390 = vmatprep.subr.bf16.mxu1 %v8577_v31 }
 0xaa6   : > { %5391 = vmatpush2.bf16.msra.mxu1 %v8575_v62 }
 0xaa7   : > { %5392 = vmatprep.subr.bf16.mxu1 %v8580_v63  ;;  %v8683_v63 = vld [vmem:[#allocation12 + $0x1b0] ss:$8 sps:$4 sm:$0xff]  }
 0xaaa   : > { %5393 = vmatpush2.bf16.msra.mxu1 %v8578_v1 }
 0xaab   : > { %5394 = vmatprep.subr.bf16.mxu1 %v8583_v2  ;;  %v5425_v2 = vrot.slane %v4381_v60, %v9404_v6 }
 0xaae   : > { %5395 = vmatpush2.bf16.msra.mxu1 %v8581_v3 }
 0xaaf   : > { %5396 = vmatprep.subr.bf16.mxu1 %v8586_v5  ;;  %v8688_v5 = vld [vmem:[#allocation12 + $0x1a4] ss:$8 sps:$4 sm:$0xff]  }
 0xab2   : > { %5397 = vmatpush2.bf16.msra.mxu1 %v8584_v35 }
 0xab3   : > { %5398 = vmatprep.subr.bf16.mxu1 %v8589_v30 }
 0xab6   : > { %5399 = vmatpush2.bf16.msra.mxu1 %v8587_v7  ;;  %v5421_v7 = vrot.slane %v4381_v60, %v9407_v8  ;;  %v8691_v60 = vld [vmem:[#allocation12 + $0x194] ss:$8 sps:$4 sm:$0xff]  }
 0xab7   : > { %5400 = vmatprep.subr.bf16.mxu1 %v8592_v44 }
 0xaba   : > { %5401 = vmatpush2.bf16.msra.mxu1 %v8590_v45 }
 0xabb   : > { %5402 = vmatprep.subr.bf16.mxu1 %v8595_v9 }
 0xabe   : > { %5403 = vmatpush2.bf16.msra.mxu1 %v8593_v4 }
 0xabf   : > { %5404 = vmatprep.subr.bf16.mxu1 %v8598_v10  ;;  %v8686_v10 = vld [vmem:[#allocation12 + $0x1a0] ss:$8 sps:$4 sm:$0xff]  }
 0xac2   : > { %5405 = vmatpush2.bf16.msra.mxu1 %v8596_v33 }
 0xac3   : > { %5710 = vmatprep.subr.bf16.mxu1 %v8649_v39 }
 0xac5   : > { %5407 = vmatmul.mubr.bf16.vlgmr.msra.gmra.mxu1 %v9499_v50  ;;  %v8664_v50 = vld [vmem:[#allocation12 + $0x124] ss:$8 sps:$4 sm:$0xff]  }
 0xac6   : > { %5711 = vmatpush1.bf16.msra.mxu1 %v8647_v32 }
 0xac7   : > { %5712 = vmatprep.subr.bf16.mxu1 %v8652_v15 }
 0xaca   : > { %5713 = vmatpush1.bf16.msra.mxu1 %v8650_v18 }
 0xacb   : > { %5714 = vmatprep.subr.bf16.mxu1 %v8655_v20 }
 0xace   : > { %5715 = vmatpush1.bf16.msra.mxu1 %v8653_v21 }
 0xacf   : > { %5716 = vmatprep.subr.bf16.mxu1 %v8658_v22 }
 0xad2   : > { %5717 = vmatpush1.bf16.msra.mxu1 %v8656_v23 }
 0xad3   : > { %5718 = vmatprep.subr.bf16.mxu1 %v8661_v24 }
 0xad6   : > { %5719 = vmatpush1.bf16.msra.mxu1 %v8659_v25  ;;  %v8601_v25 = vld [vmem:[#allocation12 + $0x74] ss:$8 sps:$4 sm:$0xff]  }
 0xad7   : > { %5720 = vmatprep.subr.bf16.mxu1 %v8664_v50 }
 0xada   : > { %5721 = vmatpush1.bf16.msra.mxu1 %v8662_v26  ;;  %v8599_v26 = vld [vmem:[#allocation12 + $0x70] ss:$8 sps:$4 sm:$0xff]  }
 0xadb   : > { %5722 = vmatprep.subr.bf16.mxu1 %v8667_v11  ;;  %v8604_v11 = vld [vmem:[#allocation12 + $0x64] ss:$8 sps:$4 sm:$0xff]  }
 0xade   : > { %5723 = vmatpush1.bf16.msra.mxu1 %v8665_v28  ;;  %v8607_v28 = vld [vmem:[#allocation12 + $0x54] ss:$8 sps:$4 sm:$0xff]  }
 0xadf   : > { %5724 = vmatprep.subr.bf16.mxu1 %v8670_v13  ;;  %v8605_v13 = vld [vmem:[#allocation12 + $0x50] ss:$8 sps:$4 sm:$0xff]  }
 0xae2   : > { %5725 = vmatpush1.bf16.msra.mxu1 %v8668_v34  ;;  %v8608_v34 = vld [vmem:[#allocation12 + $0x40] ss:$8 sps:$4 sm:$0xff]  }
 0xae3   : > { %5726 = vmatprep.subr.bf16.mxu1 %v8673_v16  ;;  %v8613_v16 = vld [vmem:[#allocation12 + $0x34] ss:$8 sps:$4 sm:$0xff]  }
 0xae6   : > { %5727 = vmatpush2.bf16.msra.mxu1 %v8671_v37  ;;  %v8614_v37 = vld [vmem:[#allocation12 + $0x20] ss:$8 sps:$4 sm:$0xff]  }
 0xae7   : > { %5728 = vmatprep.subr.bf16.mxu1 %v8676_v38  ;;  %v8617_v38 = vld [vmem:[#allocation12 + $0x10] ss:$8 sps:$4 sm:$0xff]  }
 0xaea   : > { %5729 = vmatpush2.bf16.msra.mxu1 %v8674_v42  ;;  %v8625_v42 = vld [vmem:[#allocation12 + $0xf4] ss:$8 sps:$4 sm:$0xff]  }
 0xaeb   : > { %5730 = vmatprep.subr.bf16.mxu1 %v8679_v43  ;;  %v8623_v43 = vld [vmem:[#allocation12 + $0xf0] ss:$8 sps:$4 sm:$0xff]  }
 0xaee   : > { %5731 = vmatpush2.bf16.msra.mxu1 %v8677_v49  ;;  %v8631_v49 = vld [vmem:[#allocation12 + $0xd4] ss:$8 sps:$4 sm:$0xff]  }
 0xaef   : > { %5732 = vmatprep.subr.bf16.mxu1 %v8682_v51  ;;  %v8629_v51 = vld [vmem:[#allocation12 + $0xd0] ss:$8 sps:$4 sm:$0xff]  }
 0xaf2   : > { %5733 = vmatpush2.bf16.msra.mxu1 %v8680_v56  ;;  %v8640_v56 = vld [vmem:[#allocation12 + $0xa4] ss:$8 sps:$4 sm:$0xff]  }
 0xaf3   : > { %5734 = vmatprep.subr.bf16.mxu1 %v8685_v19  ;;  %v8643_v19 = vld [vmem:[#allocation12 + $0x94] ss:$8 sps:$4 sm:$0xff]  }
 0xaf6   : > { %5735 = vmatpush2.bf16.msra.mxu1 %v8683_v63 }
 0xaf7   : > { %5736 = vmatprep.subr.bf16.mxu1 %v8688_v5 }
 0xafa   : > { %5737 = vmatpush2.bf16.msra.mxu1 %v8686_v10  ;;  %v8706_v10 = vld [vmem:[#allocation13 + $0x44] ss:$8 sps:$4 sm:$0xff]  }
 0xafb   : > { %5738 = vmatprep.subr.bf16.mxu1 %v8691_v60 }
 0xb05   : > { %v4959_v27 = vpop.f32.mrf.mxu0 }
 0xb07   : > { %v4961_v29 = vpop.f32.mrf.mxu0 }
 0xb09   : > { %v4963_v17 = vpop.f32.mrf.mxu0 }
 0xb0b   : > { %v4965_v40 = vpop.f32.mrf.mxu0 }
 0xb45   : > { %v5002_v36 = vpop.f32.mrf.mxu1  ;;  %v5365_v46 = vpop.f32.mrf.mxu0 }
 0xb46   : > { %v5003_v54 = vadd.f32 %v5002_v36, %v4959_v27  ;;  %v8602_v27 = vld [vmem:[#allocation12 + $0x60] ss:$8 sps:$4 sm:$0xff]   ;;  %v8616_v36 = vld [vmem:[#allocation12 + $0x24] ss:$8 sps:$4 sm:$0xff]  }
 0xb47   : > { %v5004_v41 = vpop.f32.mrf.mxu1  ;;  %v5367_v52 = vpop.f32.mrf.mxu0 }
 0xb48   : > { %v5005_v53 = vadd.f32 %v5004_v41, %v4961_v29  ;;  %v5366_v31 = vadd.f32 %v5365_v46, %v5003_v54  ;;  %v8610_v29 = vld [vmem:[#allocation12 + $0x44] ss:$8 sps:$4 sm:$0xff]   ;;  %v8620_v41 = vld [vmem:[#allocation12] ss:$8 sps:$4 sm:$0xff]   ;;  %v8637_v54 = vld [vmem:[#allocation12 + $0xb4] ss:$8 sps:$4 sm:$0xff]  }
 0xb49   : > { %v5006_v47 = vpop.f32.mrf.mxu1  ;;  %v5369_v58 = vpop.f32.mrf.mxu0  ;;  %v8628_v46 = vld [vmem:[#allocation12 + $0xe4] ss:$8 sps:$4 sm:$0xff]  }
 0xb4a   : > { %v5007_v57 = vadd.f32 %v5006_v47, %v4963_v17  ;;  %v5368_v61 = vadd.f32 %v5367_v52, %v5005_v53  ;;  %v8611_v17 = vld [vmem:[#allocation12 + $0x30] ss:$8 sps:$4 sm:$0xff]   ;;  %v8626_v47 = vld [vmem:[#allocation12 + $0xe0] ss:$8 sps:$4 sm:$0xff]   ;;  %v8634_v52 = vld [vmem:[#allocation12 + $0xc4] ss:$8 sps:$4 sm:$0xff]  }
 0xb4b   : > { %v5008_v55 = vpop.f32.mrf.mxu1  ;;  %v5371_v35 = vpop.f32.mrf.mxu0  ;;  %v8632_v53 = vld [vmem:[#allocation12 + $0xc0] ss:$8 sps:$4 sm:$0xff]  }
 0xb4c   : > { %v5009_v59 = vadd.f32 %v5008_v55, %v4965_v40  ;;  %v5370_v3 = vadd.f32 %v5369_v58, %v5007_v57  ;;  %v8622_v40 = vld [vmem:[#allocation12 + $0x4] ss:$8 sps:$4 sm:$0xff]   ;;  %v8635_v55 = vld [vmem:[#allocation12 + $0xb0] ss:$8 sps:$4 sm:$0xff]   ;;  %v8638_v57 = vld [vmem:[#allocation12 + $0xa0] ss:$8 sps:$4 sm:$0xff]  }
 0xb4d   : > { %v8641_v58 = vld [vmem:[#allocation12 + $0x90] ss:$8 sps:$4 sm:$0xff]  }
 0xb4e   : > { %v5372_v9 = vadd.f32 %v5371_v35, %v5009_v59  ;;  %v8644_v59 = vld [vmem:[#allocation12 + $0x80] ss:$8 sps:$4 sm:$0xff]  }
 0xb85   : > { %v5408_v14 = vpop.f32.mrf.mxu1 }
 0xb86   : > { %v5409_v30 = vadd.f32 %v5408_v14, %v5366_v31  ;;  %v8646_v14 = vld [vmem:[#allocation12 + $0x84] ss:$8 sps:$4 sm:$0xff]  }
 0xb87   : > { %v5410_v62 = vpop.f32.mrf.mxu1  ;;  %v8694_v31 = vld [vmem:[#allocation12 + $0x184] ss:$8 sps:$4 sm:$0xff]  }
 0xb88   : > { %v5411_v1 = vadd.f32 %v5410_v62, %v5368_v61  ;;  %v5428_v15 = vadd.f32 %v5421_v7, %v5409_v30  ;;  %v8689_v61 = vld [vmem:[#allocation12 + $0x190] ss:$8 sps:$4 sm:$0xff]   ;;  %v8692_v62 = vld [vmem:[#allocation12 + $0x180] ss:$8 sps:$4 sm:$0xff]  }
 0xb89   : > { %v5412_v44 = vpop.f32.mrf.mxu1  ;;  %5739 = vmatpush2.bf16.msra.mxu1 %v8689_v61  ;;  %v8695_v30 = vld [vmem:[#allocation13 + $0x70] ss:$8 sps:$4 sm:$0xff]  }
 0xb8a   : > { %v5413_v45 = vadd.f32 %v5412_v44, %v5370_v3  ;;  %v5429_v33 = vadd.f32 %v5425_v2, %v5411_v1  ;;  %v5432_v23 = vmax.f32 %v5428_v15, 0.0  ;;  %5740 = vmatprep.subr.bf16.mxu1 %v8694_v31  ;;  %v8700_v44 = vld [vmem:[#allocation13 + $0x64] ss:$8 sps:$4 sm:$0xff]   ;;  %v8710_v15 = vld [vmem:[#allocation13 + $0x20] ss:$8 sps:$4 sm:$0xff]  }
 0xb8b   : > { %v5414_v4 = vpop.f32.mrf.mxu1  ;;  %v5975_v31 = vld [vmem:[%s564_s23] sm:$0x3]  ;;  %s9696_s23 = sld [smem:[#allocation25_spill]] }
 0xb8c   : > { %v5430_v32 = vadd.f32 %v5421_v7, %v5413_v45  ;;  %v5415_v39 = vadd.f32 %v5414_v4, %v5372_v9  ;;  %v5433_v21 = vmax.f32 %v5429_v33, 0.0  ;;  %v8697_v7 = vld [vmem:[#allocation13 + $0x74] ss:$8 sps:$4 sm:$0xff]   ;;  %v8698_v45 = vld [vmem:[#allocation13 + $0x60] ss:$8 sps:$4 sm:$0xff]  }
 0xb8d   : > { %5741 = vmatpush2.bf16.msra.mxu1 %v8692_v62  ;;  %v8703_v9 = vld [vmem:[#allocation13 + $0x54] ss:$8 sps:$4 sm:$0xff]   ;;  %v8701_v4 = vld [vmem:[#allocation13 + $0x50] ss:$8 sps:$4 sm:$0xff]   ;;  %v8704_v33 = vld [vmem:[#allocation13 + $0x40] ss:$8 sps:$4 sm:$0xff]  }
 0xb8e   : > { %v5431_v18 = vadd.f32 %v5425_v2, %v5415_v39  ;;  %v5434_v20 = vmax.f32 %v5430_v32, 0.0  ;;  %v8709_v32 = vld [vmem:[#allocation13 + $0x34] ss:$8 sps:$4 sm:$0xff]   ;;  %v8707_v39 = vld [vmem:[#allocation13 + $0x30] ss:$8 sps:$4 sm:$0xff]  }
 0xb90   : > { %v5435_v22 = vmax.f32 %v5431_v18, 0.0  ;;  %v9514_v50 = vpack.c.bf16 %v5434_v20, %v5432_v23  ;;  %v8715_v18 = vld [vmem:[#allocation13 + $0x14] ss:$8 sps:$4 sm:$0xff]   ;;  %v8713_v20 = vld [vmem:[#allocation13 + $0x10] ss:$8 sps:$4 sm:$0xff]  }
 0xb91   : > { %v8721_v23 = vld [vmem:[#allocation13 + $0xf4] ss:$8 sps:$4 sm:$0xff]  }
 0xb92   : > { %v5439_v24 = vpack.c.bf16 %v5435_v22, %v5433_v21  ;;  %v8718_v21 = vld [vmem:[#allocation13 + $0x4] ss:$8 sps:$4 sm:$0xff]   ;;  %v8716_v22 = vld [vmem:[#allocation13] ss:$8 sps:$4 sm:$0xff]  }
 0xb94   : > { %5454 = vmatprep.subr.bf16.mxu0 %v5439_v24 }
 0xb95   : > { %5455 = vmatpush1.bf16.msra.mxu0 %v9514_v50 }
 0xb96   : > { %5913 = vmatprep.subr.bf16.mxu0 %v8601_v25  ;;  %v8724_v25 = vld [vmem:[#allocation13 + $0xe4] ss:$8 sps:$4 sm:$0xff]  }
 0xb98   : > { %7386 = vmatmul.mubr.msk.bf16.vlgmr.msra.gmra.mxu0 %vm674_vm3, %v9373_v12  ;;  %v8619_v12 = vld [vmem:[#allocation12 + $0x14] ss:$8 sps:$4 sm:$0xff]  }
 0xb99   : > { %5914 = vmatpush1.bf16.msra.mxu0 %v8599_v26  ;;  %5945 = vmatprep.mubr.bf16.mxu0 %v5439_v24  ;;  %v8719_v24 = vld [vmem:[#allocation13 + $0xf0] ss:$8 sps:$4 sm:$0xff]   ;;  %v8727_v26 = vld [vmem:[#allocation13 + $0xd4] ss:$8 sps:$4 sm:$0xff]  }
 0xb9a   : > { %5915 = vmatprep.subr.bf16.mxu0 %v8604_v11  ;;  %v8725_v11 = vld [vmem:[#allocation13 + $0xd0] ss:$8 sps:$4 sm:$0xff]  }
 0xb9d   : > { %5916 = vmatpush1.bf16.msra.mxu0 %v8602_v27  ;;  %v8730_v27 = vld [vmem:[#allocation13 + $0xc4] ss:$8 sps:$4 sm:$0xff]  }
 0xb9e   : > { %5917 = vmatprep.subr.bf16.mxu0 %v8607_v28  ;;  %v8728_v28 = vld [vmem:[#allocation13 + $0xc0] ss:$8 sps:$4 sm:$0xff]  }
 0xba1   : > { %5918 = vmatpush1.bf16.msra.mxu0 %v8605_v13  ;;  %v8733_v13 = vld [vmem:[#allocation13 + $0xb4] ss:$8 sps:$4 sm:$0xff]  }
 0xba2   : > { %5919 = vmatprep.subr.bf16.mxu0 %v8610_v29  ;;  %v8731_v29 = vld [vmem:[#allocation13 + $0xb0] ss:$8 sps:$4 sm:$0xff]  }
 0xba5   : > { %5920 = vmatpush1.bf16.msra.mxu0 %v8608_v34  ;;  %v8736_v34 = vld [vmem:[#allocation13 + $0xa4] ss:$8 sps:$4 sm:$0xff]  }
 0xba6   : > { %5921 = vmatprep.subr.bf16.mxu0 %v8613_v16  ;;  %v8734_v16 = vld [vmem:[#allocation13 + $0xa0] ss:$8 sps:$4 sm:$0xff]  }
 0xba9   : > { %5922 = vmatpush1.bf16.msra.mxu0 %v8611_v17  ;;  %v8739_v17 = vld [vmem:[#allocation13 + $0x94] ss:$8 sps:$4 sm:$0xff]  }
 0xbaa   : > { %5923 = vmatprep.subr.bf16.mxu0 %v8616_v36  ;;  %v8737_v36 = vld [vmem:[#allocation13 + $0x90] ss:$8 sps:$4 sm:$0xff]  }
 0xbad   : > { %5924 = vmatpush1.bf16.msra.mxu0 %v8614_v37 }
 0xbae   : > { %5925 = vmatprep.subr.bf16.mxu0 %v8619_v12 }
 0xbb1   : > { %5926 = vmatpush1.bf16.msra.mxu0 %v8617_v38 }
 0xbb2   : > { %5927 = vmatprep.subr.bf16.mxu0 %v8622_v40  ;;  %v5437_v40 = vld [vmem:[#allocation15 + $0x6] ss:$8 sm:$0x3] }
 0xbb5   : > { %5928 = vmatpush1.bf16.msra.mxu0 %v8620_v41 }
 0xbb6   : > { %5929 = vmatprep.subr.bf16.mxu0 %v8625_v42 }
 0xbb9   : > { %5930 = vmatpush2.bf16.msra.mxu0 %v8623_v43 }
 0xbba   : > { %5931 = vmatprep.subr.bf16.mxu0 %v8628_v46  ;;  %v5964_v46 = vrot.slane %v5437_v40, %v9404_v6 }
 0xbbd   : > { %5932 = vmatpush2.bf16.msra.mxu0 %v8626_v47 }
 0xbbe   : > { %5933 = vmatprep.subr.bf16.mxu0 %v8631_v49  ;;  %v5960_v49 = vrot.slane %v5437_v40, %v9407_v8 }
 0xbc1   : > { %5934 = vmatpush2.bf16.msra.mxu0 %v8629_v51 }
 0xbc2   : > { %5935 = vmatprep.subr.bf16.mxu0 %v8634_v52 }
 0xbc5   : > { %5936 = vmatpush2.bf16.msra.mxu0 %v8632_v53 }
 0xbc6   : > { %5937 = vmatprep.subr.bf16.mxu0 %v8637_v54 }
 0xbc9   : > { %5938 = vmatpush2.bf16.msra.mxu0 %v8635_v55 }
 0xbca   : > { %5939 = vmatprep.subr.bf16.mxu0 %v8640_v56 }
 0xbcd   : > { %5940 = vmatpush2.bf16.msra.mxu0 %v8638_v57 }
 0xbce   : > { %5941 = vmatprep.subr.bf16.mxu0 %v8643_v19 }
 0xbd1   : > { %5942 = vmatpush2.bf16.msra.mxu0 %v8641_v58 }
 0xbd2   : > { %5943 = vmatprep.subr.bf16.mxu0 %v8646_v14 }
 0xbd5   : > { %5944 = vmatpush2.bf16.msra.mxu0 %v8644_v59 }
 0xbd6   : > { %6230 = vmatprep.subr.bf16.mxu0 %v8697_v7  ;;  %v8746_v7 = vld [vmem:[%s9656_s11 + $0x30] sm:$0xff]  }
 0xbd8   : > { %5946 = vmatmul.mubr.bf16.vlgmr.msra.gmra.mxu0 %v9514_v50  ;;  %v8722_v50 = vld [vmem:[#allocation13 + $0xe0] ss:$8 sps:$4 sm:$0xff]  }
 0xbd9   : > { %6231 = vmatpush1.bf16.msra.mxu0 %v8695_v30  ;;  %v8745_v30 = vld [vmem:[%s9656_s11 + $0x70] sm:$0xff]  }
 0xbda   : > { %6232 = vmatprep.subr.bf16.mxu0 %v8700_v44  ;;  %v8747_v44 = vld [vmem:[%s9656_s11 + $0x68] sm:$0xff]  }
 0xbdd   : > { %6233 = vmatpush1.bf16.msra.mxu0 %v8698_v45  ;;  %v8748_v45 = vld [vmem:[%s9656_s11 + $0x28] sm:$0xff]  }
 0xbde   : > { %6234 = vmatprep.subr.bf16.mxu0 %v8703_v9  ;;  %v8749_v9 = vld [vmem:[%s9656_s11 + $0x60] sm:$0xff]  }
 0xbe1   : > { %6235 = vmatpush1.bf16.msra.mxu0 %v8701_v4  ;;  %v8750_v4 = vld [vmem:[%s9656_s11 + $0x20] sm:$0xff]  }
 0xbe2   : > { %6236 = vmatprep.subr.bf16.mxu0 %v8706_v10  ;;  %v8751_v10 = vld [vmem:[%s9656_s11 + $0x58] sm:$0xff]  }
 0xbe5   : > { %6237 = vmatpush1.bf16.msra.mxu0 %v8704_v33  ;;  %v8752_v33 = vld [vmem:[%s9656_s11 + $0x18] sm:$0xff]  }
 0xbe6   : > { %6238 = vmatprep.subr.bf16.mxu0 %v8709_v32  ;;  %v8753_v32 = vld [vmem:[%s9656_s11 + $0x50] sm:$0xff]  }
 0xbe9   : > { %6239 = vmatpush1.bf16.msra.mxu0 %v8707_v39  ;;  %v8754_v39 = vld [vmem:[%s9656_s11 + $0x10] sm:$0xff]  }
 0xc58   : > { %v5474_v63 = vpop.f32.mrf.mxu0 }
 0xc5a   : > { %v5476_v1 = vpop.f32.mrf.mxu0 }
 0xc5c   : > { %v5478_v2 = vpop.f32.mrf.mxu0 }
 0xc5d   : > { %v5483_v35 = vpack.c.bf16 %v5478_v2, %v5474_v63  ;;  %v8742_v2 = vld [vmem:[#allocation13 + $0x84] ss:$8 sps:$4 sm:$0xff]  }
 0xc5e   : > { %v5480_v3 = vpop.f32.mrf.mxu0 }
 0xc5f   : > { %v5484_v5 = vpack.c.bf16 %v5480_v3, %v5476_v1  ;;  %v5976_v1 = vpack.c.bf16 %v5975_v31, %v5975_v31  ;;  %v8740_v3 = vld [vmem:[#allocation13 + $0x80] ss:$8 sps:$4 sm:$0xff]  }
 0xc61   : > { %5742 = vmatprep.mubr.bf16.mxu1 %v5484_v5  ;;  %v8743_v5 = vld [vmem:[%s9656_s11 + $0x78] sm:$0xff]  }
 0xc62   : > { %5743 = vmatmul.mubr.bf16.vlgmr.msra.gmra.mxu1 %v5483_v35  ;;  %v8744_v35 = vld [vmem:[%s9656_s11 + $0x38] sm:$0xff]  }
 0xc63   : > { %6014 = vmatprep.mubr.bf16.mxu1 %v9079_v48  ;;  %v8712_v48 = vld [vmem:[#allocation13 + $0x24] ss:$8 sps:$4 sm:$0xff]  }
 0xc64   : > { %6240 = vmatprep.subr.bf16.mxu0 %v8712_v48 }
 0xc65   : > { %6241 = vmatpush1.bf16.msra.mxu0 %v8710_v15 }
 0xc66   : > { %6242 = vmatprep.subr.bf16.mxu0 %v8715_v18 }
 0xc69   : > { %6243 = vmatpush1.bf16.msra.mxu0 %v8713_v20 }
 0xc6a   : > { %6244 = vmatprep.subr.bf16.mxu0 %v8718_v21 }
 0xc6d   : > { %6245 = vmatpush1.bf16.msra.mxu0 %v8716_v22 }
 0xc6e   : > { %6246 = vmatprep.subr.bf16.mxu0 %v8721_v23  ;;  %v8755_v23 = vld [vmem:[%s9656_s11 + $0x48] sm:$0xff]  }
 0xc71   : > { %6247 = vmatpush2.bf16.msra.mxu0 %v8719_v24  ;;  %v8756_v24 = vld [vmem:[%s9656_s11 + $0x8] sm:$0xff]  }
 0xc72   : > { %6248 = vmatprep.subr.bf16.mxu0 %v8724_v25  ;;  %v8757_v25 = vld [vmem:[%s9656_s11 + $0x40] sm:$0xff]  }
 0xc75   : > { %6249 = vmatpush2.bf16.msra.mxu0 %v8722_v50  ;;  %v8758_v50 = vld [vmem:[%s9656_s11] sm:$0xff]  }
 0xc76   : > { %6250 = vmatprep.subr.bf16.mxu0 %v8727_v26  ;;  %v6056_v26 = vld [vmem:[#allocation15 + $0x7] ss:$8 sm:$0x3] }
 0xc79   : > { %6251 = vmatpush2.bf16.msra.mxu0 %v8725_v11  ;;  %v6063_v11 = vrot.slane %v6056_v26, %v9407_v8  ;;  %v8761_v8 = vld [vmem:[%s9695_s12 + $0x28] sm:$0xff]  }
 0xc7a   : > { %6252 = vmatprep.subr.bf16.mxu0 %v8730_v27  ;;  %v6067_v27 = vrot.slane %v6056_v26, %v9404_v6  ;;  %v8760_v6 = vld [vmem:[%s9695_s12 + $0x30] sm:$0xff]  }
 0xc7d   : > { %6253 = vmatpush2.bf16.msra.mxu0 %v8728_v28 }
 0xc7e   : > { %6254 = vmatprep.subr.bf16.mxu0 %v8733_v13 }
 0xc81   : > { %6255 = vmatpush2.bf16.msra.mxu0 %v8731_v29 }
 0xc82   : > { %6256 = vmatprep.subr.bf16.mxu0 %v8736_v34 }
 0xc85   : > { %6257 = vmatpush2.bf16.msra.mxu0 %v8734_v16 }
 0xc86   : > { %6258 = vmatprep.subr.bf16.mxu0 %v8739_v17 }
 0xc89   : > { %6259 = vmatpush2.bf16.msra.mxu0 %v8737_v36 }
 0xc8a   : > { %6260 = vmatprep.subr.bf16.mxu0 %v8742_v2 }
 0xc8d   : > { %6261 = vmatpush2.bf16.msra.mxu0 %v8740_v3 }
 0xc8e   : > { %7635 = vmatprep.subr.bf16.mxu0 %v9076_v0 }
 0xc98   : > { %v5947_v37 = vpop.f32.mrf.mxu0 }
 0xc9a   : > { %v5949_v12 = vpop.f32.mrf.mxu0 }
 0xc9c   : > { %v5951_v41 = vpop.f32.mrf.mxu0 }
 0xc9e   : > { %v5953_v53 = vpop.f32.mrf.mxu0 }
 0xd22   : > { %v5744_v38 = vpop.f32.mrf.mxu1 }
 0xd23   : > { %v5948_v47 = vadd.f32 %v5947_v37, %v5744_v38  ;;  %v8759_v38 = vld [vmem:[%s9695_s12 + $0x38] sm:$0xff]  }
 0xd24   : > { %v5746_v42 = vpop.f32.mrf.mxu1 }
 0xd25   : > { %v5950_v43 = vadd.f32 %v5949_v12, %v5746_v42  ;;  %v5967_v19 = vadd.f32 %v5960_v49, %v5948_v47  ;;  %v8763_v42 = vld [vmem:[%s9695_s12 + $0x18] sm:$0xff]   ;;  %v8766_v47 = vld [vmem:[%s9695_s12] sm:$0xff]  }
 0xd26   : > { %v5748_v51 = vpop.f32.mrf.mxu1 }
 0xd27   : > { %v5952_v52 = vadd.f32 %v5951_v41, %v5748_v51  ;;  %v5968_v55 = vadd.f32 %v5964_v46, %v5950_v43  ;;  %v5971_v61 = vmax.f32 %v5967_v19, 0.0  ;;  %v8762_v41 = vld [vmem:[%s9695_s12 + $0x20] sm:$0xff]   ;;  %v8764_v43 = vld [vmem:[%s9695_s12 + $0x10] sm:$0xff]  }
 0xd28   : > { %v5750_v54 = vpop.f32.mrf.mxu1  ;;  %v8768_v51 = vld [vmem:[%s9696_s23 + $0x10] sm:$0xff]  }
 0xd29   : > { %v5969_v56 = vadd.f32 %v5960_v49, %v5952_v52  ;;  %v5954_v57 = vadd.f32 %v5953_v53, %v5750_v54  ;;  %v5972_v59 = vmax.f32 %v5968_v55, 0.0  ;;  %v8767_v49 = vld [vmem:[%s9696_s23 + $0x18] sm:$0xff]   ;;  %v6305_v53 = vld [vmem:[#allocation15 + $0x20] ss:$0 sm:$0xff] }
 0xd2b   : > { %v5970_v58 = vadd.f32 %v5964_v46, %v5954_v57  ;;  %v5973_v14 = vmax.f32 %v5969_v56, 0.0  ;;  %v8765_v46 = vld [vmem:[%s9695_s12 + $0x8] sm:$0xff]  }
 0xd2d   : > { %v5974_v60 = vmax.f32 %v5970_v58, 0.0  ;;  %v5977_v63 = vpack.c.bf16 %v5973_v14, %v5971_v61  ;;  %v6461_v61 = vld [vmem:[#allocation15 + $0x21] ss:$0 sm:$0xff] }
 0xd2f   : > { %v5978_v62 = vpack.c.bf16 %v5974_v60, %v5972_v59  ;;  %v8769_v59 = vld [vmem:[%s9696_s23 + $0x8] sm:$0xff]   ;;  %v8770_v60 = vld [vmem:[%s9696_s23] sm:$0xff]  }
 0xd31   : > { %5996 = vmatprep.subr.bf16.mxu1 %v5978_v62 }
 0xd32   : > { %5997 = vmatpush1.bf16.msra.mxu1 %v5977_v63 }
 0xd33   : > { %7533 = vmatprep.subr.bf16.mxu1 %v8743_v5 }
 0xd35   : > { %7451 = vmatmul.mubr.msk.bf16.vlgmr.msra.gmra.mxu1 %vm674_vm3, %v5976_v1 }
 0xd36   : > { %7534 = vmatpush3.bf16.msra.mxu1 %v8744_v35  ;;  %v6560_v35 = vld [vmem:[#allocation15 + $0x22] ss:$0 sm:$0xff] }
 0xd37   : > { %7535 = vmatprep.subr.bf16.mxu1 %v8745_v30 }
 0xd3a   : > { %7536 = vmatpush3.bf16.msra.mxu1 %v8746_v7 }
 0xd3b   : > { %7537 = vmatprep.subr.bf16.mxu1 %v8747_v44 }
 0xd3e   : > { %7538 = vmatpush3.bf16.msra.mxu1 %v8748_v45 }
 0xd3f   : > { %7539 = vmatprep.subr.bf16.mxu1 %v8749_v9 }
 0xd42   : > { %7540 = vmatpush3.bf16.msra.mxu1 %v8750_v4 }
 0xd43   : > { %7541 = vmatprep.subr.bf16.mxu1 %v8751_v10 }
 0xd46   : > { %7542 = vmatpush3.bf16.msra.mxu1 %v8752_v33 }
 0xd47   : > { %7543 = vmatprep.subr.bf16.mxu1 %v8753_v32 }
 0xd4a   : > { %7544 = vmatpush3.bf16.msra.mxu1 %v8754_v39 }
 0xd4b   : > { %7545 = vmatprep.subr.bf16.mxu1 %v8755_v23 }
 0xd4e   : > { %7546 = vmatpush3.bf16.msra.mxu1 %v8756_v24 }
 0xd4f   : > { %7547 = vmatprep.subr.bf16.mxu1 %v8757_v25 }
 0xd52   : > { %7548 = vmatpush3.bf16.msra.mxu1 %v8758_v50 }
 0xd53   : > { %7615 = vmatprep.subr.bf16.mxu1 %v9076_v0 }
 0xdf5   : > { %v6016_v48 = vpop.f32.mrf.mxu1 }
 0xdf6   : > { %v6057_v20 = vpack.c.bf16 %v6016_v48, %v6016_v48 }
 0xdf7   : > { %v6018_v15 = vpop.f32.mrf.mxu1 }
 0xdf8   : > { %v6058_v18 = vpack.c.bf16 %v6018_v15, %v6018_v15 }
 0xdf9   : > { %v6020_v21 = vpop.f32.mrf.mxu1 }
 0xdfa   : > { %6262 = vmatprep.mubr.bf16.mxu0 %v6058_v18 }
 0xdfb   : > { %v6021_v22 = vpop.f32.mrf.mxu1  ;;  %6263 = vmatmul.mubr.bf16.vlgmr.msra.gmra.mxu0 %v6057_v20 }
 0xdfc   : > { %7643 = vmatprep.mubr.msk.bf16.mxu0 %vm9077_vm0, %v9076_v0  ;;  %7636 = vmatpush3.bf16.msra.mxu0 %v8767_v49 }
 0xdfd   : > { %7637 = vmatprep.subr.bf16.mxu0 %v9076_v0 }
 0xe00   : > { %7638 = vmatpush3.bf16.msra.mxu0 %v8768_v51 }
 0xe01   : > { %7639 = vmatprep.subr.bf16.mxu0 %v9076_v0 }
 0xe04   : > { %7640 = vmatpush3.bf16.msra.mxu0 %v8769_v59 }
 0xe05   : > { %7641 = vmatprep.subr.bf16.mxu0 %v9076_v0 }
 0xe08   : > { %7642 = vmatpush3.bf16.msra.mxu0 %v8770_v60 }
 0xebb   : > { %v6264_v28 = vpop.f32.mrf.mxu0 }
 0xebc   : > { %v6265_v13 = vadd.f32 %v6264_v28, %v6063_v11 }
 0xebd   : > { %v6266_v29 = vpop.f32.mrf.mxu0 }
 0xebe   : > { %v6267_v34 = vadd.f32 %v6266_v29, %v6067_v27  ;;  %v6271_v16 = vmax.f32 %v6265_v13, 0.0 }
 0xebf   : > { %v6268_v17 = vpop.f32.mrf.mxu0 }
 0xec0   : > { %v6272_v36 = vmax.f32 %v6267_v34, 0.0  ;;  %v6306_v40 = vpack.c.bf16 %v6271_v16, %v6271_v16 }
 0xec1   : > { %v6269_v37 = vpop.f32.mrf.mxu0 }
 0xec2   : > { %v6307_v12 = vpack.c.bf16 %v6272_v36, %v6272_v36 }
 0xec4   : > { %6436 = vmatprep.mubr.bf16.mxu1 %v6307_v12 }
 0xec5   : > { %6437 = vmatmul.mubr.bf16.vlgmr.msra.gmra.mxu1 %v6306_v40 }
 0xec6   : > { %7616 = vmatpush3.bf16.msra.mxu1 %v8759_v38  ;;  %7631 = vmatprep.mubr.msk.bf16.mxu1 %vm9077_vm0, %v9076_v0 }
 0xec7   : > { %7617 = vmatprep.subr.bf16.mxu1 %v9076_v0 }
 0xeca   : > { %7618 = vmatpush3.bf16.msra.mxu1 %v8760_v6 }
 0xecb   : > { %7619 = vmatprep.subr.bf16.mxu1 %v9076_v0 }
 0xece   : > { %7620 = vmatpush3.bf16.msra.mxu1 %v8761_v8 }
 0xecf   : > { %7621 = vmatprep.subr.bf16.mxu1 %v9076_v0 }
 0xed2   : > { %7622 = vmatpush3.bf16.msra.mxu1 %v8762_v41 }
 0xed3   : > { %7623 = vmatprep.subr.bf16.mxu1 %v9076_v0 }
 0xed6   : > { %7624 = vmatpush3.bf16.msra.mxu1 %v8763_v42 }
 0xed7   : > { %7625 = vmatprep.subr.bf16.mxu1 %v9076_v0 }
 0xeda   : > { %7626 = vmatpush3.bf16.msra.mxu1 %v8764_v43 }
 0xedb   : > { %7627 = vmatprep.subr.bf16.mxu1 %v9076_v0 }
 0xede   : > { %7628 = vmatpush3.bf16.msra.mxu1 %v8765_v46 }
 0xedf   : > { %7629 = vmatprep.subr.bf16.mxu1 %v9076_v0 }
 0xee2   : > { %7630 = vmatpush3.bf16.msra.mxu1 %v8766_v47 }
 0xf85   : > { %v7549_v52 = vpop.f32.mrf.mxu1 }
 0xf87   : > { %v7550_v54 = vpop.f32.mrf.mxu1 }
 0xf88   : > { %v7551_v55 = vadd.f32 %v7550_v54, %v7549_v52 }
 0xf89   : > { %v7552_v56 = vpop.f32.mrf.mxu1 }
 0xf8a   : > { %v6439_v57 = vadd.f32 %v7551_v55, %v6305_v53 }
 0xf8b   : > { %v7553_v19 = vpop.f32.mrf.mxu1 }
 0xf8c   : > { %v6444_v58 = vmax.f32 %v6439_v57, 0.0 }
 0xf8e   : > { %v6462_v14 = vpack.c.bf16 %v6444_v58, %v6444_v58 }
 0xf90   : > { %7632 = vmatmul.mubr.bf16.vlgmr.msra.gmra.mxu1 %v6462_v14 }
0x1050   : > { %v6545_v31 = vpop.f32.mrf.mxu1 }
0x1051   : > { %v6546_v62 = vadd.f32 %v6545_v31, %v6461_v61 }
0x1052   : > { %v7633_v63 = vpop.f32.mrf.mxu1 }
0x1053   : > { %v6551_v1 = vmax.f32 %v6546_v62, 0.0 }
0x1054   : > { %v6548_v2 = vpop.f32.mrf.mxu1 }
0x1055   : > { %v6561_v3 = vpack.c.bf16 %v6551_v1, %v6551_v1 }
0x1056   : > { %v7634_v5 = vpop.f32.mrf.mxu1 }
0x1057   : > { %7644 = vmatmul.mubr.msk.bf16.vlgmr.msra.gmra.mxu0 %vm6586_vm6, %v6561_v3 }
0x1117   : > { %v6624_v0 = vpop.f32.mrf.mxu0 }
0x1118   : > { %v6625_v30 = vadd.f32 %v6624_v0, %v6560_v35 }
0x1119   : > { %v7645_v7 = vpop.f32.mrf.mxu0 }
0x111a   : > { %6631 = vst.msk [vmem:[%s665_s18] sm:$0x3] %vm6630_vm7, %v6625_v30 }
0x111b   : > { %v6627_v44 = vpop.f32.mrf.mxu0 }
0x111d   : > { %v7646_v45 = vpop.f32.mrf.mxu0 }
0x111e PF: > { %p29_p12 = scmp.ge.s32.totalorder %s9279_s4, 6   ;;  %s9698_s18 = smov %s9049_s19 }
0x111f   : > { %s9699_s19 = smov %s9053_s20  ;;  %s9700_s20 = smov %s9291_s13 }
0x1120   : > { %s9701_s21 = smov %s9279_s4  ;;  %31 = sbr.rel (!%p29_p12) target bundleno = 14 (0xe), region = 171 }
0x1125   :  { %6651 = vsyncpa [#allocation3], 1 }
0x1126   :  { %6653 = vsyncpa [#allocation3 + $0x1], 1 }
0x1127   :  { %6654 = vsyncpa [#allocation5], 1 }
0x1128   :  { %6655 = vsyncpa [#allocation8], 1 }
0x1129   :  { %6656 = vsyncpa [#allocation11], 1 }
0x112a   :  { %6657 = vsyncpa [#allocation14], 1 }

</bundles_post_ra>
